<compile_context>
chip_gen: v7x
topology: tpu7x:2x2x1
jax: 0.10.0
libtpu: 0.0.40
codegen_flags: <defaults>
</compile_context>

<pallas_src>
import functools

import jax
import jax.numpy as jnp
from jax.experimental import pallas as pl
from jax.experimental.pallas import tpu as pltpu


def _aspp_kernel(x_ref, w_ref, gamma_ref, beta_ref, gmat_ref, gmatT_ref,
                 o_ref, xpad_ref, acc_ref,
                 *, H, W, Ho, Wo, KH, KW, padding, dilation, cg, eps):
    """One (batch, Cout-tile) grid step.

    x_ref:     (1, H, W, Cin)        unpadded bf16 input block
    w_ref:     (KH, KW, Cin, TILE_C) bf16 weight tile
    gamma_ref: (1, TILE_C)  f32 GroupNorm scale tile
    beta_ref:  (1, TILE_C)  f32 GroupNorm shift tile
    gmat_ref:  (TILE_C, G_t) one-hot tile-local channel->group matrix (f32)
    gmatT_ref: (G_t, TILE_C) its transpose
    o_ref:     (1, Ho, Wo, TILE_C)   f32 output block
    xpad_ref:  (Hp, Wp, Cin) bf16 VMEM scratch (in-kernel zero padding)
    acc_ref:   (Ho*Wo, TILE_C) f32 VMEM scratch accumulator
    """
    Cin = x_ref.shape[-1]
    TILE_C = w_ref.shape[-1]

    # ---- in-kernel zero padding: zero the halo, copy the interior ----
    xpad_ref[...] = jnp.zeros_like(xpad_ref)
    xpad_ref[padding:padding + H, padding:padding + W, :] = x_ref[0]

    # ---- dilated conv: KH*KW shifted-window matmuls on the MXU (bf16 -> f32) ----
    first = True
    for kh in range(KH):
        for kw in range(KW):
            patch = xpad_ref[kh * dilation: kh * dilation + Ho,
                             kw * dilation: kw * dilation + Wo, :]   # (Ho, Wo, Cin)
            tap = jnp.dot(patch.reshape(Ho * Wo, Cin), w_ref[kh, kw],
                          preferred_element_type=jnp.float32)        # (Ho*Wo, TILE_C)
            if first:
                acc_ref[...] = tap
                first = False
            else:
                acc_ref[...] += tap

    # ---- GroupNorm (two-pass, f32) + affine + ReLU ----
    n_elem = float(Ho * Wo * cg)
    gmat = gmat_ref[...]        # (TILE_C, G_t)
    gmatT = gmatT_ref[...]      # (G_t, TILE_C)

    ch_sum = jnp.sum(acc_ref[...], axis=0, keepdims=True)                     # (1, TILE_C)
    g_mean = jnp.dot(ch_sum, gmat, preferred_element_type=jnp.float32) / n_elem
    mean_c = jnp.dot(g_mean, gmatT, preferred_element_type=jnp.float32)       # (1, TILE_C)

    diff = acc_ref[...] - mean_c
    ch_sq = jnp.sum(diff * diff, axis=0, keepdims=True)                       # (1, TILE_C)
    g_var = jnp.dot(ch_sq, gmat, preferred_element_type=jnp.float32) / n_elem
    inv_c = jnp.dot(jax.lax.rsqrt(g_var + eps), gmatT,
                    preferred_element_type=jnp.float32)                       # (1, TILE_C)

    scale_c = inv_c * gamma_ref[...]                                          # (1, TILE_C)
    y = (acc_ref[...] - mean_c) * scale_c + beta_ref[...]
    y = jnp.maximum(y, 0.0)                    # ReLU (abn=False branch)
    o_ref[0] = y.reshape(Ho, Wo, TILE_C)


def aspp_module(x_nchw, weight_hwio, gamma, beta, *, padding, dilation,
                groups=32, eps=1e-5):
    """Forward of _ASPPModule (Conv2d no-bias -> GroupNorm(32) -> ReLU).

    x_nchw:      (N, Cin, H, W)      float32
    weight_hwio: (KH, KW, Cin, Cout) float32
    gamma, beta: (Cout,)             float32
    returns      (N, Cout, Ho, Wo)   float32
    """
    N, Cin, H, W = x_nchw.shape
    KH, KW, wcin, Cout = weight_hwio.shape
    assert wcin == Cin
    assert Cout % groups == 0
    cg = Cout // groups                       # channels per group

    Ho = H + 2 * padding - dilation * (KH - 1)
    Wo = W + 2 * padding - dilation * (KW - 1)
    assert Ho > 0 and Wo > 0, "padding/dilation combo gives empty output"
    Hp, Wp = H + 2 * padding, W + 2 * padding

    # ---- lane-dense output channels: pad Cout up to a multiple of 128.
    # Padded channels are zero-weight and form whole fake groups, so GroupNorm
    # stats of the real groups are untouched; sliced away afterwards.
    Cout_pad = ((Cout + 127) // 128) * 128
    if (Cout_pad - Cout) % cg != 0:
        Cout_pad = Cout                        # fall back: keep original width

    # ---- Cout tile aligned to group boundaries (128 native on v5e/v7x).
    tile_c = Cout_pad
    if Cout_pad % 128 == 0 and 128 % cg == 0:
        tile_c = 128
    G_t = tile_c // cg                         # groups per tile
    num_ct = Cout_pad // tile_c

    # ---- prepare inputs (bf16 activations/weights for the MXU) ----
    xh = jnp.transpose(x_nchw, (0, 2, 3, 1)).astype(jnp.bfloat16)   # NHWC bf16
    w = weight_hwio.astype(jnp.bfloat16)
    gamma_f = gamma.astype(jnp.float32)
    beta_f = beta.astype(jnp.float32)
    if Cout_pad != Cout:
        pad_c = Cout_pad - Cout
        w = jnp.pad(w, ((0, 0), (0, 0), (0, 0), (0, pad_c)))
        gamma_f = jnp.pad(gamma_f, (0, pad_c), constant_values=1.0)
        beta_f = jnp.pad(beta_f, (0, pad_c))
    gamma2 = gamma_f.reshape(1, Cout_pad)
    beta2 = beta_f.reshape(1, Cout_pad)

    # tile-local channel -> group one-hot (same for every tile) + its transpose
    gmat = (jnp.arange(tile_c)[:, None] // cg
            == jnp.arange(G_t)[None, :]).astype(jnp.float32)         # (tile_c, G_t)
    gmatT = gmat.T                                                    # (G_t, tile_c)

    # ---- VMEM budget (double-buffered blocks + scratches) with headroom ----
    blk_bytes = (2 * H * W * Cin * 2
                 + 2 * KH * KW * Cin * tile_c * 2
                 + 2 * Ho * Wo * tile_c * 4
                 + 4 * tile_c * 4
                 + 4 * tile_c * G_t * 4
                 + Hp * Wp * Cin * 2
                 + Ho * Wo * tile_c * 4)
    vmem_limit = int(min(64 * 1024 * 1024, max(16 * 1024 * 1024, 2 * blk_bytes)))

    cost = pl.CostEstimate(
        flops=int(2 * N * Ho * Wo * KH * KW * Cin * Cout_pad),
        transcendentals=int(N * (Cout_pad // cg)),
        bytes_accessed=int(N * H * W * Cin * 2
                           + KH * KW * Cin * Cout_pad * 2
                           + N * Ho * Wo * Cout_pad * 4))

    kernel = functools.partial(_aspp_kernel, H=H, W=W, Ho=Ho, Wo=Wo, KH=KH,
                               KW=KW, padding=padding, dilation=dilation,
                               cg=cg, eps=eps)

    out_nhwc = pl.pallas_call(
        kernel,
        out_shape=jax.ShapeDtypeStruct((N, Ho, Wo, Cout_pad), jnp.float32),
        grid_spec=pltpu.PrefetchScalarGridSpec(
            num_scalar_prefetch=0,
            grid=(N, num_ct),
            in_specs=[
                pl.BlockSpec((1, H, W, Cin), lambda n, c: (n, 0, 0, 0)),
                pl.BlockSpec((KH, KW, Cin, tile_c), lambda n, c: (0, 0, 0, c)),
                pl.BlockSpec((1, tile_c), lambda n, c: (0, c)),
                pl.BlockSpec((1, tile_c), lambda n, c: (0, c)),
                pl.BlockSpec((tile_c, G_t), lambda n, c: (0, 0)),
                pl.BlockSpec((G_t, tile_c), lambda n, c: (0, 0)),
            ],
            out_specs=pl.BlockSpec((1, Ho, Wo, tile_c),
                                   lambda n, c: (n, 0, 0, c)),
            scratch_shapes=[
                pltpu.VMEM((Hp, Wp, Cin), jnp.bfloat16),   # padded-input scratch
                pltpu.VMEM((Ho * Wo, tile_c), jnp.float32) # conv accumulator
            ],
        ),
        compiler_params=pltpu.CompilerParams(
            dimension_semantics=("parallel", "parallel"),
            vmem_limit_bytes=vmem_limit),
        cost_estimate=cost,
    )(xh, w, gamma2, beta2, gmat, gmatT)

    out_nhwc = out_nhwc[..., :Cout]                         # drop lane padding
    return jnp.transpose(out_nhwc, (0, 3, 1, 2))            # back to NCHW


def _reference(x_nchw, weight_hwio, gamma, beta, *, padding, dilation,
               groups=32, eps=1e-5):
    """Pure-JAX reference (same bf16 MXU precision for the conv, f32 GroupNorm)."""
    conv = jax.lax.conv_general_dilated(
        x_nchw.astype(jnp.bfloat16), weight_hwio.astype(jnp.bfloat16),
        window_strides=(1, 1),
        padding=[(padding, padding), (padding, padding)],
        rhs_dilation=(dilation, dilation),
        dimension_numbers=('NCHW', 'HWIO', 'NCHW'),
        preferred_element_type=jnp.float32)
    N, C, H, W = conv.shape
    g = conv.reshape(N, groups, C // groups, H, W)
    mean = g.mean(axis=(2, 3, 4), keepdims=True)
    var = g.var(axis=(2, 3, 4), keepdims=True)
    gn = ((g - mean) * jax.lax.rsqrt(var + eps)).reshape(N, C, H, W)
    gn = gn * gamma[None, :, None, None] + beta[None, :, None, None]
    return jnp.maximum(gn, 0.0)


if __name__ == "__main__":
    # GroupNorm(32, planes) needs planes divisible by 32.
    N, Cin, H, W = 2, 16, 16, 16
    Cout, KH, KW = 32, 3, 3
    padding, dilation = 2, 2

    key = jax.random.PRNGKey(0)
    kx, kw_, kg, kb = jax.random.split(key, 4)

    x = jax.random.normal(kx, (N, Cin, H, W), dtype=jnp.float32)

    # kaiming_normal_ (fan_in, relu gain): std = sqrt(2 / fan_in)
    fan_in = Cin * KH * KW
    weight = jax.random.normal(kw_, (KH, KW, Cin, Cout), dtype=jnp.float32) \
        * jnp.sqrt(2.0 / fan_in)

    # GroupNorm affine params (exercise the affine path)
    gamma = 1.0 + 0.1 * jax.random.normal(kg, (Cout,), jnp.float32)
    beta = 0.1 * jax.random.normal(kb, (Cout,), jnp.float32)

    out = aspp_module(x, weight, gamma, beta, padding=padding, dilation=dilation)
    out = jax.block_until_ready(out)

    ref = _reference(x, weight, gamma, beta, padding=padding, dilation=dilation)
    assert out.shape == (N, Cout, H, W)
    err = jnp.max(jnp.abs(out - ref))
    assert jnp.allclose(out, ref, atol=1e-2, rtol=1e-2), f"max err {err}"

    print("KERNEL_OK")
</pallas_src>

<mosaic_0001>
module attributes {stable_mosaic.version = 11 : i64} {
  func.func @_aspp_kernel(%arg0: i32, %arg1: i32, %arg2: memref<1x16x16x16xbf16, #tpu.memory_space<vmem>>, %arg3: memref<3x3x16x128xbf16, #tpu.memory_space<vmem>>, %arg4: memref<1x128xf32, #tpu.memory_space<vmem>>, %arg5: memref<1x128xf32, #tpu.memory_space<vmem>>, %arg6: memref<128x128xf32, #tpu.memory_space<vmem>>, %arg7: memref<128x128xf32, #tpu.memory_space<vmem>>, %arg8: memref<1x16x16x128xf32, #tpu.memory_space<vmem>>, %arg9: memref<20x20x16xbf16, #tpu.memory_space<vmem>>, %arg10: memref<256x128xf32, #tpu.memory_space<vmem>>) attributes {dimension_semantics = [#tpu.dimension_semantics<parallel>, #tpu.dimension_semantics<parallel>], iteration_bounds = array<i64: 2, 1>, scalar_prefetch = 0 : i64, scratch_operands = 2 : i64, tpu.core_type = #tpu.core_type<tc>, window_params = [{transform_indices = @transform_0, window_bounds = array<i64: 1, 16, 16, 16>}, {transform_indices = @transform_1, window_bounds = array<i64: 3, 3, 16, 128>}, {transform_indices = @transform_2, window_bounds = array<i64: 1, 128>}, {transform_indices = @transform_3, window_bounds = array<i64: 1, 128>}, {pipeline_mode = #tpu.pipeline_mode<synchronous>, transform_indices = @transform_4, window_bounds = array<i64: 128, 128>}, {pipeline_mode = #tpu.pipeline_mode<synchronous>, transform_indices = @transform_5, window_bounds = array<i64: 128, 128>}, {transform_indices = @transform_6, window_bounds = array<i64: 1, 16, 16, 128>}]} {
    %cst = arith.constant 0.000000e+00 : bf16
    %0 = vector.broadcast %cst : bf16 to vector<20x20x16xbf16>
    %c0 = arith.constant 0 : index
    %c0_0 = arith.constant 0 : index
    %c0_1 = arith.constant 0 : index
    %1 = vector.load %arg9[%c0, %c0_0, %c0_1] : memref<20x20x16xbf16, #tpu.memory_space<vmem>>, vector<20x20x16xbf16>
    tpu.vector_store %arg9[%c0, %c0_0, %c0_1], %0 {strides = array<i32>} : memref<20x20x16xbf16, #tpu.memory_space<vmem>>, vector<20x20x16xbf16>,
    %c0_2 = arith.constant 0 : index
    %c0_3 = arith.constant 0 : index
    %c0_4 = arith.constant 0 : index
    %c0_5 = arith.constant 0 : index
    %2 = vector.load %arg2[%c0_2, %c0_3, %c0_4, %c0_5] : memref<1x16x16x16xbf16, #tpu.memory_space<vmem>>, vector<1x16x16x16xbf16>
    %3 = vector.shape_cast %2 : vector<1x16x16x16xbf16> to vector<16x16x16xbf16>
    %c2 = arith.constant 2 : index
    %c2_6 = arith.constant 2 : index
    %c0_7 = arith.constant 0 : index
    %4 = vector.load %arg9[%c2, %c2_6, %c0_7] : memref<20x20x16xbf16, #tpu.memory_space<vmem>>, vector<16x16x16xbf16>
    tpu.vector_store %arg9[%c2, %c2_6, %c0_7], %3 {strides = array<i32>} : memref<20x20x16xbf16, #tpu.memory_space<vmem>>, vector<16x16x16xbf16>,
    %c0_8 = arith.constant 0 : index
    %c0_9 = arith.constant 0 : index
    %c0_10 = arith.constant 0 : index
    %5 = vector.load %arg9[%c0_8, %c0_9, %c0_10] : memref<20x20x16xbf16, #tpu.memory_space<vmem>>, vector<16x16x16xbf16>
    %6 = vector.shape_cast %5 : vector<16x16x16xbf16> to vector<256x16xbf16>
    %c0_11 = arith.constant 0 : index
    %c0_12 = arith.constant 0 : index
    %c0_13 = arith.constant 0 : index
    %c0_14 = arith.constant 0 : index
    %7 = vector.load %arg3[%c0_11, %c0_12, %c0_13, %c0_14] : memref<3x3x16x128xbf16, #tpu.memory_space<vmem>>, vector<1x1x16x128xbf16>
    %8 = vector.shape_cast %7 : vector<1x1x16x128xbf16> to vector<16x128xbf16>
    %cst_15 = arith.constant dense<0.000000e+00> : vector<256x128xf32>
    %9 = tpu.matmul %6, %8, %cst_15 {dimension_numbers = #tpu.dot_dimension_numbers<[1], [0], [0], [1], [0, 0, 1, 1], [], []>} : vector<256x16xbf16>, vector<16x128xbf16>, vector<256x128xf32> -> vector<256x128xf32>
    %c0_16 = arith.constant 0 : index
    %c0_17 = arith.constant 0 : index
    %10 = vector.load %arg10[%c0_16, %c0_17] : memref<256x128xf32, #tpu.memory_space<vmem>>, vector<256x128xf32>
    tpu.vector_store %arg10[%c0_16, %c0_17], %9 {strides = array<i32>} : memref<256x128xf32, #tpu.memory_space<vmem>>, vector<256x128xf32>,
    %c0_18 = arith.constant 0 : index
    %c2_19 = arith.constant 2 : index
    %c0_20 = arith.constant 0 : index
    %11 = vector.load %arg9[%c0_18, %c2_19, %c0_20] : memref<20x20x16xbf16, #tpu.memory_space<vmem>>, vector<16x16x16xbf16>
    %12 = vector.shape_cast %11 : vector<16x16x16xbf16> to vector<256x16xbf16>
    %c0_21 = arith.constant 0 : index
    %c1 = arith.constant 1 : index
    %c0_22 = arith.constant 0 : index
    %c0_23 = arith.constant 0 : index
    %13 = vector.load %arg3[%c0_21, %c1, %c0_22, %c0_23] : memref<3x3x16x128xbf16, #tpu.memory_space<vmem>>, vector<1x1x16x128xbf16>
    %14 = vector.shape_cast %13 : vector<1x1x16x128xbf16> to vector<16x128xbf16>
    %cst_24 = arith.constant dense<0.000000e+00> : vector<256x128xf32>
    %15 = tpu.matmul %12, %14, %cst_24 {dimension_numbers = #tpu.dot_dimension_numbers<[1], [0], [0], [1], [0, 0, 1, 1], [], []>} : vector<256x16xbf16>, vector<16x128xbf16>, vector<256x128xf32> -> vector<256x128xf32>
    %c0_25 = arith.constant 0 : index
    %c0_26 = arith.constant 0 : index
    %16 = vector.load %arg10[%c0_25, %c0_26] : memref<256x128xf32, #tpu.memory_space<vmem>>, vector<256x128xf32>
    %17 = arith.addf %16, %15 : vector<256x128xf32>
    %c0_27 = arith.constant 0 : index
    %c0_28 = arith.constant 0 : index
    %18 = vector.load %arg10[%c0_27, %c0_28] : memref<256x128xf32, #tpu.memory_space<vmem>>, vector<256x128xf32>
    tpu.vector_store %arg10[%c0_27, %c0_28], %17 {strides = array<i32>} : memref<256x128xf32, #tpu.memory_space<vmem>>, vector<256x128xf32>,
    %c0_29 = arith.constant 0 : index
    %c4 = arith.constant 4 : index
    %c0_30 = arith.constant 0 : index
    %19 = vector.load %arg9[%c0_29, %c4, %c0_30] : memref<20x20x16xbf16, #tpu.memory_space<vmem>>, vector<16x16x16xbf16>
    %20 = vector.shape_cast %19 : vector<16x16x16xbf16> to vector<256x16xbf16>
    %c0_31 = arith.constant 0 : index
    %c2_32 = arith.constant 2 : index
    %c0_33 = arith.constant 0 : index
    %c0_34 = arith.constant 0 : index
    %21 = vector.load %arg3[%c0_31, %c2_32, %c0_33, %c0_34] : memref<3x3x16x128xbf16, #tpu.memory_space<vmem>>, vector<1x1x16x128xbf16>
    %22 = vector.shape_cast %21 : vector<1x1x16x128xbf16> to vector<16x128xbf16>
    %cst_35 = arith.constant dense<0.000000e+00> : vector<256x128xf32>
    %23 = tpu.matmul %20, %22, %cst_35 {dimension_numbers = #tpu.dot_dimension_numbers<[1], [0], [0], [1], [0, 0, 1, 1], [], []>} : vector<256x16xbf16>, vector<16x128xbf16>, vector<256x128xf32> -> vector<256x128xf32>
    %c0_36 = arith.constant 0 : index
    %c0_37 = arith.constant 0 : index
    %24 = vector.load %arg10[%c0_36, %c0_37] : memref<256x128xf32, #tpu.memory_space<vmem>>, vector<256x128xf32>
    %25 = arith.addf %24, %23 : vector<256x128xf32>
    %c0_38 = arith.constant 0 : index
    %c0_39 = arith.constant 0 : index
    %26 = vector.load %arg10[%c0_38, %c0_39] : memref<256x128xf32, #tpu.memory_space<vmem>>, vector<256x128xf32>
    tpu.vector_store %arg10[%c0_38, %c0_39], %25 {strides = array<i32>} : memref<256x128xf32, #tpu.memory_space<vmem>>, vector<256x128xf32>,
    %c2_40 = arith.constant 2 : index
    %c0_41 = arith.constant 0 : index
    %c0_42 = arith.constant 0 : index
    %27 = vector.load %arg9[%c2_40, %c0_41, %c0_42] : memref<20x20x16xbf16, #tpu.memory_space<vmem>>, vector<16x16x16xbf16>
    %28 = vector.shape_cast %27 : vector<16x16x16xbf16> to vector<256x16xbf16>
    %c1_43 = arith.constant 1 : index
    %c0_44 = arith.constant 0 : index
    %c0_45 = arith.constant 0 : index
    %c0_46 = arith.constant 0 : index
    %29 = vector.load %arg3[%c1_43, %c0_44, %c0_45, %c0_46] : memref<3x3x16x128xbf16, #tpu.memory_space<vmem>>, vector<1x1x16x128xbf16>
    %30 = vector.shape_cast %29 : vector<1x1x16x128xbf16> to vector<16x128xbf16>
    %cst_47 = arith.constant dense<0.000000e+00> : vector<256x128xf32>
    %31 = tpu.matmul %28, %30, %cst_47 {dimension_numbers = #tpu.dot_dimension_numbers<[1], [0], [0], [1], [0, 0, 1, 1], [], []>} : vector<256x16xbf16>, vector<16x128xbf16>, vector<256x128xf32> -> vector<256x128xf32>
    %c0_48 = arith.constant 0 : index
    %c0_49 = arith.constant 0 : index
    %32 = vector.load %arg10[%c0_48, %c0_49] : memref<256x128xf32, #tpu.memory_space<vmem>>, vector<256x128xf32>
    %33 = arith.addf %32, %31 : vector<256x128xf32>
    %c0_50 = arith.constant 0 : index
    %c0_51 = arith.constant 0 : index
    %34 = vector.load %arg10[%c0_50, %c0_51] : memref<256x128xf32, #tpu.memory_space<vmem>>, vector<256x128xf32>
    tpu.vector_store %arg10[%c0_50, %c0_51], %33 {strides = array<i32>} : memref<256x128xf32, #tpu.memory_space<vmem>>, vector<256x128xf32>,
    %c2_52 = arith.constant 2 : index
    %c2_53 = arith.constant 2 : index
    %c0_54 = arith.constant 0 : index
    %35 = vector.load %arg9[%c2_52, %c2_53, %c0_54] : memref<20x20x16xbf16, #tpu.memory_space<vmem>>, vector<16x16x16xbf16>
    %36 = vector.shape_cast %35 : vector<16x16x16xbf16> to vector<256x16xbf16>
    %c1_55 = arith.constant 1 : index
    %c1_56 = arith.constant 1 : index
    %c0_57 = arith.constant 0 : index
    %c0_58 = arith.constant 0 : index
    %37 = vector.load %arg3[%c1_55, %c1_56, %c0_57, %c0_58] : memref<3x3x16x128xbf16, #tpu.memory_space<vmem>>, vector<1x1x16x128xbf16>
    %38 = vector.shape_cast %37 : vector<1x1x16x128xbf16> to vector<16x128xbf16>
    %cst_59 = arith.constant dense<0.000000e+00> : vector<256x128xf32>
    %39 = tpu.matmul %36, %38, %cst_59 {dimension_numbers = #tpu.dot_dimension_numbers<[1], [0], [0], [1], [0, 0, 1, 1], [], []>} : vector<256x16xbf16>, vector<16x128xbf16>, vector<256x128xf32> -> vector<256x128xf32>
    %c0_60 = arith.constant 0 : index
    %c0_61 = arith.constant 0 : index
    %40 = vector.load %arg10[%c0_60, %c0_61] : memref<256x128xf32, #tpu.memory_space<vmem>>, vector<256x128xf32>
    %41 = arith.addf %40, %39 : vector<256x128xf32>
    %c0_62 = arith.constant 0 : index
    %c0_63 = arith.constant 0 : index
    %42 = vector.load %arg10[%c0_62, %c0_63] : memref<256x128xf32, #tpu.memory_space<vmem>>, vector<256x128xf32>
    tpu.vector_store %arg10[%c0_62, %c0_63], %41 {strides = array<i32>} : memref<256x128xf32, #tpu.memory_space<vmem>>, vector<256x128xf32>,
    %c2_64 = arith.constant 2 : index
    %c4_65 = arith.constant 4 : index
    %c0_66 = arith.constant 0 : index
    %43 = vector.load %arg9[%c2_64, %c4_65, %c0_66] : memref<20x20x16xbf16, #tpu.memory_space<vmem>>, vector<16x16x16xbf16>
    %44 = vector.shape_cast %43 : vector<16x16x16xbf16> to vector<256x16xbf16>
    %c1_67 = arith.constant 1 : index
    %c2_68 = arith.constant 2 : index
    %c0_69 = arith.constant 0 : index
    %c0_70 = arith.constant 0 : index
    %45 = vector.load %arg3[%c1_67, %c2_68, %c0_69, %c0_70] : memref<3x3x16x128xbf16, #tpu.memory_space<vmem>>, vector<1x1x16x128xbf16>
    %46 = vector.shape_cast %45 : vector<1x1x16x128xbf16> to vector<16x128xbf16>
    %cst_71 = arith.constant dense<0.000000e+00> : vector<256x128xf32>
    %47 = tpu.matmul %44, %46, %cst_71 {dimension_numbers = #tpu.dot_dimension_numbers<[1], [0], [0], [1], [0, 0, 1, 1], [], []>} : vector<256x16xbf16>, vector<16x128xbf16>, vector<256x128xf32> -> vector<256x128xf32>
    %c0_72 = arith.constant 0 : index
    %c0_73 = arith.constant 0 : index
    %48 = vector.load %arg10[%c0_72, %c0_73] : memref<256x128xf32, #tpu.memory_space<vmem>>, vector<256x128xf32>
    %49 = arith.addf %48, %47 : vector<256x128xf32>
    %c0_74 = arith.constant 0 : index
    %c0_75 = arith.constant 0 : index
    %50 = vector.load %arg10[%c0_74, %c0_75] : memref<256x128xf32, #tpu.memory_space<vmem>>, vector<256x128xf32>
    tpu.vector_store %arg10[%c0_74, %c0_75], %49 {strides = array<i32>} : memref<256x128xf32, #tpu.memory_space<vmem>>, vector<256x128xf32>,
    %c4_76 = arith.constant 4 : index
    %c0_77 = arith.constant 0 : index
    %c0_78 = arith.constant 0 : index
    %51 = vector.load %arg9[%c4_76, %c0_77, %c0_78] : memref<20x20x16xbf16, #tpu.memory_space<vmem>>, vector<16x16x16xbf16>
    %52 = vector.shape_cast %51 : vector<16x16x16xbf16> to vector<256x16xbf16>
    %c2_79 = arith.constant 2 : index
    %c0_80 = arith.constant 0 : index
    %c0_81 = arith.constant 0 : index
    %c0_82 = arith.constant 0 : index
    %53 = vector.load %arg3[%c2_79, %c0_80, %c0_81, %c0_82] : memref<3x3x16x128xbf16, #tpu.memory_space<vmem>>, vector<1x1x16x128xbf16>
    %54 = vector.shape_cast %53 : vector<1x1x16x128xbf16> to vector<16x128xbf16>
    %cst_83 = arith.constant dense<0.000000e+00> : vector<256x128xf32>
    %55 = tpu.matmul %52, %54, %cst_83 {dimension_numbers = #tpu.dot_dimension_numbers<[1], [0], [0], [1], [0, 0, 1, 1], [], []>} : vector<256x16xbf16>, vector<16x128xbf16>, vector<256x128xf32> -> vector<256x128xf32>
    %c0_84 = arith.constant 0 : index
    %c0_85 = arith.constant 0 : index
    %56 = vector.load %arg10[%c0_84, %c0_85] : memref<256x128xf32, #tpu.memory_space<vmem>>, vector<256x128xf32>
    %57 = arith.addf %56, %55 : vector<256x128xf32>
    %c0_86 = arith.constant 0 : index
    %c0_87 = arith.constant 0 : index
    %58 = vector.load %arg10[%c0_86, %c0_87] : memref<256x128xf32, #tpu.memory_space<vmem>>, vector<256x128xf32>
    tpu.vector_store %arg10[%c0_86, %c0_87], %57 {strides = array<i32>} : memref<256x128xf32, #tpu.memory_space<vmem>>, vector<256x128xf32>,
    %c4_88 = arith.constant 4 : index
    %c2_89 = arith.constant 2 : index
    %c0_90 = arith.constant 0 : index
    %59 = vector.load %arg9[%c4_88, %c2_89, %c0_90] : memref<20x20x16xbf16, #tpu.memory_space<vmem>>, vector<16x16x16xbf16>
    %60 = vector.shape_cast %59 : vector<16x16x16xbf16> to vector<256x16xbf16>
    %c2_91 = arith.constant 2 : index
    %c1_92 = arith.constant 1 : index
    %c0_93 = arith.constant 0 : index
    %c0_94 = arith.constant 0 : index
    %61 = vector.load %arg3[%c2_91, %c1_92, %c0_93, %c0_94] : memref<3x3x16x128xbf16, #tpu.memory_space<vmem>>, vector<1x1x16x128xbf16>
    %62 = vector.shape_cast %61 : vector<1x1x16x128xbf16> to vector<16x128xbf16>
    %cst_95 = arith.constant dense<0.000000e+00> : vector<256x128xf32>
    %63 = tpu.matmul %60, %62, %cst_95 {dimension_numbers = #tpu.dot_dimension_numbers<[1], [0], [0], [1], [0, 0, 1, 1], [], []>} : vector<256x16xbf16>, vector<16x128xbf16>, vector<256x128xf32> -> vector<256x128xf32>
    %c0_96 = arith.constant 0 : index
    %c0_97 = arith.constant 0 : index
    %64 = vector.load %arg10[%c0_96, %c0_97] : memref<256x128xf32, #tpu.memory_space<vmem>>, vector<256x128xf32>
    %65 = arith.addf %64, %63 : vector<256x128xf32>
    %c0_98 = arith.constant 0 : index
    %c0_99 = arith.constant 0 : index
    %66 = vector.load %arg10[%c0_98, %c0_99] : memref<256x128xf32, #tpu.memory_space<vmem>>, vector<256x128xf32>
    tpu.vector_store %arg10[%c0_98, %c0_99], %65 {strides = array<i32>} : memref<256x128xf32, #tpu.memory_space<vmem>>, vector<256x128xf32>,
    %c4_100 = arith.constant 4 : index
    %c4_101 = arith.constant 4 : index
    %c0_102 = arith.constant 0 : index
    %67 = vector.load %arg9[%c4_100, %c4_101, %c0_102] : memref<20x20x16xbf16, #tpu.memory_space<vmem>>, vector<16x16x16xbf16>
    %68 = vector.shape_cast %67 : vector<16x16x16xbf16> to vector<256x16xbf16>
    %c2_103 = arith.constant 2 : index
    %c2_104 = arith.constant 2 : index
    %c0_105 = arith.constant 0 : index
    %c0_106 = arith.constant 0 : index
    %69 = vector.load %arg3[%c2_103, %c2_104, %c0_105, %c0_106] : memref<3x3x16x128xbf16, #tpu.memory_space<vmem>>, vector<1x1x16x128xbf16>
    %70 = vector.shape_cast %69 : vector<1x1x16x128xbf16> to vector<16x128xbf16>
    %cst_107 = arith.constant dense<0.000000e+00> : vector<256x128xf32>
    %71 = tpu.matmul %68, %70, %cst_107 {dimension_numbers = #tpu.dot_dimension_numbers<[1], [0], [0], [1], [0, 0, 1, 1], [], []>} : vector<256x16xbf16>, vector<16x128xbf16>, vector<256x128xf32> -> vector<256x128xf32>
    %c0_108 = arith.constant 0 : index
    %c0_109 = arith.constant 0 : index
    %72 = vector.load %arg10[%c0_108, %c0_109] : memref<256x128xf32, #tpu.memory_space<vmem>>, vector<256x128xf32>
    %73 = arith.addf %72, %71 : vector<256x128xf32>
    %c0_110 = arith.constant 0 : index
    %c0_111 = arith.constant 0 : index
    %74 = vector.load %arg10[%c0_110, %c0_111] : memref<256x128xf32, #tpu.memory_space<vmem>>, vector<256x128xf32>
    tpu.vector_store %arg10[%c0_110, %c0_111], %73 {strides = array<i32>} : memref<256x128xf32, #tpu.memory_space<vmem>>, vector<256x128xf32>,
    %c0_112 = arith.constant 0 : index
    %c0_113 = arith.constant 0 : index
    %75 = vector.load %arg6[%c0_112, %c0_113] : memref<128x128xf32, #tpu.memory_space<vmem>>, vector<128x128xf32>
    %c0_114 = arith.constant 0 : index
    %c0_115 = arith.constant 0 : index
    %76 = vector.load %arg7[%c0_114, %c0_115] : memref<128x128xf32, #tpu.memory_space<vmem>>, vector<128x128xf32>
    %c0_116 = arith.constant 0 : index
    %c0_117 = arith.constant 0 : index
    %77 = vector.load %arg10[%c0_116, %c0_117] : memref<256x128xf32, #tpu.memory_space<vmem>>, vector<256x128xf32>
    %cst_118 = arith.constant dense<0.000000e+00> : vector<128xf32>
    %78 = vector.multi_reduction <add>, %77, %cst_118 [0] : vector<256x128xf32> to vector<128xf32>
    %79 = vector.shape_cast %78 : vector<128xf32> to vector<1x128xf32>
    %cst_119 = arith.constant dense<0.000000e+00> : vector<1x128xf32>
    %80 = tpu.matmul %79, %75, %cst_119 {dimension_numbers = #tpu.dot_dimension_numbers<[1], [0], [0], [1], [0, 0, 1, 1], [], []>} : vector<1x128xf32>, vector<128x128xf32>, vector<1x128xf32> -> vector<1x128xf32>
    %cst_120 = arith.constant 2.560000e+02 : f32
    %81 = vector.broadcast %cst_120 : f32 to vector<1x128xf32>
    %82 = arith.divf %80, %81 : vector<1x128xf32>
    %cst_121 = arith.constant dense<0.000000e+00> : vector<1x128xf32>
    %83 = tpu.matmul %82, %76, %cst_121 {dimension_numbers = #tpu.dot_dimension_numbers<[1], [0], [0], [1], [0, 0, 1, 1], [], []>} : vector<1x128xf32>, vector<128x128xf32>, vector<1x128xf32> -> vector<1x128xf32>
    %c0_122 = arith.constant 0 : index
    %c0_123 = arith.constant 0 : index
    %84 = vector.load %arg10[%c0_122, %c0_123] : memref<256x128xf32, #tpu.memory_space<vmem>>, vector<256x128xf32>
    %85 = vector.broadcast %83 : vector<1x128xf32> to vector<256x128xf32>
    %86 = arith.subf %84, %85 : vector<256x128xf32>
    %87 = arith.mulf %86, %86 : vector<256x128xf32>
    %cst_124 = arith.constant dense<0.000000e+00> : vector<128xf32>
    %88 = vector.multi_reduction <add>, %87, %cst_124 [0] : vector<256x128xf32> to vector<128xf32>
    %89 = vector.shape_cast %88 : vector<128xf32> to vector<1x128xf32>
    %cst_125 = arith.constant dense<0.000000e+00> : vector<1x128xf32>
    %90 = tpu.matmul %89, %75, %cst_125 {dimension_numbers = #tpu.dot_dimension_numbers<[1], [0], [0], [1], [0, 0, 1, 1], [], []>} : vector<1x128xf32>, vector<128x128xf32>, vector<1x128xf32> -> vector<1x128xf32>
    %cst_126 = arith.constant 2.560000e+02 : f32
    %91 = vector.broadcast %cst_126 : f32 to vector<1x128xf32>
    %92 = arith.divf %90, %91 : vector<1x128xf32>
    %cst_127 = arith.constant 9.99999974E-6 : f32
    %93 = vector.broadcast %cst_127 : f32 to vector<1x128xf32>
    %94 = arith.addf %92, %93 : vector<1x128xf32>
    %95 = math.rsqrt %94 : vector<1x128xf32>
    %cst_128 = arith.constant dense<0.000000e+00> : vector<1x128xf32>
    %96 = tpu.matmul %95, %76, %cst_128 {dimension_numbers = #tpu.dot_dimension_numbers<[1], [0], [0], [1], [0, 0, 1, 1], [], []>} : vector<1x128xf32>, vector<128x128xf32>, vector<1x128xf32> -> vector<1x128xf32>
    %c0_129 = arith.constant 0 : index
    %c0_130 = arith.constant 0 : index
    %97 = vector.load %arg4[%c0_129, %c0_130] : memref<1x128xf32, #tpu.memory_space<vmem>>, vector<1x128xf32>
    %98 = arith.mulf %96, %97 : vector<1x128xf32>
    %c0_131 = arith.constant 0 : index
    %c0_132 = arith.constant 0 : index
    %99 = vector.load %arg10[%c0_131, %c0_132] : memref<256x128xf32, #tpu.memory_space<vmem>>, vector<256x128xf32>
    %100 = vector.broadcast %83 : vector<1x128xf32> to vector<256x128xf32>
    %101 = arith.subf %99, %100 : vector<256x128xf32>
    %102 = vector.broadcast %98 : vector<1x128xf32> to vector<256x128xf32>
    %103 = arith.mulf %101, %102 : vector<256x128xf32>
    %c0_133 = arith.constant 0 : index
    %c0_134 = arith.constant 0 : index
    %104 = vector.load %arg5[%c0_133, %c0_134] : memref<1x128xf32, #tpu.memory_space<vmem>>, vector<1x128xf32>
    %105 = vector.broadcast %104 : vector<1x128xf32> to vector<256x128xf32>
    %106 = arith.addf %103, %105 : vector<256x128xf32>
    %cst_135 = arith.constant 0.000000e+00 : f32
    %107 = vector.broadcast %cst_135 : f32 to vector<256x128xf32>
    %108 = arith.maximumf %106, %107 : vector<256x128xf32>
    %109 = vector.shape_cast %108 : vector<256x128xf32> to vector<16x16x128xf32>
    %c0_136 = arith.constant 0 : index
    %c0_137 = arith.constant 0 : index
    %c0_138 = arith.constant 0 : index
    %c0_139 = arith.constant 0 : index
    %110 = vector.load %arg8[%c0_136, %c0_137, %c0_138, %c0_139] : memref<1x16x16x128xf32, #tpu.memory_space<vmem>>, vector<1x16x16x128xf32>
    %111 = vector.shape_cast %110 : vector<1x16x16x128xf32> to vector<16x16x128xf32>
    %112 = vector.shape_cast %109 : vector<16x16x128xf32> to vector<1x16x16x128xf32>
    tpu.vector_store %arg8[%c0_136, %c0_137, %c0_138, %c0_139], %112 {strides = array<i32>} : memref<1x16x16x128xf32, #tpu.memory_space<vmem>>, vector<1x16x16x128xf32>,
    return
  }
  func.func @transform_0(%arg0: i32, %arg1: i32) -> (i32, i32, i32, i32) {
    %c0_i32 = arith.constant 0 : i32
    %c0_i32_0 = arith.constant 0 : i32
    %c0_i32_1 = arith.constant 0 : i32
    %c0_i32_2 = arith.constant 0 : i32
    return %arg0, %c0_i32, %c0_i32_0, %c0_i32_1 : i32, i32, i32, i32
  }
  func.func @transform_1(%arg0: i32, %arg1: i32) -> (i32, i32, i32, i32) {
    %c0_i32 = arith.constant 0 : i32
    %c0_i32_0 = arith.constant 0 : i32
    %c0_i32_1 = arith.constant 0 : i32
    %c0_i32_2 = arith.constant 0 : i32
    return %c0_i32, %c0_i32_0, %c0_i32_1, %arg1 : i32, i32, i32, i32
  }
  func.func @transform_2(%arg0: i32, %arg1: i32) -> (i32, i32) {
    %c0_i32 = arith.constant 0 : i32
    %c0_i32_0 = arith.constant 0 : i32
    return %c0_i32, %arg1 : i32, i32
  }
  func.func @transform_3(%arg0: i32, %arg1: i32) -> (i32, i32) {
    %c0_i32 = arith.constant 0 : i32
    %c0_i32_0 = arith.constant 0 : i32
    return %c0_i32, %arg1 : i32, i32
  }
  func.func @transform_4(%arg0: i32, %arg1: i32) -> (i32, i32) {
    %c0_i32 = arith.constant 0 : i32
    %c0_i32_0 = arith.constant 0 : i32
    %c0_i32_1 = arith.constant 0 : i32
    return %c0_i32, %c0_i32_0 : i32, i32
  }
  func.func @transform_5(%arg0: i32, %arg1: i32) -> (i32, i32) {
    %c0_i32 = arith.constant 0 : i32
    %c0_i32_0 = arith.constant 0 : i32
    %c0_i32_1 = arith.constant 0 : i32
    return %c0_i32, %c0_i32_0 : i32, i32
  }
  func.func @transform_6(%arg0: i32, %arg1: i32) -> (i32, i32, i32, i32) {
    %c0_i32 = arith.constant 0 : i32
    %c0_i32_0 = arith.constant 0 : i32
    %c0_i32_1 = arith.constant 0 : i32
    return %arg0, %c0_i32, %c0_i32_0, %arg1 : i32, i32, i32, i32
  }
}

</mosaic_0001>

<bundles_post_ra>
// kernel: tpu_custom_call.1
= control target key start
LH: loop header
LB: loop body
LE: loop exit
PB: predicated region body
PF: predicated region fallthrough
CT: control target
= control target key end

     0   :  { %s9614_s0 = inlined_call_operand.hbm [shape: bf16[2,16,16,16], index: 0, kind: input, shape index: {}]   ;;  %s9615_s1 = inlined_call_operand.hbm [shape: bf16[3,3,16,128], index: 1, kind: input, shape index: {}]   ;;  %s9616_s2 = inlined_call_operand.vmem [shape: f32[1,128], index: 2, kind: input, shape index: {}]   ;;  %s9617_s3 = inlined_call_operand.vmem [shape: f32[1,128], index: 3, kind: input, shape index: {}]   ;;  %s9618_s4 = inlined_call_operand.hbm [shape: f32[128,128], index: 4, kind: input, shape index: {}]   ;;  %s9619_s5 = inlined_call_operand.hbm [shape: f32[128,128], index: 5, kind: input, shape index: {}]   ;;  %s9620_s6 = inlined_call_operand.hbm [shape: f32[2,16,16,128], index: 6, kind: output, shape index: {}]  }
   0x1   :  { %9629 = sst [smem:[#allocation19_spill]] %s9615_s1 }
   0x2   :  { %11 = vsyncpa [#allocation5], 0 }
   0x3   :  { %13 = vsyncpa [#allocation5 + $0x1], 0 }
   0x4   :  { %14 = vsyncpa [#allocation8], 0 }
   0x5   :  { %15 = vsyncpa [#allocation11], 0 }
   0x6   :  { %16 = vsyncpa [#allocation6], 0 }
   0x7   :  { %18 = vsyncpa [#allocation6 + $0x1], 0  ;;  %s7957_s21 = smov 0   ;;  %s7959_s22 = smov 0  }
   0x8   :  { %s7961_s23 = smov 0   ;;  %s7963_s24 = smov 0  }
   0x9   :  { %s7965_s25 = smov 0   ;;  %s7967_s26 = smov 0  }
   0xa LB: > { %9630 = sst [smem:[#allocation17_spill]] %s7885_s21  ;;  %s6098_s27 = sadd.s32 4294967295, %s7905_s26   ;;  %s7905_s26 = sphi %s7967_s26, %s24_s26   ;;  %s7901_s25 = sphi %s7965_s25, %s9663_s25   ;;  %s7897_s24 = sphi %s7963_s24, %s9662_s24   ;;  %s7893_s23 = sphi %s7961_s23, %s9661_s23   ;;  %s7889_s22 = sphi %s7959_s22, %s9660_s22   ;;  %s7885_s21 = sphi %s7957_s21, %s9659_s21  }
   0xb   : > { %s6099_s28 = sadd.s32 4294967294, %s7905_s26   ;;  %p56_p0 = scmp.ne.s32.totalorder %s7889_s22, %s7885_s21 }
   0xc   : > { %p7991_p1 = scmp.eq.s32.totalorder %s6098_s27, 0  ;;  %p7995_p2 = scmp.eq.s32.totalorder %s6098_s27, 1 }
   0xd   : > { %p208_p3 = scmp.eq.s32.totalorder %s6099_s28, 1  ;;  %p6100_p5 = scmp.ge.s32.totalorder %s7905_s26, 1 }
   0xe   : > { %s9631_s29 = scalar_select %p7991_p1, 1, 0 }
   0xf   : > { %s9632_s30 = scalar_select %p7995_p2, 1, 0 }
  0x10   : > { %p8001_p4 = por %p7991_p1, %p56_p0  ;;  %p8006_p6 = por %p208_p3, %p56_p0 }
  0x11   : > { %p215_p7 = scmp.lt.s32.totalorder %s7905_s26, 3  ;;  %s7907_s10 = smov [#allocation7]  }
  0x12   : > { %s9633_s7 = scalar_select %p8001_p4, 1, 0 }
  0x13   : > { %s9634_s8 = scalar_select %p8006_p6, 1, 0 }
  0x14   : > { %p8011_p8 = pnand %p6100_p5, %p215_p7  ;;  %s229_s11 = sshll.u32 %s7907_s10, 4  ;;  %s8015_s11 = int_to_ptr.vmem [resolvable:$true] %s229_s11 }
  0x15   : > { %9635 = sst [smem:[#allocation18_spill]] %s9634_s8  ;;  %s7908_s13 = smov [#allocation9]  }
  0x16   : > { %s9636_s9 = scalar_select %p8011_p8, 1, 0 }
  0x17   : > { %p7554_p9 = pneg %p8011_p8  ;;  %s254_s14 = sshll.u32 %s7908_s13, 4  ;;  %s8026_s14 = int_to_ptr.vmem [resolvable:$true] %s254_s14 }
  0x18   : > { %s9638_s1 = sld [smem:[#allocation19_spill]] }
  0x19   : > { %p8022_p11 = pnand %p7554_p9, %p7991_p1 }
  0x1b   : > { %p8036_p13 = pneg %p8022_p11 }
  0x1e   : > { %s7701_s17 = scalar_lea.hbm %s9638_s1, 1152 }
  0x1f   : > { %p7702_p12 = scmp.ne.s32.totalorder %s9638_s1, %s7701_s17  ;;  %p7708_p5 = scmp.lt.u32.totalorder %s7701_s17, %s9638_s1 }
  0x21   : > { %p7704_p0 = pnand %p8036_p13, %p7702_p12 }
  0x23   : > { %p7705_p3 = pneg %p7704_p0 }
  0x25   : > { %p7710_p7 = pnand %p7708_p5, %p7705_p3 }
  0x27   : > { %7713 = shalt.err (!%p7710_p7)
}
  0x28   : > { %s7714_s10 = scalar_lea.vmem %s8015_s11, 1152  ;;  %p7722_p1 = scmp.lt.s32.totalorder %s8015_s11, %s8015_s11 }
  0x29   : > { %p7715_p9 = scmp.ne.s32.totalorder %s8015_s11, %s7714_s10  ;;  %p7723_p4 = scmp.lt.s32.totalorder %s7714_s10, %s7714_s10 }
  0x2b   : > { %p7717_p10 = pnand %p7715_p9, %p8036_p13  ;;  %p7724_p12 = por %p7723_p4, %p7722_p1 }
  0x2d   : > { %p7718_p6 = pneg %p7717_p10 }
  0x2f   : > { %p7725_p0 = pnand %p7724_p12, %p7718_p6 }
  0x31   : > { %7728 = shalt.err (!%p7725_p0)
}
  0x32   : > { %s9626_s13 = smov 64   ;;  %s9627_s15 = smov 4  }
  0x33   : > { %7557 = dma.hbm_to_vmem [thread:$0]  (!%p8022_p11), %s9638_s1, 1152, %s8015_s11, [#allocation8], %s9626_s13, %s9626_s13, %s9627_s15  }
  0x34   : > { %s7729_s27 = scalar_lea.hbm %s9618_s4, 2048 }
  0x35   : > { %p7730_p1 = scmp.ne.s32.totalorder %s9618_s4, %s7729_s27  ;;  %p7736_p10 = scmp.lt.u32.totalorder %s7729_s27, %s9618_s4 }
  0x37   : > { %p7732_p4 = pnand %p7730_p1, %p8036_p13 }
  0x39   : > { %p7733_p6 = pneg %p7732_p4 }
  0x3b   : > { %p7738_p3 = pnand %p7736_p10, %p7733_p6 }
  0x3d   : > { %7741 = shalt.err (!%p7738_p3)
}
  0x3e   : > { %s7742_s11 = scalar_lea.vmem %s8026_s14, 2048  ;;  %p7750_p12 = scmp.lt.s32.totalorder %s8026_s14, %s8026_s14 }
  0x3f   : > { %p7743_p5 = scmp.ne.s32.totalorder %s8026_s14, %s7742_s11  ;;  %p7751_p0 = scmp.lt.s32.totalorder %s7742_s11, %s7742_s11 }
  0x41   : > { %p7745_p7 = pnand %p7743_p5, %p8036_p13  ;;  %p7752_p1 = por %p7751_p0, %p7750_p12 }
  0x43   : > { %p7746_p9 = pneg %p7745_p7 }
  0x45   : > { %p7753_p4 = pnand %p7752_p1, %p7746_p9 }
  0x47   : > { %7756 = shalt.err (!%p7753_p4)
}
  0x48   : > { %s7911_s16 = smov 128   ;;  %s7912_s21 = smov 8  }
  0x49   : > { %7560 = dma.hbm_to_vmem [thread:$0]  (!%p8022_p11), %s9618_s4, 2048, %s8026_s14, [#allocation8], %s7911_s16, %s7911_s16, %s7912_s21  }
  0x4a   : > { %s7913_s18 = smov [#allocation10]   ;;  %s7757_s10 = scalar_lea.hbm %s9619_s5, 2048 }
  0x4b   : > { %s267_s19 = sshll.u32 %s7913_s18, 4  ;;  %p7758_p6 = scmp.ne.s32.totalorder %s9619_s5, %s7757_s10  ;;  %s268_s19 = int_to_ptr.vmem [resolvable:$true] %s267_s19 }
  0x4c   : > { %p7764_p5 = scmp.lt.u32.totalorder %s7757_s10, %s9619_s5 }
  0x4d   : > { %p7760_p10 = pnand %p7758_p6, %p8036_p13 }
  0x4f   : > { %p7761_p3 = pneg %p7760_p10 }
  0x51   : > { %p7766_p7 = pnand %p7764_p5, %p7761_p3 }
  0x53   : > { %7769 = shalt.err (!%p7766_p7)
}
  0x54   : > { %s7770_s14 = scalar_lea.vmem %s268_s19, 2048  ;;  %p7778_p1 = scmp.lt.s32.totalorder %s268_s19, %s268_s19 }
  0x55   : > { %p7771_p9 = scmp.ne.s32.totalorder %s268_s19, %s7770_s14  ;;  %p7779_p4 = scmp.lt.s32.totalorder %s7770_s14, %s7770_s14 }
  0x57   : > { %p7773_p12 = pnand %p7771_p9, %p8036_p13  ;;  %p7780_p8 = por %p7779_p4, %p7778_p1 }
  0x59   : > { %p7774_p0 = pneg %p7773_p12 }
  0x5b   : > { %p7781_p2 = pnand %p7780_p8, %p7774_p0 }
  0x5d   : > { %7784 = shalt.err (!%p7781_p2)
}
  0x5e   : > { %7563 = dma.hbm_to_vmem [thread:$0]  (!%p8022_p11), %s9619_s5, 2048, %s268_s19, [#allocation11], %s7911_s16, %s7911_s16, %s7912_s21  }
  0x5f   : > { %s36_s1 = sadd.s32 1, %s7901_s25  ;;  %s43_s20 = sadd.s32 1, %s7893_s23 }
  0x60   : > { %p38_p8 = scmp.ge.s32.totalorder %s36_s1, 2  ;;  %p50_p2 = scmp.ne.s32.totalorder %s7893_s23, %s7889_s22 }
  0x61   : > { %p51_p13 = scmp.eq.s32.totalorder %s7905_s26, 0  ;;  %p9641_p10 = scmp.ne.s32.totalorder %s9632_s30, 0 }
  0x62   : > { %s9665_s1 = smov (%p38_p8, %s36_s1), 0  ;;  %p7575_p11 = scmp.lt.s32.totalorder %s7905_s26, 2 }
  0x63   : > { %p8108_p6 = por %p51_p13, %p50_p2  ;;  %p8114_p3 = por %p9641_p10, %p50_p2 }
  0x64   : > { %s40_s17 = ssub.s32 %s7901_s25, %s9665_s1  ;;  %s281_s16 = sand.u32 1, %s7893_s23  }
  0x65   : > { %p41_p5 = scmp.eq.s32.totalorder %s40_s17, 0  ;;  %s6107_s21 = sshll.u32 %s281_s16, 7 }
  0x66   : > { %s6515_s19 = sshll.u32 %s7901_s25, 11  ;;  %s285_s30 = scalar_lea.vmem [#allocation4], %s6107_s21 }
  0x67   : > { %s8123_s18 = scalar_select %p41_p5, %s7893_s23, %s43_s20  }
  0x68   : > { %s8129_s10 = scalar_lea.hbm %s9614_s0, %s6515_s19  ;;  %s292_s11 = sshll.u32 %s285_s30, 4  ;;  %s8131_s11 = int_to_ptr.vmem [resolvable:$true] %s292_s11 }
  0x69   : > { %p8135_p7 = pnand %p7575_p11, %p8108_p6  ;;  %s8139_s13 = scalar_lea.sflag [#allocation5], %s281_s16 }
  0x6a   : > { %s7785_s8 = scalar_lea.hbm %s8129_s10, 2048  ;;  %s7790_s12 = scalar_lea.hbm %s9614_s0, 4096 }
  0x6b   : > { %p7786_p9 = scmp.ne.s32.totalorder %s8129_s10, %s7785_s8  ;;  %p7787_p12 = pneg %p8135_p7 }
  0x6c   : > { %p7791_p4 = scmp.lt.u32.totalorder %s8129_s10, %s9614_s0  ;;  %p7792_p8 = scmp.lt.u32.totalorder %s7790_s12, %s7785_s8 }
  0x6d   : > { %p7788_p0 = pnand %p7787_p12, %p7786_p9  ;;  %p7794_p13 = scmp.lt.u32.totalorder %s7785_s8, %s8129_s10 }
  0x6e   : > { %p7793_p2 = por %p7792_p8, %p7791_p4 }
  0x6f   : > { %p7789_p1 = pneg %p7788_p0 }
  0x70   : > { %p7795_p6 = por %p7794_p13, %p7793_p2 }
  0x72   : > { %p7796_p10 = pnand %p7795_p6, %p7789_p1 }
  0x74   : > { %7799 = shalt.err (!%p7796_p10)
}
  0x75   : > { %s7800_s16 = scalar_lea.vmem %s8131_s11, 2048  ;;  %s7914_s27 = smov [#allocation4]  }
  0x76   : > { %p7801_p11 = scmp.ne.s32.totalorder %s8131_s11, %s7800_s16  ;;  %s7805_s28 = sshll.u32 %s7914_s27, 4  ;;  %s7806_s28 = int_to_ptr.vmem [resolvable:$false] %s7805_s28 }
  0x77   : > { %s7807_s30 = scalar_lea.vmem %s7806_s28, 4096  ;;  %p7808_p0 = scmp.lt.s32.totalorder %s8131_s11, %s7806_s28 }
  0x78   : > { %p7803_p5 = pnand %p7801_p11, %p7787_p12  ;;  %p7809_p4 = scmp.lt.s32.totalorder %s7807_s30, %s7800_s16 }
  0x7a   : > { %p7804_p9 = pneg %p7803_p5  ;;  %p7810_p8 = por %p7809_p4, %p7808_p0 }
  0x7c   : > { %p7811_p2 = pnand %p7810_p8, %p7804_p9 }
  0x7e   : > { %7814 = shalt.err (!%p7811_p2)
}
  0x7f   : > { %s9644_s8 = smov 4   ;;  %s9645_s20 = smov 64  }
  0x80   : > { %7567 = dma.hbm_to_vmem [thread:$0]  (!%p8135_p7), %s8129_s10, 2048, %s8131_s11, %s8139_s13, %s9645_s20, %s9645_s20, %s9644_s8  }
  0x81   : > { %p9646_p12 = scmp.ne.s32.totalorder %s9636_s9, 0 }
  0x82   : > { %s8173_s17 = sand.u32 (!%p9646_p12), 1, %s7889_s22   ;;  %p9647_p1 = scmp.ne.s32.totalorder (!%p9646_p12), %s9633_s7, 0 }
  0x83   : > { %304 = sbr.rel (%p9646_p12) target bundleno = 1757 (0x6dd), region = 44  ;;  %s6111_s12 = sshll.u32 (!%p9646_p12), %s8173_s17, 7 }
  0x84   : > { %s307_s21 = scalar_lea.sflag (!%p9646_p12), [#allocation5], %s8173_s17  ;;  %s8177_s19 = scalar_lea.vmem (!%p9646_p12), [#allocation4], %s6111_s12 }
  0x8a   : > { %7868 = dma.done.wait (%p9647_p1), %s307_s21, 2048  }
  0x8b   : > { %7870 = vsyncadd (%p9647_p1), %s307_s21, 4294965248  ;;  %p9648_p7 = scmp.ne.s32.totalorder %s9631_s29, 0 }
  0x8d   : > { %7872 = dma.done.wait (%p9648_p7), [#allocation8], 3200  }
  0x8e   : > { %7874 = vsyncadd (%p9648_p7), [#allocation8], 4294964096 }
  0x8f   : > { %7876 = dma.done.wait (%p9648_p7), [#allocation11], 2048  }
  0x90   : > { %7878 = vsyncadd (%p9648_p7), [#allocation11], 4294965248  ;;  %vm364_vm0 = vcmask 125952   ;;  %v7915_v0 = vmov 0   ;;  %vm367_vm1 = vcmask 123904   ;;  %v7641_v1 = vld [vmem:[#allocation7] sm:$0xff]  }
  0x91   : > { %365 = vst.msk [vmem:[#allocation2] sm:$0xf] %vm364_vm0, %v7915_v0  ;;  %366 = vst.msk [vmem:[#allocation2 + $0x4] sm:$0xf] %vm364_vm0, %v7915_v0  ;;  %vm792_vm2 = vcmask 130048   ;;  %vm490_vm3 = vcmask 1040384   ;;  %6738 = vmatprep.subr.bf16.mxu1 %v7641_v1 }
  0x92   : > { %369 = vst.msk [vmem:[#allocation2 + $0xc] sm:$0xf] %vm364_vm0, %v7915_v0  ;;  %370 = vst.msk [vmem:[#allocation2 + $0x10] sm:$0xf] %vm364_vm0, %v7915_v0  ;;  %vm491_vm4 = vcmask 1044484   ;;  %6739 = vmatpush3.bf16.msra.mxu1 %v7641_v1  ;;  %v8252_v4 = vld [vmem:[#allocation7 + $0x18] sm:$0xff]  }
  0x93   : > { %372 = vst.msk [vmem:[#allocation2 + $0x18] sm:$0xf] %vm364_vm0, %v7915_v0  ;;  %373 = vst.msk [vmem:[#allocation2 + $0x1c] sm:$0xf] %vm364_vm0, %v7915_v0  ;;  %vm622_vm5 = vcmask 125953   ;;  %6840 = vmatprep.subr.bf16.mxu0 %v8252_v4  ;;  %v8261_v10 = vld [vmem:[#allocation7 + $0x20] sm:$0xff]  }
  0x94   : > { %375 = vst.msk [vmem:[#allocation2 + $0x24] sm:$0xf] %vm364_vm0, %v7915_v0  ;;  %376 = vst.msk [vmem:[#allocation2 + $0x28] sm:$0xf] %vm364_vm0, %v7915_v0  ;;  %v426_v5 = vld [vmem:[%s8177_s19] sm:$0xf]  ;;  %6841 = vmatpush3.bf16.msra.mxu0 %v8252_v4 }
  0x95   : > { %378 = vst.msk [vmem:[#allocation2 + $0x30] sm:$0xf] %vm364_vm0, %v7915_v0  ;;  %379 = vst.msk [vmem:[#allocation2 + $0x34] sm:$0xf] %vm364_vm0, %v7915_v0  ;;  %v427_v6 = vld [vmem:[%s8177_s19 + $0x4] sm:$0xf]  ;;  %6874 = vmatprep.subr.bf16.mxu0 %v8261_v10 }
  0x96   : > { %381 = vst.msk [vmem:[#allocation2 + $0x3c] sm:$0xf] %vm364_vm0, %v7915_v0  ;;  %382 = vst.msk [vmem:[#allocation2 + $0x40] sm:$0xf] %vm364_vm0, %v7915_v0  ;;  %v493_v8 = vrot.slane %v426_v5, 7  ;;  %v495_v9 = vrot.slane %v427_v6, 7 }
  0x97   : > { %384 = vst.msk [vmem:[#allocation2 + $0x48] sm:$0xf] %vm364_vm0, %v7915_v0  ;;  %385 = vst.msk [vmem:[#allocation2 + $0x4c] sm:$0xf] %vm364_vm0, %v7915_v0  ;;  %vm625_vm7 = vcmask 122880   ;;  %v7667_v28 = vld [vmem:[#allocation7 + $0x8] sm:$0xff]  }
  0x98   : > { %387 = vst.msk [vmem:[#allocation2 + $0x54] sm:$0xf] %vm364_vm0, %v7915_v0  ;;  %388 = vst.msk [vmem:[#allocation2 + $0x58] sm:$0xf] %vm364_vm0, %v7915_v0  ;;  %v7642_v2 = vld [vmem:[#allocation2] sm:$0xff]   ;;  %v494_v14 = vrot.slane %v493_v8, 4  ;;  %6772 = vmatprep.subr.bf16.mxu1 %v7667_v28 }
  0x99   : > { %390 = vst.msk [vmem:[#allocation2 + $0x60] sm:$0xf] %vm364_vm0, %v7915_v0  ;;  %391 = vst.msk [vmem:[#allocation2 + $0x64] sm:$0xf] %vm364_vm0, %v7915_v0  ;;  %v7643_v3 = vld [vmem:[#allocation2 + $0xc] sm:$0xff]   ;;  %6740 = vmatprep.mubr.msk.bf16.mxu1 %vm792_vm2, %v7642_v2  ;;  %v497_v15 = vrot.slane %v495_v9, 4 }
  0x9a   : > { %393 = vst.msk [vmem:[#allocation2 + $0x6c] sm:$0xf] %vm364_vm0, %v7915_v0  ;;  %394 = vst.msk [vmem:[#allocation2 + $0x70] sm:$0xf] %vm364_vm0, %v7915_v0  ;;  %6741 = vmatmul.mubr.msk.bf16.vlgmr.msra.gmra.mrb[0].mxu1 %vm792_vm2, %v7643_v3  ;;  %v428_v11 = vld [vmem:[%s8177_s19 + $0x8] sm:$0xf] }
  0x9b   : > { %396 = vst.msk [vmem:[#allocation2 + $0x78] sm:$0xf] %vm364_vm0, %v7915_v0  ;;  %397 = vst.msk [vmem:[#allocation2 + $0x7c] sm:$0xf] %vm364_vm0, %v7915_v0  ;;  %v429_v12 = vld [vmem:[%s8177_s19 + $0xc] sm:$0xf]  ;;  %6773 = vmatpush3.bf16.msra.mxu1 %v7667_v28 }
  0x9c   : > { %399 = vst.msk [vmem:[#allocation2 + $0x84] sm:$0xf] %vm364_vm0, %v7915_v0  ;;  %400 = vst.msk [vmem:[#allocation2 + $0x88] sm:$0xf] %vm364_vm0, %v7915_v0  ;;  %v430_v13 = vld [vmem:[%s8177_s19 + $0x10] sm:$0xf] }
  0x9d   : > { %402 = vst.msk [vmem:[#allocation2 + $0x90] sm:$0xf] %vm364_vm0, %v7915_v0  ;;  %403 = vst.msk [vmem:[#allocation2 + $0x94] sm:$0xf] %vm364_vm0, %v7915_v0  ;;  %v498_v16 = vrot.slane %v428_v11, 7  ;;  %v500_v17 = vrot.slane %v429_v12, 7 }
  0x9e   : > { %405 = vst.msk [vmem:[#allocation2 + $0x9c] sm:$0xf] %vm364_vm0, %v7915_v0  ;;  %406 = vst.msk [vmem:[#allocation2 + $0xa0] sm:$0xf] %vm364_vm0, %v7915_v0  ;;  %v431_v18 = vld [vmem:[%s8177_s19 + $0x14] sm:$0xf] }
  0x9f   : > { %408 = vst.msk [vmem:[#allocation2 + $0xa8] sm:$0xf] %vm364_vm0, %v7915_v0  ;;  %409 = vst.msk [vmem:[#allocation2 + $0xac] sm:$0xf] %vm364_vm0, %v7915_v0  ;;  %v503_v19 = vrot.slane %v430_v13, 7  ;;  %v505_v20 = vrot.slane %v431_v18, 7 }
  0xa0   : > { %411 = vst.msk [vmem:[#allocation2 + $0xb4] sm:$0xf] %vm364_vm0, %v7915_v0  ;;  %412 = vst.msk [vmem:[#allocation2 + $0xb8] sm:$0xf] %vm364_vm0, %v7915_v0  ;;  %v432_v21 = vld [vmem:[%s8177_s19 + $0x18] sm:$0xf] }
  0xa1   : > { %414 = vst.msk [vmem:[#allocation2 + $0xc0] sm:$0xf] %vm364_vm0, %v7915_v0  ;;  %415 = vst.msk [vmem:[#allocation2 + $0xc4] sm:$0xf] %vm364_vm0, %v7915_v0  ;;  %v433_v22 = vld [vmem:[%s8177_s19 + $0x1c] sm:$0xf] }
  0xa2   : > { %417 = vst.msk [vmem:[#allocation2 + $0xcc] sm:$0xf] %vm364_vm0, %v7915_v0  ;;  %418 = vst.msk [vmem:[#allocation2 + $0xd0] sm:$0xf] %vm364_vm0, %v7915_v0  ;;  %v499_v24 = vrot.slane %v498_v16, 4  ;;  %v502_v25 = vrot.slane %v500_v17, 4 }
  0xa3   : > { %420 = vst.msk [vmem:[#allocation2 + $0xd8] sm:$0xf] %vm364_vm0, %v7915_v0  ;;  %421 = vst.msk [vmem:[#allocation2 + $0xdc] sm:$0xf] %vm364_vm0, %v7915_v0  ;;  %v508_v26 = vrot.slane %v432_v21, 7  ;;  %v504_v29 = vrot.slane %v503_v19, 4 }
  0xa4   : > { %423 = vst.msk [vmem:[#allocation2 + $0xe4] sm:$0xf] %vm364_vm0, %v7915_v0  ;;  %424 = vst.msk [vmem:[#allocation2 + $0xe8] sm:$0xf] %vm364_vm0, %v7915_v0  ;;  %v434_v27 = vld [vmem:[%s8177_s19 + $0x20] sm:$0xf] }
  0xa5   : > { %374 = vst.msk [vmem:[#allocation2 + $0x20] sm:$0x3] %vm367_vm1, %v7915_v0  ;;  %368 = vst.msk [vmem:[#allocation2 + $0x8] sm:$0x3] %vm367_vm1, %v7915_v0  ;;  %v507_v30 = vrot.slane %v505_v20, 4  ;;  %v510_v31 = vrot.slane %v433_v22, 7 }
  0xa6   : > { %371 = vst.msk [vmem:[#allocation2 + $0x14] sm:$0x3] %vm367_vm1, %v7915_v0  ;;  %377 = vst.msk [vmem:[#allocation2 + $0x2c] sm:$0x3] %vm367_vm1, %v7915_v0  ;;  %v435_v32 = vld [vmem:[%s8177_s19 + $0x24] sm:$0xf] }
  0xa7   : > { %380 = vst.msk [vmem:[#allocation2 + $0x38] sm:$0x3] %vm367_vm1, %v7915_v0  ;;  %383 = vst.msk [vmem:[#allocation2 + $0x44] sm:$0x3] %vm367_vm1, %v7915_v0  ;;  %v513_v33 = vrot.slane %v434_v27, 7  ;;  %v509_v35 = vrot.slane %v508_v26, 4 }
  0xa8   : > { %386 = vst.msk [vmem:[#allocation2 + $0x50] sm:$0x3] %vm367_vm1, %v7915_v0  ;;  %389 = vst.msk [vmem:[#allocation2 + $0x5c] sm:$0x3] %vm367_vm1, %v7915_v0  ;;  %v515_v36 = vrot.slane %v435_v32, 7  ;;  %v512_v40 = vrot.slane %v510_v31, 4 }
  0xa9   : > { %392 = vst.msk [vmem:[#allocation2 + $0x68] sm:$0x3] %vm367_vm1, %v7915_v0  ;;  %395 = vst.msk [vmem:[#allocation2 + $0x74] sm:$0x3] %vm367_vm1, %v7915_v0  ;;  %v436_v37 = vld [vmem:[%s8177_s19 + $0x28] sm:$0xf] }
  0xaa   : > { %398 = vst.msk [vmem:[#allocation2 + $0x80] sm:$0x3] %vm367_vm1, %v7915_v0  ;;  %401 = vst.msk [vmem:[#allocation2 + $0x8c] sm:$0x3] %vm367_vm1, %v7915_v0  ;;  %v437_v38 = vld [vmem:[%s8177_s19 + $0x2c] sm:$0xf] }
  0xab   : > { %404 = vst.msk [vmem:[#allocation2 + $0x98] sm:$0x3] %vm367_vm1, %v7915_v0  ;;  %407 = vst.msk [vmem:[#allocation2 + $0xa4] sm:$0x3] %vm367_vm1, %v7915_v0  ;;  %v514_v41 = vrot.slane %v513_v33, 4  ;;  %v518_v42 = vrot.slane %v436_v37, 7 }
  0xac   : > { %410 = vst.msk [vmem:[#allocation2 + $0xb0] sm:$0x3] %vm367_vm1, %v7915_v0  ;;  %413 = vst.msk [vmem:[#allocation2 + $0xbc] sm:$0x3] %vm367_vm1, %v7915_v0  ;;  %v438_v43 = vld [vmem:[%s8177_s19 + $0x30] sm:$0xf] }
  0xad   : > { %416 = vst.msk [vmem:[#allocation2 + $0xc8] sm:$0x3] %vm367_vm1, %v7915_v0  ;;  %419 = vst.msk [vmem:[#allocation2 + $0xd4] sm:$0x3] %vm367_vm1, %v7915_v0  ;;  %v517_v45 = vrot.slane %v515_v36, 4  ;;  %v520_v46 = vrot.slane %v437_v38, 7 }
  0xae   : > { %422 = vst.msk [vmem:[#allocation2 + $0xe0] sm:$0x3] %vm367_vm1, %v7915_v0  ;;  %425 = vst.msk [vmem:[#allocation2 + $0xec] sm:$0x3] %vm367_vm1, %v7915_v0  ;;  %v439_v47 = vld [vmem:[%s8177_s19 + $0x34] sm:$0xf] }
  0xaf   : > { %vm8257_vm6 = vmor %vm490_vm3, %vm491_vm4  ;;  %623 = vst.msk [vmem:[#allocation2 + $0x18] sm:$0xe] %vm622_vm5, %v493_v8  ;;  %v523_v48 = vrot.slane %v438_v43, 7  ;;  %v8297_v49 = vld [vmem:[#allocation7 + $0x10] sm:$0xff]   ;;  %v519_v51 = vrot.slane %v518_v42, 4  ;;  %v525_v52 = vrot.slane %v439_v47, 7 }
  0xb0   : > { %v496_v23 = vsel %vm8257_vm6, %v494_v14, %v495_v9  ;;  %627 = vst.msk [vmem:[#allocation2 + $0x24] sm:$0xe] %vm622_vm5, %v498_v16  ;;  %630 = vst.msk [vmem:[#allocation2 + $0x30] sm:$0xe] %vm622_vm5, %v503_v19  ;;  %v501_v34 = vsel %vm8257_vm6, %v499_v24, %v500_v17  ;;  %v506_v39 = vsel %vm8257_vm6, %v504_v29, %v505_v20  ;;  %v522_v53 = vrot.slane %v520_v46, 4  ;;  %v8315_v60 = vld [vmem:[#allocation7 + $0x28] sm:$0xff]  }
  0xb1   : > { %626 = vst.msk [vmem:[#allocation2 + $0x20] sm:$0x1] %vm625_vm7, %v497_v15  ;;  %629 = vst.msk [vmem:[#allocation2 + $0x2c] sm:$0x1] %vm625_vm7, %v502_v25  ;;  %v511_v44 = vsel %vm8257_vm6, %v509_v35, %v510_v31  ;;  %v516_v50 = vsel %vm8257_vm6, %v514_v41, %v515_v36  ;;  %v524_v54 = vrot.slane %v523_v48, 4  ;;  %6806 = vmatprep.subr.bf16.mxu1 %v8297_v49  ;;  %v527_v56 = vrot.slane %v525_v52, 4 }
  0xb2   : > { %624 = vst.msk [vmem:[#allocation2 + $0x1c] sm:$0xf] %vm364_vm0, %v496_v23  ;;  %628 = vst.msk [vmem:[#allocation2 + $0x28] sm:$0xf] %vm364_vm0, %v501_v34  ;;  %v521_v55 = vsel %vm8257_vm6, %v519_v51, %v520_v46  ;;  %vm1130_vm8 = vcmask 1042432   ;;  %vm1131_vm9 = vcmask 1046532  }
  0xb3   : > { %633 = vst.msk [vmem:[#allocation2 + $0x3c] sm:$0xe] %vm622_vm5, %v508_v26  ;;  %636 = vst.msk [vmem:[#allocation2 + $0x48] sm:$0xe] %vm622_vm5, %v513_v33  ;;  %v526_v58 = vsel %vm8257_vm6, %v524_v54, %v525_v52  ;;  %v440_v14 = vld [vmem:[%s8177_s19 + $0x38] sm:$0xf] }
  0xb4   : > { %632 = vst.msk [vmem:[#allocation2 + $0x38] sm:$0x1] %vm625_vm7, %v507_v30  ;;  %635 = vst.msk [vmem:[#allocation2 + $0x44] sm:$0x1] %vm625_vm7, %v512_v40  ;;  %v441_v15 = vld [vmem:[%s8177_s19 + $0x3c] sm:$0xf] }
  0xb5   : > { %631 = vst.msk [vmem:[#allocation2 + $0x34] sm:$0xf] %vm364_vm0, %v506_v39  ;;  %634 = vst.msk [vmem:[#allocation2 + $0x40] sm:$0xf] %vm364_vm0, %v511_v44  ;;  %v528_v18 = vrot.slane %v440_v14, 7  ;;  %v530_v19 = vrot.slane %v441_v15, 7 }
  0xb6   : > { %639 = vst.msk [vmem:[#allocation2 + $0x54] sm:$0xe] %vm622_vm5, %v518_v42  ;;  %642 = vst.msk [vmem:[#allocation2 + $0x60] sm:$0xe] %vm622_vm5, %v523_v48  ;;  %v2606_v1 = vld [vmem:[#allocation2 + $0x18] sm:$0xe] }
  0xb7   : > { %637 = vst.msk [vmem:[#allocation2 + $0x4c] sm:$0xf] %vm364_vm0, %v516_v50  ;;  %640 = vst.msk [vmem:[#allocation2 + $0x58] sm:$0xf] %vm364_vm0, %v521_v55  ;;  %v6280_v9 = vrot.slane %v2606_v1, 9  ;;  %v529_v28 = vrot.slane %v528_v18, 4 }
  0xb8   : > { %638 = vst.msk [vmem:[#allocation2 + $0x50] sm:$0x1] %vm625_vm7, %v517_v45  ;;  %641 = vst.msk [vmem:[#allocation2 + $0x5c] sm:$0x1] %vm625_vm7, %v522_v53  ;;  %v2609_v20 = vld [vmem:[#allocation2 + $0x24] sm:$0xe] }
  0xb9   : > { %v7645_v57 = vld [vmem:[#allocation2 + $0x18] sm:$0xff]   ;;  %643 = vst.msk [vmem:[#allocation2 + $0x64] sm:$0xf] %vm364_vm0, %v526_v58  ;;  %v7648_v61 = vld [vmem:[#allocation2 + $0x24] sm:$0xff]   ;;  %vm8327_vm10 = vmor %vm1130_vm8, %vm1131_vm9  ;;  %v6281_v25 = vrot.slane %v2609_v20, 9  ;;  %v532_v29 = vrot.slane %v530_v19, 4  ;;  %v531_v37 = vsel %vm8257_vm6, %v529_v28, %v530_v19 }
  0xba   : > { %v7646_v59 = vld [vmem:[#allocation2 + $0x18] sm:$0xff]   ;;  %644 = vst.msk [vmem:[#allocation2 + $0x68] sm:$0x1] %vm625_vm7, %v527_v56  ;;  %6744 = vmatprep.mubr.msk.bf16.mxu1 %vm792_vm2, %v7645_v57  ;;  %v7649_v62 = vld [vmem:[#allocation2 + $0x24] sm:$0xff]   ;;  %v2611_v24 = vld [vmem:[#allocation2 + $0x2c] sm:$0x1] }
  0xbb   : > { %6842 = vmatprep.mubr.msk.bf16.mxu0 %vm792_vm2, %v7646_v59  ;;  %6745 = vmatmul.mubr.msk.bf16.gmra.mrb[4].mxu1 %vm792_vm2, %v7648_v61  ;;  %v2607_v8 = vld [vmem:[#allocation2 + $0x1c] sm:$0xf]  ;;  %v2610_v23 = vld [vmem:[#allocation2 + $0x28] sm:$0xf]  ;;  %645 = vst.msk [vmem:[#allocation2 + $0x6c] sm:$0xe] %vm622_vm5, %v528_v18 }
  0xbc   : > { %v7650_v63 = vld [vmem:[#allocation2 + $0x30] sm:$0xff]   ;;  %6843 = vmatmul.mubr.msk.bf16.vlgmr.msra.gmra.mrb[0].mxu0 %vm792_vm2, %v7649_v62  ;;  %v7652_v2 = vld [vmem:[#allocation2 + $0x3c] sm:$0xff]   ;;  %v2704_v12 = vrot.slane %v2607_v8, 5  ;;  %v2711_v30 = vrot.slane %v2610_v23, 5  ;;  %v2714_v32 = vrot.slane %v2611_v24, 5  ;;  %vm1703_vm11 = vcmask 1041408  }
  0xbd   : > { %v7651_v0 = vld [vmem:[#allocation2 + $0x30] sm:$0xff]   ;;  %6748 = vmatprep.mubr.msk.bf16.mxu1 %vm792_vm2, %v7650_v63  ;;  %6875 = vmatpush3.bf16.msra.mxu0 %v8261_v10  ;;  %v7653_v3 = vld [vmem:[#allocation2 + $0x3c] sm:$0xff]   ;;  %647 = vst.msk [vmem:[#allocation2 + $0x74] sm:$0x1] %vm625_vm7, %v532_v29  ;;  %v2614_v41 = vld [vmem:[#allocation2 + $0x38] sm:$0x1] }
  0xbe   : > { %6846 = vmatprep.mubr.msk.bf16.mxu0 %vm792_vm2, %v7651_v0  ;;  %6908 = vmatprep.subr.bf16.mxu0 %v8315_v60  ;;  %v7654_v5 = vld [vmem:[#allocation2 + $0x48] sm:$0xff]   ;;  %v2608_v10 = vld [vmem:[#allocation2 + $0x20] sm:$0x1]  ;;  %v7656_v16 = vld [vmem:[#allocation2 + $0x54] sm:$0xff]   ;;  %v2706_v17 = vrot.slane %v2704_v12, 4  ;;  %v2705_v22 = vsel %vm8327_vm10, %v6280_v9, %v2704_v12  ;;  %v2713_v38 = vrot.slane %v2711_v30, 4  ;;  %v2712_v52 = vsel %vm8327_vm10, %v6281_v25, %v2711_v30 }
  0xbf   : > { %v7655_v6 = vld [vmem:[#allocation2 + $0x48] sm:$0xff]   ;;  %v2707_v13 = vrot.slane %v2608_v10, 5  ;;  %v7657_v21 = vld [vmem:[#allocation2 + $0x54] sm:$0xff]   ;;  %v442_v31 = vld [vmem:[%s8177_s19 + $0x40] sm:$0xf]  ;;  %v2721_v45 = vrot.slane %v2614_v41, 5 }
  0xc0   : > { %v7658_v26 = vld [vmem:[#allocation2 + $0x60] sm:$0xff]   ;;  %v443_v33 = vld [vmem:[%s8177_s19 + $0x44] sm:$0xf]  ;;  %v533_v34 = vrot.slane %v442_v31, 7  ;;  %v2612_v35 = vld [vmem:[#allocation2 + $0x30] sm:$0xe]  ;;  %v2715_v53 = vsel %vm8327_vm10, %v2713_v38, %v2714_v32 }
  0xc1   : > { %v2708_v27 = vsel %vm8327_vm10, %v2706_v17, %v2707_v13  ;;  %v535_v39 = vrot.slane %v443_v33, 7  ;;  %v2613_v40 = vld [vmem:[#allocation2 + $0x34] sm:$0xf]  ;;  %646 = vst.msk [vmem:[#allocation2 + $0x70] sm:$0xf] %vm364_vm0, %v531_v37  ;;  %v6282_v43 = vrot.slane %v2612_v35, 9 }
  0xc2   : > { %v6296_v36 = vcombine.low %v2705_v22, %v2708_v27  ;;  %v534_v42 = vrot.slane %v533_v34, 4  ;;  %648 = vst.msk [vmem:[#allocation2 + $0x78] sm:$0xe] %vm622_vm5, %v533_v34  ;;  %v2718_v44 = vrot.slane %v2613_v40, 5  ;;  %v444_v46 = vld [vmem:[%s8177_s19 + $0x48] sm:$0xf] }
  0xc3   : > { %6749 = vmatmul.mubr.msk.bf16.gmra.mrb[8].mxu1 %vm792_vm2, %v7652_v2  ;;  %v537_v47 = vrot.slane %v535_v39, 4  ;;  %v445_v48 = vld [vmem:[%s8177_s19 + $0x4c] sm:$0xf]  ;;  %v538_v50 = vrot.slane %v444_v46, 7  ;;  %v2616_v56 = vld [vmem:[#allocation2 + $0x40] sm:$0xf] }
  0xc4   : > { %6847 = vmatmul.mubr.msk.bf16.gmra.mrb[4].mxu0 %vm792_vm2, %v7653_v3  ;;  %6752 = vmatprep.mubr.msk.bf16.mxu1 %vm792_vm2, %v7654_v5  ;;  %v2615_v51 = vld [vmem:[#allocation2 + $0x3c] sm:$0xe]  ;;  %v536_v54 = vsel %vm8257_vm6, %v534_v42, %v535_v39  ;;  %v2720_v55 = vrot.slane %v2718_v44, 4  ;;  %v2617_v57 = vld [vmem:[#allocation2 + $0x44] sm:$0x1]  ;;  %v540_v59 = vrot.slane %v445_v48, 7  ;;  %v2719_v63 = vsel %vm8327_vm10, %v6282_v43, %v2718_v44 }
  0xc5   : > { %6850 = vmatprep.mubr.msk.bf16.mxu0 %vm792_vm2, %v7655_v6  ;;  %649 = vst.msk [vmem:[#allocation2 + $0x7c] sm:$0xf] %vm364_vm0, %v536_v54  ;;  %v539_v58 = vrot.slane %v538_v50, 4  ;;  %v2725_v61 = vrot.slane %v2616_v56, 5  ;;  %v446_v62 = vld [vmem:[%s8177_s19 + $0x50] sm:$0xf]  ;;  %v6297_v5 = vcombine.low %v2712_v52, %v2715_v53 }
  0xc6   : > { %650 = vst.msk [vmem:[#allocation2 + $0x80] sm:$0x1] %vm625_vm7, %v537_v47  ;;  %v2722_v0 = vsel %vm8327_vm10, %v2720_v55, %v2721_v45  ;;  %v6283_v1 = vrot.slane %v2615_v51, 9  ;;  %v447_v2 = vld [vmem:[%s8177_s19 + $0x54] sm:$0xf]  ;;  %v543_v3 = vrot.slane %v446_v62, 7 }
  0xc7   : > { %651 = vst.msk [vmem:[#allocation2 + $0x84] sm:$0xe] %vm622_vm5, %v538_v50  ;;  %v541_v6 = vsel %vm8257_vm6, %v539_v58, %v540_v59  ;;  %v542_v8 = vrot.slane %v540_v59, 4  ;;  %v2728_v9 = vrot.slane %v2617_v57, 5  ;;  %v2618_v10 = vld [vmem:[#allocation2 + $0x48] sm:$0xe]  ;;  %v6298_v20 = vcombine.low %v2719_v63, %v2722_v0 }
  0xc8   : > { %v2619_v12 = vld [vmem:[#allocation2 + $0x4c] sm:$0xf]  ;;  %652 = vst.msk [vmem:[#allocation2 + $0x88] sm:$0xf] %vm364_vm0, %v541_v6  ;;  %v2727_v13 = vrot.slane %v2725_v61, 4  ;;  %v544_v14 = vrot.slane %v543_v3, 4  ;;  %v2726_v32 = vsel %vm8327_vm10, %v6283_v1, %v2725_v61 }
  0xc9   : > { %v545_v15 = vrot.slane %v447_v2, 7  ;;  %654 = vst.msk [vmem:[#allocation2 + $0x90] sm:$0xe] %vm622_vm5, %v543_v3  ;;  %v6284_v17 = vrot.slane %v2618_v10, 9  ;;  %v8373_v18 = vld [vmem:[#allocation7 + $0x30] sm:$0xff]   ;;  %v7660_v19 = vld [vmem:[#allocation2 + $0x6c] sm:$0xff]  }
  0xca   : > { %653 = vst.msk [vmem:[#allocation2 + $0x8c] sm:$0x1] %vm625_vm7, %v542_v8  ;;  %v448_v25 = vld [vmem:[%s8177_s19 + $0x58] sm:$0xf]  ;;  %v2621_v29 = vld [vmem:[#allocation2 + $0x54] sm:$0xe]  ;;  %v2729_v34 = vsel %vm8327_vm10, %v2727_v13, %v2728_v9 }
  0xcb   : > { %6753 = vmatmul.mubr.msk.bf16.gmra.mrb[12].mxu1 %vm792_vm2, %v7656_v16  ;;  %v2620_v16 = vld [vmem:[#allocation2 + $0x50] sm:$0x1]  ;;  %v546_v22 = vsel %vm8257_vm6, %v544_v14, %v545_v15  ;;  %v547_v23 = vrot.slane %v545_v15, 4  ;;  %v548_v28 = vrot.slane %v448_v25, 7  ;;  %v2622_v30 = vld [vmem:[#allocation2 + $0x58] sm:$0xf]  ;;  %v6299_v47 = vcombine.low %v2726_v32, %v2729_v34 }
  0xcc   : > { %6851 = vmatmul.mubr.msk.bf16.gmra.mrb[8].mxu0 %vm792_vm2, %v7657_v21  ;;  %6756 = vmatprep.mubr.msk.bf16.mxu1 %vm792_vm2, %v7658_v26  ;;  %v2732_v21 = vrot.slane %v2619_v12, 5  ;;  %v2735_v24 = vrot.slane %v2620_v16, 5  ;;  %v449_v26 = vld [vmem:[%s8177_s19 + $0x5c] sm:$0xf]  ;;  %655 = vst.msk [vmem:[#allocation2 + $0x94] sm:$0xf] %vm364_vm0, %v546_v22 }
  0xcd   : > { %6876 = vmatprep.mubr.msk.bf16.mxu0 %vm792_vm2, %v6296_v36  ;;  %v7661_v31 = vld [vmem:[#allocation2 + $0x78] sm:$0xff]   ;;  %656 = vst.msk [vmem:[#allocation2 + $0x98] sm:$0x1] %vm625_vm7, %v547_v23  ;;  %v550_v33 = vrot.slane %v449_v26, 7  ;;  %v549_v35 = vrot.slane %v548_v28, 4  ;;  %v6285_v37 = vrot.slane %v2621_v29, 9 }
  0xce   : > { %v2734_v27 = vrot.slane %v2732_v21, 4  ;;  %657 = vst.msk [vmem:[#allocation2 + $0x9c] sm:$0xe] %vm622_vm5, %v548_v28  ;;  %v2623_v36 = vld [vmem:[#allocation2 + $0x5c] sm:$0x1]  ;;  %v2739_v38 = vrot.slane %v2622_v30, 5  ;;  %v2733_v39 = vsel %vm8327_vm10, %v6284_v17, %v2732_v21 }
  0xcf   : > { %v2742_v41 = vrot.slane %v2623_v36, 5  ;;  %v450_v42 = vld [vmem:[%s8177_s19 + $0x60] sm:$0xf]  ;;  %v451_v43 = vld [vmem:[%s8177_s19 + $0x64] sm:$0xf]  ;;  %v7662_v44 = vld [vmem:[#allocation2 + $0x84] sm:$0xff]   ;;  %v551_v45 = vsel %vm8257_vm6, %v549_v35, %v550_v33 }
  0xd0   : > { %v2736_v40 = vsel %vm8327_vm10, %v2734_v27, %v2735_v24  ;;  %v2741_v46 = vrot.slane %v2739_v38, 4  ;;  %658 = vst.msk [vmem:[#allocation2 + $0xa0] sm:$0xf] %vm364_vm0, %v551_v45  ;;  %v553_v48 = vrot.slane %v450_v42, 7  ;;  %v555_v50 = vrot.slane %v451_v43, 7  ;;  %s6115_s11 = sshll.u32 %s8173_s17, 8 }
  0xd1   : > { %v2624_v51 = vld [vmem:[#allocation2 + $0x60] sm:$0xe]  ;;  %v2625_v52 = vld [vmem:[#allocation2 + $0x64] sm:$0xf]  ;;  %v6300_v53 = vcombine.low %v2733_v39, %v2736_v40  ;;  %v2626_v54 = vld [vmem:[#allocation2 + $0x68] sm:$0x1]  ;;  %v2740_v9 = vsel %vm8327_vm10, %v6285_v37, %v2739_v38 }
  0xd2   : > { %v6286_v55 = vrot.slane %v2624_v51, 9  ;;  %v2746_v56 = vrot.slane %v2625_v52, 5  ;;  %v452_v57 = vld [vmem:[%s8177_s19 + $0x68] sm:$0xf]  ;;  %v554_v59 = vrot.slane %v553_v48, 4  ;;  %v557_v61 = vrot.slane %v555_v50, 4 }
  0xd3   : > { %6757 = vmatmul.mubr.msk.bf16.gmra.mrb[16].mxu1 %vm792_vm2, %v7660_v19  ;;  %v7663_v58 = vld [vmem:[#allocation2 + $0x90] sm:$0xff]   ;;  %660 = vst.msk [vmem:[#allocation2 + $0xa8] sm:$0xe] %vm622_vm5, %v553_v48  ;;  %v2749_v62 = vrot.slane %v2626_v54, 5  ;;  %v453_v0 = vld [vmem:[%s8177_s19 + $0x6c] sm:$0xf]  ;;  %v2743_v10 = vsel %vm8327_vm10, %v2741_v46, %v2742_v41 }
  0xd4   : > { %6877 = vmatmul.mubr.msk.bf16.vlgmr.msra.gmra.mrb[0].mxu0 %vm792_vm2, %v6297_v5  ;;  %6760 = vmatprep.mubr.msk.bf16.mxu1 %vm792_vm2, %v7661_v31  ;;  %v2748_v63 = vrot.slane %v2746_v56, 4  ;;  %v558_v1 = vrot.slane %v452_v57, 7  ;;  %v2627_v2 = vld [vmem:[#allocation2 + $0x6c] sm:$0xe]  ;;  %v556_v3 = vsel %vm8257_vm6, %v554_v59, %v555_v50  ;;  %662 = vst.msk [vmem:[#allocation2 + $0xb0] sm:$0x1] %vm625_vm7, %v557_v61  ;;  %v2747_v15 = vsel %vm8327_vm10, %v6286_v55, %v2746_v56 }
  0xd5   : > { %6909 = vmatpush3.bf16.msra.mxu0 %v8315_v60  ;;  %6880 = vmatprep.mubr.msk.bf16.mxu0 %vm792_vm2, %v6298_v20  ;;  %v552_v60 = vrot.slane %v550_v33, 4  ;;  %v560_v5 = vrot.slane %v453_v0, 7  ;;  %v2628_v6 = vld [vmem:[#allocation2 + $0x70] sm:$0xf]  ;;  %v6287_v8 = vrot.slane %v2627_v2, 9  ;;  %v6301_v25 = vcombine.low %v2740_v9, %v2743_v10  ;;  %s9508_s14 = scalar_lea.vmem [#allocation12], %s6115_s11 }
  0xd6   : > { %6942 = vmatprep.subr.bf16.mxu0 %v8373_v18  ;;  %661 = vst.msk [vmem:[#allocation2 + $0xac] sm:$0xf] %vm364_vm0, %v556_v3  ;;  %v559_v12 = vrot.slane %v558_v1, 4  ;;  %v2629_v13 = vld [vmem:[#allocation2 + $0x74] sm:$0x1]  ;;  %v2753_v14 = vrot.slane %v2628_v6, 5  ;;  %v2750_v16 = vsel %vm8327_vm10, %v2748_v63, %v2749_v62 }
  0xd7   : > { %659 = vst.msk [vmem:[#allocation2 + $0xa4] sm:$0x1] %vm625_vm7, %v552_v60  ;;  %v562_v17 = vrot.slane %v560_v5, 4  ;;  %v2756_v19 = vrot.slane %v2629_v13, 5  ;;  %v1034_v20 = vld [vmem:[#allocation2] sm:$0xe]  ;;  %v6302_v30 = vcombine.low %v2747_v15, %v2750_v16 }
  0xd8   : > { %663 = vst.msk [vmem:[#allocation2 + $0xb4] sm:$0xe] %vm622_vm5, %v558_v1  ;;  %v7664_v21 = vld [vmem:[#allocation2 + $0x9c] sm:$0xff]   ;;  %v561_v22 = vsel %vm8257_vm6, %v559_v12, %v560_v5  ;;  %v2755_v23 = vrot.slane %v2753_v14, 4  ;;  %v1035_v24 = vld [vmem:[#allocation2 + $0x4] sm:$0xf]  ;;  %v2754_v42 = vsel %vm8327_vm10, %v6287_v8, %v2753_v14 }
  0xd9   : > { %664 = vst.msk [vmem:[#allocation2 + $0xb8] sm:$0xf] %vm364_vm0, %v561_v22  ;;  %v1036_v26 = vld [vmem:[#allocation2 + $0x8] sm:$0x1]  ;;  %v6149_v27 = vrot.slane %v1034_v20, 9  ;;  %v1135_v28 = vrot.slane %v1035_v24, 5 }
  0xda   : > { %665 = vst.msk [vmem:[#allocation2 + $0xbc] sm:$0x1] %vm625_vm7, %v562_v17  ;;  %v2630_v29 = vld [vmem:[#allocation2 + $0x78] sm:$0xe]  ;;  %v1138_v31 = vrot.slane %v1036_v26, 5  ;;  %v2757_v43 = vsel %vm8327_vm10, %v2755_v23, %v2756_v19  ;;  %vm1704_vm12 = vcmask 1045508  }
  0xdb   : > { %6761 = vmatmul.mubr.msk.bf16.gmra.mrb[20].mxu1 %vm792_vm2, %v7662_v44  ;;  %v2631_v32 = vld [vmem:[#allocation2 + $0x7c] sm:$0xf]  ;;  %v6288_v33 = vrot.slane %v2630_v29, 9  ;;  %v1137_v34 = vrot.slane %v1135_v28, 4  ;;  %v2632_v35 = vld [vmem:[#allocation2 + $0x80] sm:$0x1]  ;;  %v1136_v44 = vsel %vm8327_vm10, %v6149_v27, %v1135_v28  ;;  %vm8533_vm13 = vmor %vm1703_vm11, %vm1704_vm12 }
  0xdc   : > { %6881 = vmatmul.mubr.msk.bf16.gmra.mrb[4].mxu0 %vm792_vm2, %v6299_v47  ;;  %6764 = vmatprep.mubr.msk.bf16.mxu1 %vm792_vm2, %v7663_v58  ;;  %v2760_v36 = vrot.slane %v2631_v32, 5  ;;  %v1037_v37 = vld [vmem:[#allocation2 + $0xc] sm:$0xe]  ;;  %v2763_v38 = vrot.slane %v2632_v35, 5  ;;  %v1038_v39 = vld [vmem:[#allocation2 + $0x10] sm:$0xf]  ;;  %v6303_v58 = vcombine.low %v2754_v42, %v2757_v43 }
  0xdd   : > { %6884 = vmatprep.mubr.msk.bf16.mxu0 %vm792_vm2, %v6300_v53  ;;  %v1039_v40 = vld [vmem:[#allocation2 + $0x14] sm:$0x1]  ;;  %v6150_v60 = vrot.slane %v1037_v37, 9  ;;  %v7665_v41 = vld [vmem:[#allocation2 + $0xa8] sm:$0xff]   ;;  %v1139_v46 = vsel %vm8327_vm10, %v1137_v34, %v1138_v31  ;;  %v1142_v48 = vrot.slane %v1038_v39, 5  ;;  %vm7917_vm14 = vmmov 0  }
  0xde   : > { %v2762_v45 = vrot.slane %v2760_v36, 4  ;;  %v2761_v47 = vsel %vm8327_vm10, %v6288_v33, %v2760_v36  ;;  %v1145_v50 = vrot.slane %v1039_v40, 5  ;;  %v2633_v51 = vld [vmem:[#allocation2 + $0x84] sm:$0xe]  ;;  %v2634_v52 = vld [vmem:[#allocation2 + $0x88] sm:$0xf]  ;;  %v6165_v63 = vcombine.low %v1136_v44, %v1139_v46 }
  0xdf   : > { %v2635_v54 = vld [vmem:[#allocation2 + $0x8c] sm:$0x1]  ;;  %v2767_v55 = vrot.slane %v2634_v52, 5  ;;  %v1040_v56 = vld [vmem:[#allocation2 + $0x18] sm:$0xe]  ;;  %v1144_v59 = vrot.slane %v1142_v48, 4  ;;  %v1143_v6 = vsel %vm8327_vm10, %v6150_v60, %v1142_v48 }
  0xe0   : > { %v2764_v53 = vsel %vm8327_vm10, %v2762_v45, %v2763_v38  ;;  %v7666_v57 = vld [vmem:[#allocation2 + $0xb4] sm:$0xff]   ;;  %v6289_v61 = vrot.slane %v2633_v51, 9  ;;  %v2770_v62 = vrot.slane %v2635_v54, 5  ;;  %v1041_v2 = vld [vmem:[#allocation2 + $0x1c] sm:$0xf]  ;;  %v6151_v5 = vrot.slane %v1040_v56, 9 }
  0xe1   : > { %v6304_v0 = vcombine.low %v2761_v47, %v2764_v53  ;;  %v2769_v1 = vrot.slane %v2767_v55, 4  ;;  %v1042_v3 = vld [vmem:[#allocation2 + $0x20] sm:$0x1]  ;;  %v1146_v8 = vsel %vm8327_vm10, %v1144_v59, %v1145_v50  ;;  %v1149_v9 = vrot.slane %v1041_v2, 5  ;;  %v2636_v12 = vld [vmem:[#allocation2 + $0x90] sm:$0xe] }
  0xe2   : > { %v1152_v10 = vrot.slane %v1042_v3, 5  ;;  %v2637_v13 = vld [vmem:[#allocation2 + $0x94] sm:$0xf]  ;;  %v2638_v14 = vld [vmem:[#allocation2 + $0x98] sm:$0x1]  ;;  %v6290_v15 = vrot.slane %v2636_v12, 9  ;;  %v6166_v23 = vcombine.low %v1143_v6, %v1146_v8  ;;  %v2768_v24 = vsel %vm8327_vm10, %v6289_v61, %v2767_v55 }
  0xe3   : > { %6765 = vmatmul.mubr.msk.bf16.gmra.mrb[24].mxu1 %vm792_vm2, %v7664_v21  ;;  %v2774_v16 = vrot.slane %v2637_v13, 5  ;;  %v1043_v17 = vld [vmem:[#allocation2 + $0x24] sm:$0xe]  ;;  %v1151_v19 = vrot.slane %v1149_v9, 4  ;;  %v2777_v20 = vrot.slane %v2638_v14, 5  ;;  %v2771_v28 = vsel %vm8327_vm10, %v2769_v1, %v2770_v62  ;;  %s6516_s13 = sshll.u32 %s7897_s24, 12 }
  0xe4   : > { %6885 = vmatmul.mubr.msk.bf16.gmra.mrb[8].mxu0 %vm792_vm2, %v6301_v25  ;;  %6768 = vmatprep.mubr.msk.bf16.mxu1 %vm792_vm2, %v7665_v41  ;;  %v1044_v21 = vld [vmem:[#allocation2 + $0x28] sm:$0xf]  ;;  %v1045_v22 = vld [vmem:[#allocation2 + $0x2c] sm:$0x1]  ;;  %v2639_v27 = vld [vmem:[#allocation2 + $0x9c] sm:$0xe]  ;;  %v1150_v29 = vsel %vm8327_vm10, %v6151_v5, %v1149_v9  ;;  %v6305_v44 = vcombine.low %v2768_v24, %v2771_v28  ;;  %s9547_s28 = scalar_lea.hbm %s9620_s6, %s6516_s13 }
  0xe5   : > { %6888 = vmatprep.mubr.msk.bf16.mxu0 %vm792_vm2, %v6302_v30  ;;  %v2776_v25 = vrot.slane %v2774_v16, 4  ;;  %v1156_v26 = vrot.slane %v1044_v21, 5  ;;  %v1153_v30 = vsel %vm8327_vm10, %v1151_v19, %v1152_v10  ;;  %v6152_v31 = vrot.slane %v1043_v17, 9  ;;  %v2640_v32 = vld [vmem:[#allocation2 + $0xa0] sm:$0xf]  ;;  %s5960_s16 = sshll.u32 %s9508_s14, 4  ;;  %s9549_s16 = int_to_ptr.vmem [resolvable:$true] %s5960_s16 }
  0xe6   : > { %v2641_v33 = vld [vmem:[#allocation2 + $0xa4] sm:$0x1]  ;;  %v2775_v34 = vsel %vm8327_vm10, %v6290_v15, %v2774_v16  ;;  %v1159_v36 = vrot.slane %v1045_v22, 5  ;;  %v6291_v37 = vrot.slane %v2639_v27, 9  ;;  %v1046_v38 = vld [vmem:[#allocation2 + $0x30] sm:$0xe]  ;;  %v6167_v45 = vcombine.low %v1150_v29, %v1153_v30 }
  0xe7   : > { %v2778_v35 = vsel %vm8327_vm10, %v2776_v25, %v2777_v20  ;;  %v1047_v39 = vld [vmem:[#allocation2 + $0x34] sm:$0xf]  ;;  %v1158_v40 = vrot.slane %v1156_v26, 4  ;;  %v2781_v60 = vrot.slane %v2640_v32, 5  ;;  %v2784_v41 = vrot.slane %v2641_v33, 5  ;;  %s5946_s30 = scalar_lea.sflag [#allocation6], %s8173_s17 }
  0xe8   : > { %v1048_v42 = vld [vmem:[#allocation2 + $0x38] sm:$0x1]  ;;  %v6153_v43 = vrot.slane %v1046_v38, 9  ;;  %v1163_v46 = vrot.slane %v1047_v39, 5  ;;  %v2642_v48 = vld [vmem:[#allocation2 + $0xa8] sm:$0xe]  ;;  %v6306_v51 = vcombine.low %v2775_v34, %v2778_v35  ;;  %v1157_v61 = vsel %vm8327_vm10, %v6152_v31, %v1156_v26 }
  0xe9   : > { %v1166_v47 = vrot.slane %v1048_v42, 5  ;;  %v2643_v50 = vld [vmem:[#allocation2 + $0xac] sm:$0xf]  ;;  %v2783_v52 = vrot.slane %v2781_v60, 4  ;;  %v2644_v53 = vld [vmem:[#allocation2 + $0xb0] sm:$0x1]  ;;  %v1160_v62 = vsel %vm8327_vm10, %v1158_v40, %v1159_v36 }
  0xea   : > { %v6292_v54 = vrot.slane %v2642_v48, 9  ;;  %v1049_v55 = vld [vmem:[#allocation2 + $0x3c] sm:$0xe]  ;;  %v1165_v56 = vrot.slane %v1163_v46, 4  ;;  %v1050_v59 = vld [vmem:[#allocation2 + $0x40] sm:$0xf]  ;;  %v1164_v5 = vsel %vm8327_vm10, %v6153_v43, %v1163_v46  ;;  %v6168_v24 = vcombine.low %v1157_v61, %v1160_v62 }
  0xeb   : > { %6769 = vmatmul.mubr.msk.bf16.gmra.mrb[28].mxu1 %vm792_vm2, %v7666_v57  ;;  %v2788_v57 = vrot.slane %v2643_v50, 5  ;;  %v1170_v1 = vrot.slane %v1050_v59, 5  ;;  %v2645_v2 = vld [vmem:[#allocation2 + $0xb4] sm:$0xe]  ;;  %v2785_v3 = vsel %vm8327_vm10, %v2783_v52, %v2784_v41  ;;  %v6154_v8 = vrot.slane %v1049_v55, 9  ;;  %s7815_s8 = scalar_lea.vmem %s9549_s16, 4096 }
  0xec   : > { %6889 = vmatmul.mubr.msk.bf16.gmra.mrb[12].mxu0 %vm792_vm2, %v6303_v58  ;;  %6774 = vmatprep.mubr.msk.bf16.mxu1 %vm792_vm2, %v6165_v63  ;;  %v2791_v58 = vrot.slane %v2644_v53, 5  ;;  %v2782_v63 = vsel %vm8327_vm10, %v6291_v37, %v2781_v60  ;;  %v2646_v9 = vld [vmem:[#allocation2 + $0xb8] sm:$0xf]  ;;  %v2647_v10 = vld [vmem:[#allocation2 + $0xbc] sm:$0x1]  ;;  %v1167_v12 = vsel %vm8327_vm10, %v1165_v56, %v1166_v47  ;;  %v6293_v20 = vrot.slane %v2645_v2, 9  ;;  %p7816_p13 = scmp.ne.s32.totalorder %s9549_s16, %s7815_s8 }
  0xed   : > { %6892 = vmatprep.mubr.msk.bf16.mxu0 %vm792_vm2, %v6304_v0  ;;  %v1051_v0 = vld [vmem:[#allocation2 + $0x44] sm:$0x1]  ;;  %v2790_v6 = vrot.slane %v2788_v57, 4  ;;  %v2789_v13 = vsel %vm8327_vm10, %v6292_v54, %v2788_v57  ;;  %v1172_v14 = vrot.slane %v1170_v1, 4  ;;  %v1052_v16 = vld [vmem:[#allocation2 + $0x48] sm:$0xe]  ;;  %v6307_v25 = vcombine.low %v2782_v63, %v2785_v3 }
  0xee   : > { %v1173_v15 = vrot.slane %v1051_v0, 5  ;;  %v1053_v17 = vld [vmem:[#allocation2 + $0x4c] sm:$0xf]  ;;  %v2795_v21 = vrot.slane %v2646_v9, 5  ;;  %v2798_v22 = vrot.slane %v2647_v10, 5  ;;  %v6155_v26 = vrot.slane %v1052_v16, 9  ;;  %p7817_p6 = pnand %p7816_p13, %p8114_p3 }
  0xef   : > { %v2792_v19 = vsel %vm8327_vm10, %v2790_v6, %v2791_v58  ;;  %v1177_v27 = vrot.slane %v1053_v17, 5  ;;  %v454_v28 = vld [vmem:[%s8177_s19 + $0x70] sm:$0xf]  ;;  %v455_v29 = vld [vmem:[%s8177_s19 + $0x74] sm:$0xf]  ;;  %v6169_v30 = vcombine.low %v1164_v5, %v1167_v12  ;;  %s7919_s20 = smov [#allocation12]  }
  0xf0   : > { %v2797_v31 = vrot.slane %v2795_v21, 4  ;;  %v1055_v33 = vld [vmem:[#allocation2 + $0x54] sm:$0xe]  ;;  %v1056_v34 = vld [vmem:[#allocation2 + $0x58] sm:$0xf]  ;;  %v6308_v35 = vcombine.low %v2789_v13, %v2792_v19  ;;  %v565_v37 = vrot.slane %v455_v29, 7  ;;  %v1174_v39 = vsel %vm8327_vm10, %v1172_v14, %v1173_v15  ;;  %p7818_p10 = pneg %p7817_p6 }
  0xf1   : > { %v1179_v36 = vrot.slane %v1177_v27, 4  ;;  %v1057_v38 = vld [vmem:[#allocation2 + $0x5c] sm:$0x1]  ;;  %v6156_v40 = vrot.slane %v1055_v33, 9  ;;  %v1184_v60 = vrot.slane %v1056_v34, 5  ;;  %v2796_v43 = vsel %vm8327_vm10, %v6293_v20, %v2795_v21  ;;  %s7819_s12 = sshll.u32 %s7919_s20, 4  ;;  %s7820_s12 = int_to_ptr.vmem [resolvable:$false] %s7819_s12 }
  0xf2   : > { %v1187_v41 = vrot.slane %v1057_v38, 5  ;;  %v456_v42 = vld [vmem:[%s8177_s19 + $0x78] sm:$0xf]  ;;  %v567_v46 = vrot.slane %v565_v37, 4  ;;  %v457_v47 = vld [vmem:[%s8177_s19 + $0x7c] sm:$0xf]  ;;  %v2799_v50 = vsel %vm8327_vm10, %v2797_v31, %v2798_v22  ;;  %p7822_p11 = scmp.lt.s32.totalorder %s9549_s16, %s7820_s12 }
  0xf3   : > { %6775 = vmatmul.mubr.msk.bf16.vlgmr.msra.gmra.mrb[0].mxu1 %vm792_vm2, %v6166_v23  ;;  %v1054_v23 = vld [vmem:[#allocation2 + $0x50] sm:$0x1]  ;;  %v1058_v48 = vld [vmem:[#allocation2 + $0x60] sm:$0xe]  ;;  %v1186_v52 = vrot.slane %v1184_v60, 4  ;;  %v568_v53 = vrot.slane %v456_v42, 7  ;;  %v6309_v5 = vcombine.low %v2796_v43, %v2799_v50  ;;  %v1185_v13 = vsel %vm8327_vm10, %v6156_v40, %v1184_v60 }
  0xf4   : > { %6893 = vmatmul.mubr.msk.bf16.gmra.mrb[16].mxu0 %vm792_vm2, %v6305_v44  ;;  %6778 = vmatprep.mubr.msk.bf16.mxu1 %vm792_vm2, %v6167_v45  ;;  %v1180_v32 = vrot.slane %v1054_v23, 5  ;;  %v1178_v44 = vsel %vm8327_vm10, %v6155_v26, %v1177_v27  ;;  %v1059_v54 = vld [vmem:[#allocation2 + $0x64] sm:$0xf]  ;;  %v1060_v55 = vld [vmem:[#allocation2 + $0x68] sm:$0x1]  ;;  %v570_v57 = vrot.slane %v457_v47, 7 }
  0xf5   : > { %6896 = vmatprep.mubr.msk.bf16.mxu0 %vm792_vm2, %v6306_v51  ;;  %6807 = vmatpush3.bf16.msra.mxu1 %v8297_v49  ;;  %v8489_v49 = vsel %vm8327_vm10, %v6154_v8, %v1170_v1  ;;  %668 = vst.msk [vmem:[#allocation2 + $0xc8] sm:$0x1] %vm625_vm7, %v567_v46  ;;  %v6157_v58 = vrot.slane %v1058_v48, 9  ;;  %v1191_v59 = vrot.slane %v1059_v54, 5  ;;  %v569_v61 = vrot.slane %v568_v53, 4  ;;  %s7821_s21 = scalar_lea.vmem %s7820_s12, 8192 }
  0xf6   : > { %7280 = vmatprep.subr.bf16.mxu1 %v8252_v4  ;;  %v563_v4 = vrot.slane %v454_v28, 7  ;;  %v1181_v51 = vsel %vm8327_vm10, %v1179_v36, %v1180_v32  ;;  %669 = vst.msk [vmem:[#allocation2 + $0xcc] sm:$0xe] %vm622_vm5, %v568_v53  ;;  %v1194_v62 = vrot.slane %v1060_v55, 5  ;;  %v3176_v63 = vld [vmem:[#allocation2 + $0x18] sm:$0xc]  ;;  %v6170_v1 = vcombine.low %v8489_v49, %v1174_v39  ;;  %p7823_p5 = scmp.lt.s32.totalorder %s7821_s21, %s7815_s8 }
  0xf7   : > { %v3177_v0 = vld [vmem:[#allocation2 + $0x1c] sm:$0xf]  ;;  %v572_v2 = vrot.slane %v570_v57, 4  ;;  %v1193_v3 = vrot.slane %v1191_v59, 4  ;;  %v6171_v6 = vcombine.low %v1178_v44, %v1181_v51  ;;  %v571_v8 = vsel %vm8257_vm6, %v569_v61, %v570_v57  ;;  %v3178_v9 = vld [vmem:[#allocation2 + $0x20] sm:$0x3] }
  0xf8   : > { %v564_v45 = vrot.slane %v563_v4, 4  ;;  %666 = vst.msk [vmem:[#allocation2 + $0xc0] sm:$0xe] %vm622_vm5, %v563_v4  ;;  %v3274_v10 = vrot.slane %v3177_v0, 6  ;;  %v1061_v12 = vld [vmem:[#allocation2 + $0x6c] sm:$0xe]  ;;  %v1188_v17 = vsel %vm8327_vm10, %v1186_v52, %v1187_v41  ;;  %v1192_v7 = vsel %vm8327_vm10, %v6157_v58, %v1191_v59  ;;  %p7824_p9 = por %p7823_p5, %p7822_p11 }
  0xf9   : > { %670 = vst.msk [vmem:[#allocation2 + $0xd0] sm:$0xf] %vm364_vm0, %v571_v8  ;;  %v1062_v14 = vld [vmem:[#allocation2 + $0x70] sm:$0xf]  ;;  %v1063_v15 = vld [vmem:[#allocation2 + $0x74] sm:$0x1]  ;;  %v1195_v19 = vsel %vm8327_vm10, %v1193_v3, %v1194_v62  ;;  %v6172_v32 = vcombine.low %v1185_v13, %v1188_v17 }
  0xfa   : > { %v566_v56 = vsel %vm8257_vm6, %v564_v45, %v565_v37  ;;  %671 = vst.msk [vmem:[#allocation2 + $0xd4] sm:$0x1] %vm625_vm7, %v572_v2  ;;  %v1198_v20 = vrot.slane %v1062_v14, 5  ;;  %v6329_v21 = vrot.slane %v3176_v63, 10  ;;  %v3276_v22 = vrot.slane %v3274_v10, 4  ;;  %p7825_p0 = pnand %p7824_p9, %p7818_p10 }
  0xfb   : > { %6779 = vmatmul.mubr.msk.bf16.gmra.mrb[4].mxu1 %vm792_vm2, %v6168_v24  ;;  %667 = vst.msk [vmem:[#allocation2 + $0xc4] sm:$0xf] %vm364_vm0, %v566_v56  ;;  %v3277_v23 = vrot.slane %v3178_v9, 6  ;;  %v6158_v24 = vrot.slane %v1061_v12, 9  ;;  %v1201_v29 = vrot.slane %v1063_v15, 5  ;;  %v6173_v34 = vcombine.low %v1192_v7, %v1195_v19 }
  0xfc   : > { %6897 = vmatmul.mubr.msk.bf16.gmra.mrb[20].mxu0 %vm792_vm2, %v6307_v25  ;;  %6782 = vmatprep.mubr.msk.bf16.mxu1 %vm792_vm2, %v6169_v30  ;;  %v8527_v25 = vld [vmem:[#allocation2 + $0x28] sm:$0xf]  ;;  %v3179_v30 = vld [vmem:[#allocation2 + $0x24] sm:$0xc]  ;;  %v1064_v49 = vld [vmem:[#allocation2 + $0x78] sm:$0xe]  ;;  %v3275_v60 = vsel %vm8533_vm13, %v6329_v21, %v3274_v10 }
  0xfd   : > { %6900 = vmatprep.mubr.msk.bf16.mxu0 %vm792_vm2, %v6308_v35  ;;  %v2650_v26 = vld [vmem:[#allocation2 + $0xc8] sm:$0x1]  ;;  %v2651_v33 = vld [vmem:[#allocation2 + $0xcc] sm:$0xe]  ;;  %v1200_v37 = vrot.slane %v1198_v20, 4  ;;  %v3281_v38 = vrot.slane %v8527_v25, 6  ;;  %v3278_v41 = vsel %vm8533_vm13, %v3276_v22, %v3277_v23  ;;  %v1199_v50 = vsel %vm8327_vm10, %v6158_v24, %v1198_v20 }
  0xfe   : > { %v3181_v35 = vld [vmem:[#allocation2 + $0x2c] sm:$0x3]  ;;  %v2805_v4 = vrot.slane %v2650_v26, 5  ;;  %v1065_v39 = vld [vmem:[#allocation2 + $0x7c] sm:$0xf]  ;;  %v6295_v40 = vrot.slane %v2651_v33, 9  ;;  %v6345_v14 = vcombine.low %v3275_v60, %v3278_v41 }
  0xff   : > { %v2648_v16 = vld [vmem:[#allocation2 + $0xc0] sm:$0xe]  ;;  %v1066_v42 = vld [vmem:[#allocation2 + $0x80] sm:$0x1]  ;;  %v6159_v43 = vrot.slane %v1064_v49, 9  ;;  %v1205_v51 = vrot.slane %v1065_v39, 5  ;;  %v1202_v58 = vsel %vm8327_vm10, %v1200_v37, %v1201_v29 }
 0x100   : > { %v6294_v27 = vrot.slane %v2648_v16, 9  ;;  %v3182_v44 = vld [vmem:[#allocation2 + $0x30] sm:$0xc]  ;;  %v6330_v54 = vrot.slane %v3179_v30, 10  ;;  %v1208_v55 = vrot.slane %v1066_v42, 5  ;;  %v3284_v59 = vrot.slane %v3181_v35, 6 }
 0x101   : > { %v2652_v47 = vld [vmem:[#allocation2 + $0xd0] sm:$0xf]  ;;  %v2653_v48 = vld [vmem:[#allocation2 + $0xd4] sm:$0x1]  ;;  %v1207_v61 = vrot.slane %v1205_v51, 4  ;;  %v3283_v2 = vrot.slane %v3281_v38, 4  ;;  %v6174_v20 = vcombine.low %v1199_v50, %v1202_v58 }
 0x102   : > { %v2649_v31 = vld [vmem:[#allocation2 + $0xc4] sm:$0xf]  ;;  %v2809_v52 = vrot.slane %v2652_v47, 5  ;;  %v2812_v53 = vrot.slane %v2653_v48, 5  ;;  %v3183_v56 = vld [vmem:[#allocation2 + $0x34] sm:$0xf]  ;;  %v3282_v21 = vsel %vm8533_vm13, %v6330_v54, %v3281_v38 }
 0x103   : > { %6783 = vmatmul.mubr.msk.bf16.gmra.mrb[8].mxu1 %vm792_vm2, %v6170_v1  ;;  %v2802_v36 = vrot.slane %v2649_v31, 5  ;;  %v3184_v62 = vld [vmem:[#allocation2 + $0x38] sm:$0x3]  ;;  %v1068_v3 = vld [vmem:[#allocation2 + $0x88] sm:$0xf]  ;;  %v6331_v8 = vrot.slane %v3182_v44, 10  ;;  %v3285_v25 = vsel %vm8533_vm13, %v3283_v2, %v3284_v59 }
 0x104   : > { %6901 = vmatmul.mubr.msk.bf16.gmra.mrb[24].mxu0 %vm792_vm2, %v6309_v5  ;;  %6786 = vmatprep.mubr.msk.bf16.mxu1 %vm792_vm2, %v6171_v6  ;;  %v2810_v0 = vsel %vm8327_vm10, %v6295_v40, %v2809_v52  ;;  %v2811_v1 = vrot.slane %v2809_v52, 4  ;;  %v1206_v5 = vsel %vm8327_vm10, %v6159_v43, %v1205_v51  ;;  %v1209_v6 = vsel %vm8327_vm10, %v1207_v61, %v1208_v55  ;;  %v1067_v10 = vld [vmem:[#allocation2 + $0x84] sm:$0xe]  ;;  %v1069_v12 = vld [vmem:[#allocation2 + $0x8c] sm:$0x1] }
 0x105   : > { %v2803_v45 = vsel %vm8327_vm10, %v6294_v27, %v2802_v36  ;;  %v2804_v46 = vrot.slane %v2802_v36, 4  ;;  %v3288_v9 = vrot.slane %v3183_v56, 6  ;;  %v3291_v15 = vrot.slane %v3184_v62, 6  ;;  %v3185_v17 = vld [vmem:[#allocation2 + $0x3c] sm:$0xc]  ;;  %v8581_v61 = vld [vmem:[#allocation7 + $0x38] sm:$0xff]  }
 0x106   : > { %v2813_v13 = vsel %vm8327_vm10, %v2811_v1, %v2812_v53  ;;  %v1212_v16 = vrot.slane %v1068_v3, 5  ;;  %v3186_v7 = vld [vmem:[#allocation2 + $0x40] sm:$0xf]  ;;  %v1070_v23 = vld [vmem:[#allocation2 + $0x90] sm:$0xe]  ;;  %v6175_v26 = vcombine.low %v1206_v5, %v1209_v6  ;;  %v6160_v27 = vrot.slane %v1067_v10, 9 }
 0x107   : > { %v2806_v57 = vsel %vm8327_vm10, %v2804_v46, %v2805_v4  ;;  %v6311_v19 = vcombine.low %v2810_v0, %v2813_v13  ;;  %v3290_v22 = vrot.slane %v3288_v9, 4  ;;  %v1071_v24 = vld [vmem:[#allocation2 + $0x94] sm:$0xf]  ;;  %v3187_v29 = vld [vmem:[#allocation2 + $0x44] sm:$0x3]  ;;  %v3295_v30 = vrot.slane %v3186_v7, 6 }
 0x108   : > { %v6310_v63 = vcombine.low %v2803_v45, %v2806_v57  ;;  %v1072_v49 = vld [vmem:[#allocation2 + $0x98] sm:$0x1]  ;;  %v1214_v31 = vrot.slane %v1212_v16, 4  ;;  %v6161_v33 = vrot.slane %v1070_v23, 9  ;;  %v3289_v35 = vsel %vm8533_vm13, %v6331_v8, %v3288_v9  ;;  %v3188_v38 = vld [vmem:[#allocation2 + $0x48] sm:$0xc] }
 0x109   : > { %v3292_v36 = vsel %vm8533_vm13, %v3290_v22, %v3291_v15  ;;  %v6332_v4 = vrot.slane %v3185_v17, 10  ;;  %v1222_v37 = vrot.slane %v1072_v49, 5  ;;  %v3189_v39 = vld [vmem:[#allocation2 + $0x4c] sm:$0xf]  ;;  %v3298_v40 = vrot.slane %v3187_v29, 6 }
 0x10a   : > { %6904 = vmatprep.mubr.msk.bf16.mxu0 %vm792_vm2, %v6310_v63  ;;  %v3190_v41 = vld [vmem:[#allocation2 + $0x50] sm:$0x3]  ;;  %v1074_v42 = vld [vmem:[#allocation2 + $0xa0] sm:$0xf]  ;;  %v6346_v43 = vcombine.low %v3282_v21, %v3285_v25  ;;  %v1213_v44 = vsel %vm8327_vm10, %v6160_v27, %v1212_v16  ;;  %v3297_v45 = vrot.slane %v3295_v30, 4  ;;  %v3302_v46 = vrot.slane %v3189_v39, 6 }
 0x10b   : > { %6787 = vmatmul.mubr.msk.bf16.gmra.mrb[12].mxu1 %vm792_vm2, %v6172_v32  ;;  %v1215_v32 = vrot.slane %v1069_v12, 5  ;;  %v1073_v47 = vld [vmem:[#allocation2 + $0x9c] sm:$0xe]  ;;  %v1075_v48 = vld [vmem:[#allocation2 + $0xa4] sm:$0x1]  ;;  %v6347_v50 = vcombine.low %v3289_v35, %v3292_v36  ;;  %v1226_v53 = vrot.slane %v1074_v42, 5  ;;  %v3296_v62 = vsel %vm8533_vm13, %v6332_v4, %v3295_v30 }
 0x10c   : > { %6790 = vmatprep.mubr.msk.bf16.mxu1 %vm792_vm2, %v6173_v34  ;;  %6905 = vmatmul.mubr.msk.bf16.gmra.mrb[28].mxu0 %vm792_vm2, %v6311_v19  ;;  %v1219_v34 = vrot.slane %v1071_v24, 5  ;;  %v3192_v54 = vld [vmem:[#allocation2 + $0x58] sm:$0xf]  ;;  %v6333_v56 = vrot.slane %v3188_v38, 10  ;;  %v3304_v57 = vrot.slane %v3302_v46, 4  ;;  %v3305_v58 = vrot.slane %v3190_v41, 6 }
 0x10d   : > { %6910 = vmatprep.mubr.msk.bf16.mxu0 %vm792_vm2, %v6345_v14  ;;  %v1216_v51 = vsel %vm8327_vm10, %v1214_v31, %v1215_v32  ;;  %v1076_v59 = vld [vmem:[#allocation2 + $0xa8] sm:$0xe]  ;;  %v6162_v63 = vrot.slane %v1073_v47, 9  ;;  %v1229_v0 = vrot.slane %v1075_v48, 5  ;;  %v3191_v1 = vld [vmem:[#allocation2 + $0x54] sm:$0xc]  ;;  %v3299_v5 = vsel %vm8533_vm13, %v3297_v45, %v3298_v40 }
 0x10e   : > { %v1221_v60 = vrot.slane %v1219_v34, 4  ;;  %v1220_v52 = vsel %vm8327_vm10, %v6161_v33, %v1219_v34  ;;  %v1077_v2 = vld [vmem:[#allocation2 + $0xac] sm:$0xf]  ;;  %v6176_v3 = vcombine.low %v1213_v44, %v1216_v51  ;;  %v3193_v6 = vld [vmem:[#allocation2 + $0x5c] sm:$0x3]  ;;  %v3309_v8 = vrot.slane %v3192_v54, 6 }
 0x10f   : > { %v1078_v9 = vld [vmem:[#allocation2 + $0xb0] sm:$0x1]  ;;  %v1233_v10 = vrot.slane %v1077_v2, 5  ;;  %v1228_v13 = vrot.slane %v1226_v53, 4  ;;  %v6163_v14 = vrot.slane %v1076_v59, 9  ;;  %v3303_v17 = vsel %vm8533_vm13, %v6333_v56, %v3302_v46 }
 0x110   : > { %v1223_v55 = vsel %vm8327_vm10, %v1221_v60, %v1222_v37  ;;  %v3194_v15 = vld [vmem:[#allocation2 + $0x60] sm:$0xc]  ;;  %v3195_v16 = vld [vmem:[#allocation2 + $0x64] sm:$0xf]  ;;  %v3306_v7 = vsel %vm8533_vm13, %v3304_v57, %v3305_v58  ;;  %v1080_v21 = vld [vmem:[#allocation2 + $0xb8] sm:$0xf]  ;;  %v6348_v22 = vcombine.low %v3296_v62, %v3299_v5  ;;  %v1227_v32 = vsel %vm8327_vm10, %v6162_v63, %v1226_v53 }
 0x111   : > { %v6177_v12 = vcombine.low %v1220_v52, %v1223_v55  ;;  %v1235_v19 = vrot.slane %v1233_v10, 4  ;;  %v6334_v23 = vrot.slane %v3191_v1, 10  ;;  %v3196_v24 = vld [vmem:[#allocation2 + $0x68] sm:$0x3]  ;;  %v3316_v25 = vrot.slane %v3195_v16, 6 }
 0x112   : > { %v3312_v27 = vrot.slane %v3193_v6, 6  ;;  %v6335_v29 = vrot.slane %v3194_v15, 10  ;;  %v1081_v30 = vld [vmem:[#allocation2 + $0xbc] sm:$0x1]  ;;  %v1240_v49 = vrot.slane %v1080_v21, 5  ;;  %v6349_v31 = vcombine.low %v3303_v17, %v3306_v7 }
 0x113   : > { %6791 = vmatmul.mubr.msk.bf16.gmra.mrb[16].mxu1 %vm792_vm2, %v6174_v20  ;;  %v1236_v20 = vrot.slane %v1078_v9, 5  ;;  %v1230_v33 = vsel %vm8327_vm10, %v1228_v13, %v1229_v0  ;;  %v1234_v34 = vsel %vm8327_vm10, %v6163_v14, %v1233_v10  ;;  %v3197_v35 = vld [vmem:[#allocation2 + $0x6c] sm:$0xc]  ;;  %v3198_v36 = vld [vmem:[#allocation2 + $0x70] sm:$0xf]  ;;  %v3318_v37 = vrot.slane %v3316_v25, 4 }
 0x114   : > { %6794 = vmatprep.mubr.msk.bf16.mxu1 %vm792_vm2, %v6175_v26  ;;  %6911 = vmatmul.mubr.msk.bf16.vlgmr.msra.gmra.mrb[0].mxu0 %vm792_vm2, %v6346_v43  ;;  %v1079_v26 = vld [vmem:[#allocation2 + $0xb4] sm:$0xe]  ;;  %v3319_v38 = vrot.slane %v3196_v24, 6  ;;  %v1242_v40 = vrot.slane %v1240_v49, 4  ;;  %v1243_v60 = vrot.slane %v1081_v30, 5  ;;  %v6178_v43 = vcombine.low %v1227_v32, %v1230_v33 }
 0x115   : > { %6943 = vmatpush3.bf16.msra.mxu0 %v8373_v18  ;;  %6914 = vmatprep.mubr.msk.bf16.mxu0 %vm792_vm2, %v6347_v50  ;;  %v3311_v18 = vrot.slane %v3309_v8, 4  ;;  %v1237_v4 = vsel %vm8327_vm10, %v1235_v19, %v1236_v20  ;;  %v6164_v39 = vrot.slane %v1079_v26, 9  ;;  %v1607_v41 = vld [vmem:[#allocation2] sm:$0xc]  ;;  %v1608_v42 = vld [vmem:[#allocation2 + $0x4] sm:$0xf]  ;;  %v3310_v44 = vsel %vm8533_vm13, %v6334_v23, %v3309_v8 }
 0x116   : > { %6976 = vmatprep.subr.bf16.mxu0 %v8581_v61  ;;  %v3199_v45 = vld [vmem:[#allocation2 + $0x74] sm:$0x3]  ;;  %v6336_v46 = vrot.slane %v3197_v35, 10  ;;  %v3323_v47 = vrot.slane %v3198_v36, 6  ;;  %v1609_v48 = vld [vmem:[#allocation2 + $0x8] sm:$0x3]  ;;  %v6179_v51 = vcombine.low %v1234_v34, %v1237_v4  ;;  %v3317_v56 = vsel %vm8533_vm13, %v6335_v29, %v3316_v25 }
 0x117   : > { %v3313_v50 = vsel %vm8533_vm13, %v3311_v18, %v3312_v27  ;;  %v6198_v52 = vrot.slane %v1607_v41, 10  ;;  %v1708_v53 = vrot.slane %v1608_v42, 6  ;;  %v3200_v54 = vld [vmem:[#allocation2 + $0x78] sm:$0xc]  ;;  %v3201_v55 = vld [vmem:[#allocation2 + $0x7c] sm:$0xf]  ;;  %v3320_v57 = vsel %vm8533_vm13, %v3318_v37, %v3319_v38 }
 0x118   : > { %v1711_v58 = vrot.slane %v1609_v48, 6  ;;  %v3202_v59 = vld [vmem:[#allocation2 + $0x80] sm:$0x3]  ;;  %v3330_v62 = vrot.slane %v3201_v55, 6  ;;  %v1610_v63 = vld [vmem:[#allocation2 + $0xc] sm:$0xc]  ;;  %v1241_v0 = vsel %vm8327_vm10, %v6164_v39, %v1240_v49  ;;  %v1244_v1 = vsel %vm8327_vm10, %v1242_v40, %v1243_v60 }
 0x119   : > { %v3326_v2 = vrot.slane %v3199_v45, 6  ;;  %v1611_v5 = vld [vmem:[#allocation2 + $0x10] sm:$0xf]  ;;  %v1612_v6 = vld [vmem:[#allocation2 + $0x14] sm:$0x3]  ;;  %v3325_v8 = vrot.slane %v3323_v47, 4  ;;  %v6350_v13 = vcombine.low %v3310_v44, %v3313_v50  ;;  %v6351_v14 = vcombine.low %v3317_v56, %v3320_v57 }
 0x11a   : > { %v6337_v9 = vrot.slane %v3200_v54, 10  ;;  %v3333_v10 = vrot.slane %v3202_v59, 6  ;;  %v3332_v15 = vrot.slane %v3330_v62, 4  ;;  %v6199_v16 = vrot.slane %v1610_v63, 10  ;;  %v3203_v17 = vld [vmem:[#allocation2 + $0x84] sm:$0xc] }
 0x11b   : > { %6795 = vmatmul.mubr.msk.bf16.gmra.mrb[20].mxu1 %vm792_vm2, %v6176_v3  ;;  %v1710_v3 = vrot.slane %v1708_v53, 4  ;;  %v3204_v7 = vld [vmem:[#allocation2 + $0x88] sm:$0xf]  ;;  %v1709_v19 = vsel %vm8533_vm13, %v6198_v52, %v1708_v53  ;;  %v3205_v23 = vld [vmem:[#allocation2 + $0x8c] sm:$0x3]  ;;  %v6180_v25 = vcombine.low %v1241_v0, %v1244_v1  ;;  %v3324_v26 = vsel %vm8533_vm13, %v6336_v46, %v3323_v47 }
 0x11c   : > { %6798 = vmatprep.mubr.msk.bf16.mxu1 %vm792_vm2, %v6177_v12  ;;  %6915 = vmatmul.mubr.msk.bf16.gmra.mrb[4].mxu0 %vm792_vm2, %v6348_v22  ;;  %v1715_v12 = vrot.slane %v1611_v5, 6  ;;  %v1718_v22 = vrot.slane %v1612_v6, 6  ;;  %v1614_v24 = vld [vmem:[#allocation2 + $0x1c] sm:$0xf]  ;;  %v3337_v18 = vrot.slane %v3204_v7, 6  ;;  %v3327_v30 = vsel %vm8533_vm13, %v3325_v8, %v3326_v2 }
 0x11d   : > { %6918 = vmatprep.mubr.msk.bf16.mxu0 %vm792_vm2, %v6349_v31  ;;  %v1712_v20 = vsel %vm8533_vm13, %v1710_v3, %v1711_v58  ;;  %v1613_v27 = vld [vmem:[#allocation2 + $0x18] sm:$0xc]  ;;  %v1615_v29 = vld [vmem:[#allocation2 + $0x20] sm:$0x3]  ;;  %v3331_v49 = vsel %vm8533_vm13, %v6337_v9, %v3330_v62  ;;  %v6338_v31 = vrot.slane %v3203_v17, 10  ;;  %v1722_v32 = vrot.slane %v1614_v24, 6 }
 0x11e   : > { %v1717_v21 = vrot.slane %v1715_v12, 4  ;;  %v3207_v33 = vld [vmem:[#allocation2 + $0x94] sm:$0xf]  ;;  %v6214_v34 = vcombine.low %v1709_v19, %v1712_v20  ;;  %v3334_v35 = vsel %vm8533_vm13, %v3332_v15, %v3333_v10  ;;  %v1716_v36 = vsel %vm8533_vm13, %v6199_v16, %v1715_v12  ;;  %v1617_v60 = vld [vmem:[#allocation2 + $0x28] sm:$0xf] }
 0x11f   : > { %v3340_v4 = vrot.slane %v3205_v23, 6  ;;  %v6200_v38 = vrot.slane %v1613_v27, 10  ;;  %v1724_v39 = vrot.slane %v1722_v32, 4  ;;  %v1725_v40 = vrot.slane %v1615_v29, 6  ;;  %v3206_v42 = vld [vmem:[#allocation2 + $0x90] sm:$0xc] }
 0x120   : > { %v1719_v37 = vsel %vm8533_vm13, %v1717_v21, %v1718_v22  ;;  %v3339_v41 = vrot.slane %v3337_v18, 4  ;;  %v3344_v44 = vrot.slane %v3207_v33, 6  ;;  %v1616_v45 = vld [vmem:[#allocation2 + $0x24] sm:$0xc]  ;;  %v1729_v46 = vrot.slane %v1617_v60, 6 }
 0x121   : > { %v6352_v47 = vcombine.low %v3324_v26, %v3327_v30  ;;  %v6353_v48 = vcombine.low %v3331_v49, %v3334_v35  ;;  %v6215_v50 = vcombine.low %v1716_v36, %v1719_v37  ;;  %v3210_v52 = vld [vmem:[#allocation2 + $0xa0] sm:$0xf]  ;;  %v1620_v53 = vld [vmem:[#allocation2 + $0x34] sm:$0xf]  ;;  %v1723_v54 = vsel %vm8533_vm13, %v6200_v38, %v1722_v32  ;;  %v1619_v58 = vld [vmem:[#allocation2 + $0x30] sm:$0xc] }
 0x122   : > { %v1726_v55 = vsel %vm8533_vm13, %v1724_v39, %v1725_v40  ;;  %v6339_v56 = vrot.slane %v3206_v42, 10  ;;  %v1621_v59 = vld [vmem:[#allocation2 + $0x38] sm:$0x3]  ;;  %v3338_v62 = vsel %vm8533_vm13, %v6338_v31, %v3337_v18  ;;  %v3341_v63 = vsel %vm8533_vm13, %v3339_v41, %v3340_v4  ;;  %v3209_v1 = vld [vmem:[#allocation2 + $0x9c] sm:$0xc]  ;;  %v7700_v36 = vld [vmem:[#allocation7 + $0x18] sm:$0xff]  }
 0x123   : > { %6799 = vmatmul.mubr.msk.bf16.gmra.mrb[24].mxu1 %vm792_vm2, %v6178_v43  ;;  %v3208_v43 = vld [vmem:[#allocation2 + $0x98] sm:$0x3]  ;;  %v3346_v0 = vrot.slane %v3344_v44, 4  ;;  %v1736_v2 = vrot.slane %v1620_v53, 6  ;;  %v3213_v3 = vld [vmem:[#allocation2 + $0xac] sm:$0xf]  ;;  %v6216_v12 = vcombine.low %v1723_v54, %v1726_v55  ;;  %v6354_v17 = vcombine.low %v3338_v62, %v3341_v63 }
 0x124   : > { %6802 = vmatprep.mubr.msk.bf16.mxu1 %vm792_vm2, %v6179_v51  ;;  %6919 = vmatmul.mubr.msk.bf16.gmra.mrb[8].mxu0 %vm792_vm2, %v6350_v13  ;;  %v1618_v51 = vld [vmem:[#allocation2 + $0x2c] sm:$0x3]  ;;  %v3347_v57 = vrot.slane %v3208_v43, 6  ;;  %v6201_v5 = vrot.slane %v1616_v45, 10  ;;  %v1731_v6 = vrot.slane %v1729_v46, 4  ;;  %v3351_v10 = vrot.slane %v3210_v52, 6 }
 0x125   : > { %6922 = vmatprep.mubr.msk.bf16.mxu0 %vm792_vm2, %v6351_v14  ;;  %v1732_v8 = vrot.slane %v1618_v51, 6  ;;  %v3211_v9 = vld [vmem:[#allocation2 + $0xa4] sm:$0x3]  ;;  %v6202_v13 = vrot.slane %v1619_v58, 10  ;;  %v1738_v14 = vrot.slane %v1736_v2, 4  ;;  %v1739_v15 = vrot.slane %v1621_v59, 6 }
 0x126   : > { %v3212_v16 = vld [vmem:[#allocation2 + $0xa8] sm:$0xc]  ;;  %v3214_v7 = vld [vmem:[#allocation2 + $0xb0] sm:$0x3]  ;;  %v3358_v19 = vrot.slane %v3213_v3, 6  ;;  %v3345_v21 = vsel %vm8533_vm13, %v6339_v56, %v3344_v44  ;;  %v3348_v22 = vsel %vm8533_vm13, %v3346_v0, %v3347_v57  ;;  %v6340_v23 = vrot.slane %v3209_v1, 10 }
 0x127   : > { %v1623_v20 = vld [vmem:[#allocation2 + $0x40] sm:$0xf]  ;;  %v3354_v24 = vrot.slane %v3211_v9, 6  ;;  %v1733_v26 = vsel %vm8533_vm13, %v1731_v6, %v1732_v8  ;;  %v3353_v18 = vrot.slane %v3351_v10, 4  ;;  %v6341_v27 = vrot.slane %v3212_v16, 10 }
 0x128   : > { %v1622_v29 = vld [vmem:[#allocation2 + $0x3c] sm:$0xc]  ;;  %v3216_v30 = vld [vmem:[#allocation2 + $0xb8] sm:$0xf]  ;;  %v1737_v49 = vsel %vm8533_vm13, %v6202_v13, %v1736_v2  ;;  %v1740_v31 = vsel %vm8533_vm13, %v1738_v14, %v1739_v15  ;;  %v3361_v32 = vrot.slane %v3214_v7, 6  ;;  %v6355_v4 = vcombine.low %v3345_v21, %v3348_v22 }
 0x129   : > { %v1624_v33 = vld [vmem:[#allocation2 + $0x44] sm:$0x3]  ;;  %v1626_v35 = vld [vmem:[#allocation2 + $0x4c] sm:$0xf]  ;;  %v3360_v37 = vrot.slane %v3358_v19, 4  ;;  %v6203_v60 = vrot.slane %v1622_v29, 10  ;;  %v3352_v44 = vsel %vm8533_vm13, %v6340_v23, %v3351_v10  ;;  %v3355_v45 = vsel %vm8533_vm13, %v3353_v18, %v3354_v24 }
 0x12a   : > { %v1625_v38 = vld [vmem:[#allocation2 + $0x48] sm:$0xc]  ;;  %v1627_v39 = vld [vmem:[#allocation2 + $0x50] sm:$0x3]  ;;  %v1750_v40 = vrot.slane %v1626_v35, 6  ;;  %v3365_v41 = vrot.slane %v3216_v30, 6  ;;  %v3359_v55 = vsel %vm8533_vm13, %v6341_v27, %v3358_v19  ;;  %v6356_v3 = vcombine.low %v3352_v44, %v3355_v45 }
 0x12b   : > { %6803 = vmatmul.mubr.msk.bf16.gmra.mrb[28].mxu1 %vm792_vm2, %v6180_v25  ;;  %v1730_v25 = vsel %vm8533_vm13, %v6201_v5, %v1729_v46  ;;  %v3219_v42 = vld [vmem:[#allocation2 + $0xc4] sm:$0xf]  ;;  %v6218_v46 = vcombine.low %v1737_v49, %v1740_v31  ;;  %v1746_v52 = vrot.slane %v1624_v33, 6  ;;  %v6204_v53 = vrot.slane %v1625_v38, 10  ;;  %v3220_v58 = vld [vmem:[#allocation2 + $0xc8] sm:$0x3] }
 0x12c   : > { %6808 = vmatprep.mubr.msk.bf16.mxu1 %vm792_vm2, %v6214_v34  ;;  %6923 = vmatmul.mubr.msk.bf16.gmra.mrb[12].mxu0 %vm792_vm2, %v6352_v47  ;;  %v1743_v34 = vrot.slane %v1623_v20, 6  ;;  %v6217_v43 = vcombine.low %v1730_v25, %v1733_v26  ;;  %v3215_v47 = vld [vmem:[#allocation2 + $0xb4] sm:$0xc]  ;;  %v1753_v54 = vrot.slane %v1627_v39, 6  ;;  %v3362_v56 = vsel %vm8533_vm13, %v3360_v37, %v3361_v32  ;;  %v1629_v62 = vld [vmem:[#allocation2 + $0x58] sm:$0xf] }
 0x12d   : > { %6926 = vmatprep.mubr.msk.bf16.mxu0 %vm792_vm2, %v6353_v48  ;;  %v3217_v48 = vld [vmem:[#allocation2 + $0xbc] sm:$0x3]  ;;  %v1752_v57 = vrot.slane %v1750_v40, 4  ;;  %v3372_v59 = vrot.slane %v3219_v42, 6  ;;  %v6342_v63 = vrot.slane %v3215_v47, 10  ;;  %v3367_v0 = vrot.slane %v3365_v41, 4 }
 0x12e   : > { %v1745_v51 = vrot.slane %v1743_v34, 4  ;;  %v3368_v1 = vrot.slane %v3217_v48, 6  ;;  %v1744_v5 = vsel %vm8533_vm13, %v6203_v60, %v1743_v34  ;;  %v1628_v6 = vld [vmem:[#allocation2 + $0x54] sm:$0xc]  ;;  %v1630_v8 = vld [vmem:[#allocation2 + $0x5c] sm:$0x3]  ;;  %v6357_v10 = vcombine.low %v3359_v55, %v3362_v56 }
 0x12f   : > { %v1632_v9 = vld [vmem:[#allocation2 + $0x64] sm:$0xf]  ;;  %v3375_v13 = vrot.slane %v3220_v58, 6  ;;  %v1757_v14 = vrot.slane %v1629_v62, 6  ;;  %v3222_v15 = vld [vmem:[#allocation2 + $0xd0] sm:$0xf]  ;;  %v1751_v16 = vsel %vm8533_vm13, %v6204_v53, %v1750_v40  ;;  %v3366_v23 = vsel %vm8533_vm13, %v6342_v63, %v3365_v41 }
 0x130   : > { %v3374_v7 = vrot.slane %v3372_v59, 4  ;;  %v1631_v19 = vld [vmem:[#allocation2 + $0x60] sm:$0xc]  ;;  %v1764_v20 = vrot.slane %v1632_v9, 6  ;;  %v1633_v21 = vld [vmem:[#allocation2 + $0x68] sm:$0x3]  ;;  %v3369_v27 = vsel %vm8533_vm13, %v3367_v0, %v3368_v1 }
 0x131   : > { %v6205_v24 = vrot.slane %v1628_v6, 10  ;;  %v1760_v25 = vrot.slane %v1630_v8, 6  ;;  %v3221_v26 = vld [vmem:[#allocation2 + $0xcc] sm:$0xc]  ;;  %v1635_v18 = vld [vmem:[#allocation2 + $0x70] sm:$0xf]  ;;  %v6358_v39 = vcombine.low %v3366_v23, %v3369_v27 }
 0x132   : > { %v1759_v30 = vrot.slane %v1757_v14, 4  ;;  %v3223_v49 = vld [vmem:[#allocation2 + $0xd4] sm:$0x3]  ;;  %v3379_v31 = vrot.slane %v3222_v15, 6  ;;  %v6206_v32 = vrot.slane %v1631_v19, 10  ;;  %v1766_v33 = vrot.slane %v1764_v20, 4 }
 0x133   : > { %6809 = vmatmul.mubr.msk.bf16.vlgmr.msra.gmra.mrb[0].mxu1 %vm792_vm2, %v6215_v50  ;;  %v3218_v50 = vld [vmem:[#allocation2 + $0xc0] sm:$0xc]  ;;  %v1767_v34 = vrot.slane %v1633_v21, 6  ;;  %v1771_v37 = vrot.slane %v1635_v18, 6  ;;  %v1638_v38 = vld [vmem:[#allocation2 + $0x7c] sm:$0xf]  ;;  %v1758_v41 = vsel %vm8533_vm13, %v6205_v24, %v1757_v14 }
 0x134   : > { %6812 = vmatprep.mubr.msk.bf16.mxu1 %vm792_vm2, %v6216_v12  ;;  %7281 = vmatpush3.bf16.msra.mxu1 %v7700_v36  ;;  %v6343_v2 = vrot.slane %v3218_v50, 10  ;;  %v1747_v12 = vsel %vm8533_vm13, %v1745_v51, %v1746_v52  ;;  %v3376_v36 = vsel %vm8533_vm13, %v3374_v7, %v3375_v13  ;;  %v1634_v40 = vld [vmem:[#allocation2 + $0x6c] sm:$0xc]  ;;  %v1636_v60 = vld [vmem:[#allocation2 + $0x74] sm:$0x3]  ;;  %v1761_v42 = vsel %vm8533_vm13, %v1759_v30, %v1760_v25 }
 0x135   : > { %6927 = vmatmul.mubr.msk.bf16.gmra.mrb[16].mxu0 %vm792_vm2, %v6354_v17  ;;  %v1754_v17 = vsel %vm8533_vm13, %v1752_v57, %v1753_v54  ;;  %v6219_v22 = vcombine.low %v1744_v5, %v1747_v12  ;;  %v3382_v44 = vrot.slane %v3223_v49, 6  ;;  %v1637_v45 = vld [vmem:[#allocation2 + $0x78] sm:$0xc]  ;;  %v1765_v48 = vsel %vm8533_vm13, %v6206_v32, %v1764_v20  ;;  %v1641_v55 = vld [vmem:[#allocation2 + $0x88] sm:$0xf]  ;;  %v7670_v12 = vld [vmem:[#allocation2 + $0x30] sm:$0xff]  }
 0x136   : > { %6930 = vmatprep.mubr.msk.bf16.mxu0 %vm792_vm2, %v6355_v4  ;;  %v6220_v29 = vcombine.low %v1751_v16, %v1754_v17  ;;  %v3373_v35 = vsel %vm8533_vm13, %v6343_v2, %v3372_v59  ;;  %v6344_v4 = vrot.slane %v3221_v26, 10  ;;  %v1768_v50 = vsel %vm8533_vm13, %v1766_v33, %v1767_v34  ;;  %v1640_v59 = vld [vmem:[#allocation2 + $0x84] sm:$0xc]  ;;  %v1642_v1 = vld [vmem:[#allocation2 + $0x8c] sm:$0x3] }
 0x137   : > { %v6359_v47 = vcombine.low %v3373_v35, %v3376_v36  ;;  %v1778_v51 = vrot.slane %v1638_v38, 6  ;;  %v6207_v52 = vrot.slane %v1634_v40, 10  ;;  %v1773_v53 = vrot.slane %v1771_v37, 4  ;;  %v1644_v2 = vld [vmem:[#allocation2 + $0x94] sm:$0xf]  ;;  %v7673_v38 = vld [vmem:[#allocation2 + $0x48] sm:$0xff]  }
 0x138   : > { %v1774_v54 = vrot.slane %v1636_v60, 6  ;;  %v6221_v56 = vcombine.low %v1758_v41, %v1761_v42  ;;  %v6208_v57 = vrot.slane %v1637_v45, 10  ;;  %v3380_v62 = vsel %vm8533_vm13, %v6344_v4, %v3379_v31  ;;  %v1643_v6 = vld [vmem:[#allocation2 + $0x90] sm:$0xc]  ;;  %v1647_v8 = vld [vmem:[#allocation2 + $0xa0] sm:$0xf] }
 0x139   : > { %v6222_v0 = vcombine.low %v1765_v48, %v1768_v50  ;;  %v1785_v5 = vrot.slane %v1641_v55, 6  ;;  %v1645_v9 = vld [vmem:[#allocation2 + $0x98] sm:$0x3]  ;;  %v1792_v13 = vrot.slane %v1644_v2, 6  ;;  %v1646_v14 = vld [vmem:[#allocation2 + $0x9c] sm:$0xc]  ;;  %v1772_v16 = vsel %vm8533_vm13, %v6207_v52, %v1771_v37 }
 0x13a   : > { %v1650_v15 = vld [vmem:[#allocation2 + $0xac] sm:$0xf]  ;;  %v1775_v17 = vsel %vm8533_vm13, %v1773_v53, %v1774_v54  ;;  %v6209_v7 = vrot.slane %v1640_v59, 10  ;;  %v1648_v19 = vld [vmem:[#allocation2 + $0xa4] sm:$0x3]  ;;  %v1799_v20 = vrot.slane %v1647_v8, 6  ;;  %v1779_v21 = vsel %vm8533_vm13, %v6208_v57, %v1778_v51 }
 0x13b   : > { %6813 = vmatmul.mubr.msk.bf16.gmra.mrb[4].mxu1 %vm792_vm2, %v6217_v43  ;;  %v3381_v43 = vrot.slane %v3379_v31, 4  ;;  %v1788_v23 = vrot.slane %v1642_v1, 6  ;;  %v1649_v24 = vld [vmem:[#allocation2 + $0xa8] sm:$0xc]  ;;  %v1806_v25 = vrot.slane %v1650_v15, 6  ;;  %v1787_v26 = vrot.slane %v1785_v5, 4 }
 0x13c   : > { %6816 = vmatprep.mubr.msk.bf16.mxu1 %vm792_vm2, %v6218_v46  ;;  %v1639_v46 = vld [vmem:[#allocation2 + $0x80] sm:$0x3]  ;;  %v6210_v18 = vrot.slane %v1643_v6, 10  ;;  %v1795_v27 = vrot.slane %v1645_v9, 6  ;;  %v1651_v30 = vld [vmem:[#allocation2 + $0xb0] sm:$0x3]  ;;  %v6223_v49 = vcombine.low %v1772_v16, %v1775_v17 }
 0x13d   : > { %6931 = vmatmul.mubr.msk.bf16.gmra.mrb[20].mxu0 %vm792_vm2, %v6356_v3  ;;  %v1781_v58 = vrot.slane %v1639_v46, 6  ;;  %v3383_v63 = vsel %vm8533_vm13, %v3381_v43, %v3382_v44  ;;  %v1780_v3 = vrot.slane %v1778_v51, 4  ;;  %v1794_v31 = vrot.slane %v1792_v13, 4  ;;  %v7672_v37 = vld [vmem:[#allocation2 + $0x3c] sm:$0xff]   ;;  %v8729_v60 = vld [vmem:[#allocation7 + $0x40] sm:$0xff]  }
 0x13e   : > { %6934 = vmatprep.mubr.msk.bf16.mxu0 %vm792_vm2, %v6357_v10  ;;  %v6360_v10 = vcombine.low %v3380_v62, %v3383_v63  ;;  %v1802_v32 = vrot.slane %v1648_v19, 6  ;;  %v1801_v34 = vrot.slane %v1799_v20, 4  ;;  %v6212_v35 = vrot.slane %v1649_v24, 10  ;;  %v1653_v44 = vld [vmem:[#allocation2 + $0xb8] sm:$0xf]  ;;  %v7676_v62 = vld [vmem:[#allocation2 + $0x6c] sm:$0xff]  }
 0x13f   : > { %v1808_v36 = vrot.slane %v1806_v25, 4  ;;  %v1809_v4 = vrot.slane %v1651_v30, 6  ;;  %v1789_v40 = vsel %vm8533_vm13, %v1787_v26, %v1788_v23  ;;  %v1793_v41 = vsel %vm8533_vm13, %v6210_v18, %v1792_v13  ;;  %v7674_v46 = vld [vmem:[#allocation2 + $0x54] sm:$0xff]   ;;  %v1654_v54 = vld [vmem:[#allocation2 + $0xbc] sm:$0x3]  ;;  %v7681_v8 = vld [vmem:[#allocation2 + $0x6c] sm:$0xff]  }
 0x140   : > { %v1796_v42 = vsel %vm8533_vm13, %v1794_v31, %v1795_v27  ;;  %v1803_v50 = vsel %vm8533_vm13, %v1801_v34, %v1802_v32  ;;  %v1813_v51 = vrot.slane %v1653_v44, 6  ;;  %v1652_v53 = vld [vmem:[#allocation2 + $0xb4] sm:$0xc]  ;;  %v1816_v59 = vrot.slane %v1654_v54, 6  ;;  %v7677_v1 = vld [vmem:[#allocation2 + $0x78] sm:$0xff]   ;;  %v7685_v13 = vld [vmem:[#allocation2 + $0x84] sm:$0xff]  }
 0x141   : > { %v6226_v45 = vcombine.low %v1793_v41, %v1796_v42  ;;  %v1810_v52 = vsel %vm8533_vm13, %v1808_v36, %v1809_v4  ;;  %v6213_v57 = vrot.slane %v1652_v53, 10  ;;  %v7680_v6 = vld [vmem:[#allocation2 + $0x90] sm:$0xff]   ;;  %v7683_v9 = vld [vmem:[#allocation2 + $0x78] sm:$0xff]   ;;  %v7688_v16 = vld [vmem:[#allocation2 + $0xc0] sm:$0xff]  }
 0x142   : > { %v7686_v15 = vld [vmem:[#allocation2 + $0xb4] sm:$0xff]   ;;  %v7689_v17 = vld [vmem:[#allocation2 + $0x9c] sm:$0xff]   ;;  %v7691_v19 = vld [vmem:[#allocation2 + $0xa8] sm:$0xff]  }
 0x143   : > { %6817 = vmatmul.mubr.msk.bf16.gmra.mrb[8].mxu1 %vm792_vm2, %v6219_v22  ;;  %v1782_v22 = vsel %vm8533_vm13, %v1780_v3, %v1781_v58  ;;  %v1815_v58 = vrot.slane %v1813_v51, 4  ;;  %v1814_v63 = vsel %vm8533_vm13, %v6213_v57, %v1813_v51  ;;  %v7679_v3 = vld [vmem:[#allocation2 + $0x60] sm:$0xff]   ;;  %v7690_v23 = vld [vmem:[#allocation2 + $0xcc] sm:$0xff]   ;;  %v7692_v24 = vld [vmem:[#allocation2 + $0xd8] sm:$0xff]  }
 0x144   : > { %6820 = vmatprep.mubr.msk.bf16.mxu1 %vm792_vm2, %v6220_v29  ;;  %v6211_v29 = vrot.slane %v1646_v14, 10  ;;  %v6224_v33 = vcombine.low %v1779_v21, %v1782_v22  ;;  %v7687_v14 = vld [vmem:[#allocation2 + $0x90] sm:$0xff]   ;;  %v4175_v22 = vld [vmem:[#allocation2 + $0x38] sm:$0x1]  ;;  %v4177_v27 = vld [vmem:[#allocation2 + $0x40] sm:$0xf] }
 0x145   : > { %6935 = vmatmul.mubr.msk.bf16.gmra.mrb[24].mxu0 %vm792_vm2, %v6358_v39  ;;  %v1786_v39 = vsel %vm8533_vm13, %v6209_v7, %v1785_v5  ;;  %v7678_v5 = vld [vmem:[#allocation2 + $0x84] sm:$0xff]   ;;  %v4174_v7 = vld [vmem:[#allocation2 + $0x34] sm:$0xf]  ;;  %v4173_v21 = vld [vmem:[#allocation2 + $0x30] sm:$0xe]  ;;  %v4274_v18 = vrot.slane %v4175_v22, 5 }
 0x146   : > { %6938 = vmatprep.mubr.msk.bf16.mxu0 %vm792_vm2, %v6359_v47  ;;  %v6225_v43 = vcombine.low %v1786_v39, %v1789_v40  ;;  %v7675_v47 = vld [vmem:[#allocation2 + $0x60] sm:$0xff]   ;;  %v1800_v48 = vsel %vm8533_vm13, %v6211_v29, %v1799_v20  ;;  %v4271_v20 = vrot.slane %v4174_v7, 5  ;;  %v7693_v29 = vld [vmem:[#allocation2 + $0xb4] sm:$0xff]   ;;  %v4180_v30 = vld [vmem:[#allocation2 + $0x4c] sm:$0xf]  ;;  %v4278_v31 = vrot.slane %v4177_v27, 5 }
 0x147   : > { %v6227_v55 = vcombine.low %v1800_v48, %v1803_v50  ;;  %v4176_v34 = vld [vmem:[#allocation2 + $0x3c] sm:$0xe]  ;;  %v4285_v36 = vrot.slane %v4180_v30, 5  ;;  %v4179_v4 = vld [vmem:[#allocation2 + $0x48] sm:$0xe] }
 0x148   : > { %v4273_v26 = vrot.slane %v4271_v20, 4  ;;  %v6412_v40 = vrot.slane %v4176_v34, 9  ;;  %v4280_v41 = vrot.slane %v4278_v31, 4  ;;  %v4186_v48 = vld [vmem:[#allocation2 + $0x64] sm:$0xf] }
 0x149   : > { %v4287_v44 = vrot.slane %v4285_v36, 4  ;;  %v4182_v54 = vld [vmem:[#allocation2 + $0x54] sm:$0xe]  ;;  %v4185_v57 = vld [vmem:[#allocation2 + $0x60] sm:$0xe] }
 0x14a   : > { %v4279_v50 = vsel %vm8327_vm10, %v6412_v40, %v4278_v31  ;;  %v4191_v7 = vld [vmem:[#allocation2 + $0x78] sm:$0xe]  ;;  %v4198_v27 = vld [vmem:[#allocation2 + $0x94] sm:$0xf]  ;;  %v4196_v34 = vld [vmem:[#allocation2 + $0x8c] sm:$0x1] }
 0x14b   : > { %6821 = vmatmul.mubr.msk.bf16.gmra.mrb[12].mxu1 %vm792_vm2, %v6221_v56 }
 0x14c   : > { %6824 = vmatprep.mubr.msk.bf16.mxu1 %vm792_vm2, %v6222_v0  ;;  %v1817_v0 = vsel %vm8533_vm13, %v1815_v58, %v1816_v59  ;;  %v4187_v58 = vld [vmem:[#allocation2 + $0x68] sm:$0x1] }
 0x14d   : > { %6939 = vmatmul.mubr.msk.bf16.gmra.mrb[28].mxu0 %vm792_vm2, %v6360_v10  ;;  %v6229_v2 = vcombine.low %v1814_v63, %v1817_v0  ;;  %v7682_v10 = vld [vmem:[#allocation2 + $0x9c] sm:$0xff]   ;;  %v6414_v63 = vrot.slane %v4182_v54, 9 }
 0x14e   : > { %6944 = vmatprep.mubr.msk.bf16.mxu0 %vm792_vm2, %v7670_v12  ;;  %v7684_v12 = vld [vmem:[#allocation2 + $0xa8] sm:$0xff]  }
 0x153   : > { %6825 = vmatmul.mubr.msk.bf16.gmra.mrb[16].mxu1 %vm792_vm2, %v6223_v49  ;;  %v7695_v49 = vld [vmem:[#allocation2 + $0xc0] sm:$0xff]  }
 0x154   : > { %6828 = vmatprep.mubr.msk.bf16.mxu1 %vm792_vm2, %v6224_v33  ;;  %v4275_v33 = vsel %vm8327_vm10, %v4273_v26, %v4274_v18  ;;  %v4195_v18 = vld [vmem:[#allocation2 + $0x88] sm:$0xf] }
 0x155   : > { %6945 = vmatmul.mubr.msk.bf16.vlgmr.msra.gmra.mrb[0].mxu0 %vm792_vm2, %v7672_v37  ;;  %v4181_v37 = vld [vmem:[#allocation2 + $0x50] sm:$0x1] }
 0x156   : > { %6977 = vmatpush3.bf16.msra.mxu0 %v8581_v61  ;;  %6948 = vmatprep.mubr.msk.bf16.mxu0 %vm792_vm2, %v7673_v38  ;;  %v1807_v61 = vsel %vm8533_vm13, %v6212_v35, %v1806_v25  ;;  %v6411_v25 = vrot.slane %v4173_v21, 9  ;;  %v4178_v35 = vld [vmem:[#allocation2 + $0x44] sm:$0x1] }
 0x157   : > { %7010 = vmatprep.subr.bf16.mxu0 %v8729_v60  ;;  %v6228_v56 = vcombine.low %v1807_v61, %v1810_v52  ;;  %v7694_v38 = vld [vmem:[#allocation2 + $0xe4] sm:$0xff]   ;;  %v4281_v42 = vrot.slane %v4178_v35, 5  ;;  %v4327_v35 = vrot.slane %v4198_v27, 5 }
 0x158   : > { %v4272_v32 = vsel %vm8327_vm10, %v6411_v25, %v4271_v20 }
 0x159   : > { %v6427_v39 = vcombine.low %v4272_v32, %v4275_v33  ;;  %v4282_v51 = vsel %vm8327_vm10, %v4280_v41, %v4281_v42  ;;  %v4194_v33 = vld [vmem:[#allocation2 + $0x84] sm:$0xe]  ;;  %v4323_v41 = vrot.slane %v4196_v34, 5  ;;  %v4215_v34 = vld [vmem:[#allocation2 + $0xd8] sm:$0xe] }
 0x15a   : > { %v6428_v59 = vcombine.low %v4279_v50, %v4282_v51 }
 0x15b   : > { %6829 = vmatmul.mubr.msk.bf16.gmra.mrb[20].mxu1 %vm792_vm2, %v6225_v43  ;;  %v6413_v43 = vrot.slane %v4179_v4, 9  ;;  %v4199_v4 = vld [vmem:[#allocation2 + $0x98] sm:$0x1] }
 0x15c   : > { %6832 = vmatprep.mubr.msk.bf16.mxu1 %vm792_vm2, %v6226_v45  ;;  %v4288_v45 = vrot.slane %v4181_v37, 5 }
 0x15d   : > { %6949 = vmatmul.mubr.msk.bf16.gmra.mrb[4].mxu0 %vm792_vm2, %v7674_v46  ;;  %v4183_v46 = vld [vmem:[#allocation2 + $0x58] sm:$0xf]  ;;  %v4286_v52 = vsel %vm8327_vm10, %v6413_v43, %v4285_v36  ;;  %v4197_v36 = vld [vmem:[#allocation2 + $0x90] sm:$0xe]  ;;  %v4329_v43 = vrot.slane %v4327_v35, 4 }
 0x15e   : > { %6952 = vmatprep.mubr.msk.bf16.mxu0 %vm792_vm2, %v7675_v47  ;;  %v7697_v47 = vld [vmem:[#allocation2 + $0xcc] sm:$0xff]   ;;  %v4292_v61 = vrot.slane %v4183_v46, 5  ;;  %v4289_v53 = vsel %vm8327_vm10, %v4287_v44, %v4288_v45  ;;  %v6419_v42 = vrot.slane %v4197_v36, 9  ;;  %v4330_v44 = vrot.slane %v4199_v4, 5  ;;  %v4201_v45 = vld [vmem:[#allocation2 + $0xa0] sm:$0xf] }
 0x15f   : > { %v4204_v46 = vld [vmem:[#allocation2 + $0xac] sm:$0xf]  ;;  %v4334_v50 = vrot.slane %v4201_v45, 5 }
 0x160   : > { %v4294_v0 = vrot.slane %v4292_v61, 4  ;;  %v4328_v51 = vsel %vm8327_vm10, %v6419_v42, %v4327_v35  ;;  %v4341_v54 = vrot.slane %v4204_v46, 5  ;;  %v4217_v35 = vld [vmem:[#allocation2 + $0xe0] sm:$0x1] }
 0x161   : > { %v4372_v42 = vrot.slane %v4217_v35, 5 }
 0x163   : > { %6833 = vmatmul.mubr.msk.bf16.gmra.mrb[24].mxu1 %vm792_vm2, %v6227_v55  ;;  %v4184_v55 = vld [vmem:[#allocation2 + $0x5c] sm:$0x1] }
 0x164   : > { %6836 = vmatprep.mubr.msk.bf16.mxu1 %vm792_vm2, %v6228_v56  ;;  %v4299_v56 = vrot.slane %v4186_v48, 5 }
 0x165   : > { %6953 = vmatmul.mubr.msk.bf16.gmra.mrb[8].mxu0 %vm792_vm2, %v7676_v62  ;;  %v6429_v62 = vcombine.low %v4286_v52, %v4289_v53  ;;  %v4200_v52 = vld [vmem:[#allocation2 + $0x9c] sm:$0xe]  ;;  %v4202_v53 = vld [vmem:[#allocation2 + $0xa4] sm:$0x1] }
 0x166   : > { %6956 = vmatprep.mubr.msk.bf16.mxu0 %vm792_vm2, %v7677_v1  ;;  %v4295_v1 = vrot.slane %v4184_v55, 5  ;;  %v4203_v55 = vld [vmem:[#allocation2 + $0xa8] sm:$0xe] }
 0x16b   : > { %6837 = vmatmul.mubr.msk.bf16.gmra.mrb[28].mxu1 %vm792_vm2, %v6229_v2  ;;  %v6415_v2 = vrot.slane %v4185_v57, 9 }
 0x16c   : > { %6854 = vmatprep.mubr.msk.bf16.mxu1 %vm792_vm2, %v7679_v3  ;;  %v4301_v3 = vrot.slane %v4299_v56, 4 }
 0x16d   : > { %6957 = vmatmul.mubr.msk.bf16.gmra.mrb[12].mxu0 %vm792_vm2, %v7678_v5  ;;  %v4302_v5 = vrot.slane %v4187_v58, 5 }
 0x16e   : > { %6960 = vmatprep.mubr.msk.bf16.mxu0 %vm792_vm2, %v7680_v6  ;;  %v4189_v6 = vld [vmem:[#allocation2 + $0x70] sm:$0xf] }
 0x173   : > { %6855 = vmatmul.mubr.msk.bf16.vlgmr.msra.gmra.mrb[12].mxu1 %vm792_vm2, %v7681_v8  ;;  %v4192_v8 = vld [vmem:[#allocation2 + $0x7c] sm:$0xf] }
 0x174   : > { %6858 = vmatprep.mubr.msk.bf16.mxu1 %vm792_vm2, %v7683_v9  ;;  %v4293_v9 = vsel %vm8327_vm10, %v6414_v63, %v4292_v61  ;;  %v4331_v61 = vsel %vm8327_vm10, %v4329_v43, %v4330_v44  ;;  %v4337_v63 = vrot.slane %v4202_v53, 5  ;;  %v4219_v43 = vld [vmem:[#allocation2 + $0xe8] sm:$0xf]  ;;  %v4744_v44 = vld [vmem:[#allocation2 + $0x34] sm:$0xf] }
 0x175   : > { %6961 = vmatmul.mubr.msk.bf16.gmra.mrb[16].mxu0 %vm792_vm2, %v7682_v10  ;;  %v4296_v10 = vsel %vm8327_vm10, %v4294_v0, %v4295_v1  ;;  %v6435_v58 = vcombine.low %v4328_v51, %v4331_v61  ;;  %v6421_v0 = vrot.slane %v4203_v55, 9  ;;  %v4343_v1 = vrot.slane %v4341_v54, 4  ;;  %v4218_v51 = vld [vmem:[#allocation2 + $0xe4] sm:$0xe]  ;;  %v4220_v61 = vld [vmem:[#allocation2 + $0xec] sm:$0x1] }
 0x176   : > { %6964 = vmatprep.mubr.msk.bf16.mxu0 %vm792_vm2, %v7684_v12  ;;  %v4306_v12 = vrot.slane %v4189_v6, 5  ;;  %v4743_v53 = vld [vmem:[#allocation2 + $0x30] sm:$0xc] }
 0x178   : > { %v4308_v22 = vrot.slane %v4306_v12, 4 }
 0x17b   : > { %6859 = vmatmul.mubr.msk.bf16.gmra.mrb[16].mxu1 %vm792_vm2, %v7685_v13  ;;  %v4300_v13 = vsel %vm8327_vm10, %v6415_v2, %v4299_v56  ;;  %v4205_v56 = vld [vmem:[#allocation2 + $0xb0] sm:$0x1] }
 0x17c   : > { %6862 = vmatprep.mubr.msk.bf16.mxu1 %vm792_vm2, %v7687_v14  ;;  %v4303_v14 = vsel %vm8327_vm10, %v4301_v3, %v4302_v5  ;;  %v4344_v2 = vrot.slane %v4205_v56, 5  ;;  %v4207_v3 = vld [vmem:[#allocation2 + $0xb8] sm:$0xf]  ;;  %v4210_v5 = vld [vmem:[#allocation2 + $0xc4] sm:$0xf] }
 0x17d   : > { %6965 = vmatmul.mubr.msk.bf16.gmra.mrb[20].mxu0 %vm792_vm2, %v7686_v15  ;;  %v4188_v15 = vld [vmem:[#allocation2 + $0x6c] sm:$0xe]  ;;  %v6431_v20 = vcombine.low %v4300_v13, %v4303_v14  ;;  %v4206_v13 = vld [vmem:[#allocation2 + $0xb4] sm:$0xe]  ;;  %v4208_v14 = vld [vmem:[#allocation2 + $0xbc] sm:$0x1] }
 0x17e   : > { %6968 = vmatprep.mubr.msk.bf16.mxu0 %vm792_vm2, %v7688_v16  ;;  %v4190_v16 = vld [vmem:[#allocation2 + $0x74] sm:$0x1]  ;;  %v6416_v21 = vrot.slane %v4188_v15, 9  ;;  %v4355_v15 = vrot.slane %v4210_v5, 5 }
 0x183   : > { %6863 = vmatmul.mubr.msk.bf16.gmra.mrb[20].mxu1 %vm792_vm2, %v7689_v17  ;;  %v4313_v17 = vrot.slane %v4192_v8, 5 }
 0x184   : > { %6866 = vmatprep.mubr.msk.bf16.mxu1 %vm792_vm2, %v7691_v19  ;;  %v6430_v19 = vcombine.low %v4293_v9, %v4296_v10  ;;  %v4348_v9 = vrot.slane %v4207_v3, 5  ;;  %v4342_v10 = vsel %vm8327_vm10, %v6421_v0, %v4341_v54  ;;  %v4745_v54 = vld [vmem:[#allocation2 + $0x38] sm:$0x3] }
 0x185   : > { %6969 = vmatmul.mubr.msk.bf16.gmra.mrb[24].mxu0 %vm792_vm2, %v7690_v23  ;;  %v4309_v23 = vrot.slane %v4190_v16, 5  ;;  %v4315_v25 = vrot.slane %v4313_v17, 4  ;;  %v4209_v16 = vld [vmem:[#allocation2 + $0xc0] sm:$0xe]  ;;  %v4844_v0 = vrot.slane %v4745_v54, 6 }
 0x186   : > { %6972 = vmatprep.mubr.msk.bf16.mxu0 %vm792_vm2, %v7692_v24  ;;  %v6417_v24 = vrot.slane %v4191_v7, 9 }
 0x187   : > { %v4310_v30 = vsel %vm8327_vm10, %v4308_v22, %v4309_v23  ;;  %v6423_v22 = vrot.slane %v4209_v16, 9  ;;  %v4357_v23 = vrot.slane %v4355_v15, 4 }
 0x188   : > { %v4314_v31 = vsel %vm8327_vm10, %v6417_v24, %v4313_v17  ;;  %v4211_v17 = vld [vmem:[#allocation2 + $0xc8] sm:$0x1] }
 0x189   : > { %v4358_v24 = vrot.slane %v4211_v17, 5 }
 0x18b   : > { %6867 = vmatmul.mubr.msk.bf16.gmra.mrb[24].mxu1 %vm792_vm2, %v7693_v29  ;;  %v4307_v29 = vsel %vm8327_vm10, %v6416_v21, %v4306_v12  ;;  %v4345_v12 = vsel %vm8327_vm10, %v4343_v1, %v4344_v2  ;;  %v4351_v21 = vrot.slane %v4208_v14, 5  ;;  %v4747_v1 = vld [vmem:[#allocation2 + $0x40] sm:$0xf]  ;;  %v4750_v2 = vld [vmem:[#allocation2 + $0x4c] sm:$0xf] }
 0x18c   : > { %6870 = vmatprep.mubr.msk.bf16.mxu1 %vm792_vm2, %v7695_v49  ;;  %v4320_v49 = vrot.slane %v4195_v18, 5  ;;  %v6432_v37 = vcombine.low %v4307_v29, %v4310_v30  ;;  %v4356_v30 = vsel %vm8327_vm10, %v6423_v22, %v4355_v15  ;;  %v4749_v14 = vld [vmem:[#allocation2 + $0x48] sm:$0xc]  ;;  %v4751_v15 = vld [vmem:[#allocation2 + $0x50] sm:$0x3] }
 0x18d   : > { %6973 = vmatmul.mubr.msk.bf16.gmra.mrb[28].mxu0 %vm792_vm2, %v7694_v38  ;;  %v4753_v22 = vld [vmem:[#allocation2 + $0x58] sm:$0xf] }
 0x18e   : > { %6978 = vmatprep.mubr.msk.bf16.mxu0 %vm792_vm2, %v6427_v39  ;;  %v6418_v39 = vrot.slane %v4194_v33, 9  ;;  %v4322_v40 = vrot.slane %v4320_v49, 4 }
 0x190   : > { %v4324_v48 = vsel %vm8327_vm10, %v4322_v40, %v4323_v41  ;;  %v6425_v40 = vrot.slane %v4215_v34, 9 }
 0x193   : > { %6871 = vmatmul.mubr.msk.bf16.gmra.mrb[28].mxu1 %vm792_vm2, %v7697_v47  ;;  %v4321_v47 = vsel %vm8327_vm10, %v6418_v39, %v4320_v49  ;;  %v4359_v49 = vsel %vm8327_vm10, %v4357_v23, %v4358_v24  ;;  %v4756_v23 = vld [vmem:[#allocation2 + $0x64] sm:$0xf] }
 0x194   : > { %v6434_v57 = vcombine.low %v4321_v47, %v4324_v48  ;;  %v6439_v4 = vcombine.low %v4356_v30, %v4359_v49  ;;  %v4376_v47 = vrot.slane %v4219_v43, 5  ;;  %v4754_v30 = vld [vmem:[#allocation2 + $0x5c] sm:$0x3]  ;;  %v4869_v49 = vrot.slane %v4756_v23, 6 }
 0x195   : > { %6979 = vmatmul.mubr.msk.bf16.vlgmr.msra.gmra.mrb[0].mxu0 %vm792_vm2, %v6428_v59  ;;  %v6420_v59 = vrot.slane %v4200_v52, 9  ;;  %v4841_v52 = vrot.slane %v4744_v44, 6 }
 0x196   : > { %7011 = vmatpush3.bf16.msra.mxu0 %v8729_v60  ;;  %6982 = vmatprep.mubr.msk.bf16.mxu0 %vm792_vm2, %v6429_v62  ;;  %v4193_v60 = vld [vmem:[#allocation2 + $0x80] sm:$0x1]  ;;  %v4336_v62 = vrot.slane %v4334_v50, 4 }
 0x197   : > { %v4316_v26 = vrot.slane %v4193_v60, 5  ;;  %v4335_v6 = vsel %vm8327_vm10, %v6420_v59, %v4334_v50  ;;  %v6437_v60 = vcombine.low %v4342_v10, %v4345_v12  ;;  %v4379_v59 = vrot.slane %v4220_v61, 5  ;;  %v4746_v10 = vld [vmem:[#allocation2 + $0x3c] sm:$0xc]  ;;  %v4748_v12 = vld [vmem:[#allocation2 + $0x44] sm:$0x3] }
 0x198   : > { %v4338_v8 = vsel %vm8327_vm10, %v4336_v62, %v4337_v63  ;;  %v6460_v62 = vrot.slane %v4743_v53, 10  ;;  %v4843_v63 = vrot.slane %v4841_v52, 4  ;;  %v4763_v61 = vld [vmem:[#allocation2 + $0x80] sm:$0x3] }
 0x199   : > { %v4317_v32 = vsel %vm8327_vm10, %v4315_v25, %v4316_v26  ;;  %v6436_v7 = vcombine.low %v4335_v6, %v4338_v8  ;;  %v4213_v25 = vld [vmem:[#allocation2 + $0xd0] sm:$0xf]  ;;  %v4216_v26 = vld [vmem:[#allocation2 + $0xdc] sm:$0xf]  ;;  %v4848_v6 = vrot.slane %v4747_v1, 6 }
 0x19a   : > { %v6433_v38 = vcombine.low %v4314_v31, %v4317_v32  ;;  %v4362_v29 = vrot.slane %v4213_v25, 5  ;;  %v4212_v31 = vld [vmem:[#allocation2 + $0xcc] sm:$0xe]  ;;  %v4214_v32 = vld [vmem:[#allocation2 + $0xd4] sm:$0x1]  ;;  %v4369_v33 = vrot.slane %v4216_v26, 5  ;;  %v4842_v8 = vsel %vm8533_vm13, %v6460_v62, %v4841_v52 }
 0x19b   : > { %v4365_v39 = vrot.slane %v4214_v32, 5  ;;  %v4862_v26 = vrot.slane %v4753_v22, 6  ;;  %v4757_v32 = vld [vmem:[#allocation2 + $0x68] sm:$0x3] }
 0x19c   : > { %v4371_v41 = vrot.slane %v4369_v33, 4  ;;  %v4370_v48 = vsel %vm8327_vm10, %v6425_v40, %v4369_v33  ;;  %v4759_v40 = vld [vmem:[#allocation2 + $0x70] sm:$0xf]  ;;  %v4765_v62 = vld [vmem:[#allocation2 + $0x88] sm:$0xf] }
 0x19d   : > { %6983 = vmatmul.mubr.msk.bf16.gmra.mrb[4].mxu0 %vm792_vm2, %v6430_v19  ;;  %v6422_v19 = vrot.slane %v4206_v13, 9  ;;  %v4855_v13 = vrot.slane %v4750_v2, 6  ;;  %v4876_v44 = vrot.slane %v4759_v40, 6  ;;  %v4890_v2 = vrot.slane %v4765_v62, 6 }
 0x19e   : > { %6986 = vmatprep.mubr.msk.bf16.mxu0 %vm792_vm2, %v6431_v20  ;;  %v4350_v20 = vrot.slane %v4348_v9, 4  ;;  %v4373_v50 = vsel %vm8327_vm10, %v4371_v41, %v4372_v42  ;;  %v4762_v41 = vld [vmem:[#allocation2 + $0x7c] sm:$0xf] }
 0x19f   : > { %v4349_v18 = vsel %vm8327_vm10, %v6422_v19, %v4348_v9  ;;  %v6441_v56 = vcombine.low %v4370_v48, %v4373_v50  ;;  %v4845_v9 = vsel %vm8533_vm13, %v4843_v63, %v4844_v0  ;;  %v4851_v19 = vrot.slane %v4748_v12, 6  ;;  %v4760_v48 = vld [vmem:[#allocation2 + $0x74] sm:$0x3]  ;;  %v4769_v12 = vld [vmem:[#allocation2 + $0x98] sm:$0x3] }
 0x1a0   : > { %v4352_v27 = vsel %vm8327_vm10, %v4350_v20, %v4351_v21  ;;  %v6476_v17 = vcombine.low %v4842_v8, %v4845_v9  ;;  %v6462_v20 = vrot.slane %v4749_v14, 10  ;;  %v4857_v11 = vrot.slane %v4855_v13, 4  ;;  %v4768_v63 = vld [vmem:[#allocation2 + $0x94] sm:$0xf]  ;;  %v4766_v8 = vld [vmem:[#allocation2 + $0x8c] sm:$0x3] }
 0x1a1   : > { %v6438_v36 = vcombine.low %v4349_v18, %v4352_v27  ;;  %v4858_v21 = vrot.slane %v4751_v15, 6  ;;  %v4883_v50 = vrot.slane %v4762_v41, 6  ;;  %v4897_v9 = vrot.slane %v4768_v63, 6 }
 0x1a2   : > { %v4856_v18 = vsel %vm8533_vm13, %v6462_v20, %v4855_v13  ;;  %v4771_v20 = vld [vmem:[#allocation2 + $0xa0] sm:$0xf] }
 0x1a3   : > { %v4859_v27 = vsel %vm8533_vm13, %v4857_v11, %v4858_v21  ;;  %v4774_v11 = vld [vmem:[#allocation2 + $0xac] sm:$0xf]  ;;  %v4904_v23 = vrot.slane %v4771_v20, 6 }
 0x1a4   : > { %v6478_v34 = vcombine.low %v4856_v18, %v4859_v27  ;;  %v4772_v18 = vld [vmem:[#allocation2 + $0xa4] sm:$0x3]  ;;  %v4911_v27 = vrot.slane %v4774_v11, 6 }
 0x1a5   : > { %6987 = vmatmul.mubr.msk.bf16.gmra.mrb[8].mxu0 %vm792_vm2, %v6432_v37  ;;  %v6424_v37 = vrot.slane %v4212_v31, 9  ;;  %v4755_v31 = vld [vmem:[#allocation2 + $0x60] sm:$0xc] }
 0x1a6   : > { %6990 = vmatprep.mubr.msk.bf16.mxu0 %vm792_vm2, %v6433_v38  ;;  %v4364_v38 = vrot.slane %v4362_v29, 4 }
 0x1a7   : > { %v4363_v45 = vsel %vm8327_vm10, %v6424_v37, %v4362_v29  ;;  %v4752_v29 = vld [vmem:[#allocation2 + $0x54] sm:$0xc]  ;;  %v6464_v37 = vrot.slane %v4755_v31, 10 }
 0x1a8   : > { %v4366_v46 = vsel %vm8327_vm10, %v4364_v38, %v4365_v39  ;;  %v6463_v35 = vrot.slane %v4752_v29, 10  ;;  %v4871_v38 = vrot.slane %v4869_v49, 4  ;;  %v4872_v39 = vrot.slane %v4757_v32, 6  ;;  %v4773_v29 = vld [vmem:[#allocation2 + $0xa8] sm:$0xc] }
 0x1a9   : > { %v6440_v55 = vcombine.low %v4363_v45, %v4366_v46  ;;  %v4870_v45 = vsel %vm8533_vm13, %v6464_v37, %v4869_v49  ;;  %v4777_v37 = vld [vmem:[#allocation2 + $0xb8] sm:$0xf] }
 0x1aa   : > { %v4863_v42 = vsel %vm8533_vm13, %v6463_v35, %v4862_v26  ;;  %v4873_v46 = vsel %vm8533_vm13, %v4871_v38, %v4872_v39  ;;  %v6470_v35 = vrot.slane %v4773_v29, 10  ;;  %v4780_v38 = vld [vmem:[#allocation2 + $0xc4] sm:$0xf]  ;;  %v4918_v41 = vrot.slane %v4777_v37, 6 }
 0x1ab   : > { %v6480_v53 = vcombine.low %v4870_v45, %v4873_v46  ;;  %v4778_v45 = vld [vmem:[#allocation2 + $0xbc] sm:$0x3]  ;;  %v4925_v46 = vrot.slane %v4780_v38, 6 }
 0x1ad   : > { %6991 = vmatmul.mubr.msk.bf16.gmra.mrb[12].mxu0 %vm792_vm2, %v6434_v57  ;;  %v6426_v57 = vrot.slane %v4218_v51, 9  ;;  %v4761_v51 = vld [vmem:[#allocation2 + $0x78] sm:$0xc] }
 0x1ae   : > { %6994 = vmatprep.mubr.msk.bf16.mxu0 %vm792_vm2, %v6435_v58  ;;  %v4378_v58 = vrot.slane %v4376_v47, 4 }
 0x1af   : > { %v4377_v3 = vsel %vm8327_vm10, %v6426_v57, %v4376_v47  ;;  %v4758_v47 = vld [vmem:[#allocation2 + $0x6c] sm:$0xc]  ;;  %v6466_v57 = vrot.slane %v4761_v51, 10 }
 0x1b0   : > { %v4380_v5 = vsel %vm8327_vm10, %v4378_v58, %v4379_v59  ;;  %v6465_v54 = vrot.slane %v4758_v47, 10  ;;  %v4885_v58 = vrot.slane %v4883_v50, 4  ;;  %v4886_v59 = vrot.slane %v4763_v61, 6  ;;  %v4779_v47 = vld [vmem:[#allocation2 + $0xc0] sm:$0xc] }
 0x1b1   : > { %v6442_v16 = vcombine.low %v4377_v3, %v4380_v5  ;;  %v4884_v3 = vsel %vm8533_vm13, %v6466_v57, %v4883_v50  ;;  %v4783_v57 = vld [vmem:[#allocation2 + $0xd0] sm:$0xf] }
 0x1b2   : > { %v4877_v0 = vsel %vm8533_vm13, %v6465_v54, %v4876_v44  ;;  %v4887_v5 = vsel %vm8533_vm13, %v4885_v58, %v4886_v59  ;;  %v6472_v54 = vrot.slane %v4779_v47, 10  ;;  %v4786_v58 = vld [vmem:[#allocation2 + $0xdc] sm:$0xf]  ;;  %v4932_v63 = vrot.slane %v4783_v57, 6  ;;  %v5315_v57 = vld [vmem:[#allocation9 + $0x10] sm:$0xff] }
 0x1b3   : > { %v6482_v14 = vcombine.low %v4884_v3, %v4887_v5  ;;  %v4784_v3 = vld [vmem:[#allocation2 + $0xd4] sm:$0x3]  ;;  %v4939_v5 = vrot.slane %v4786_v58, 6 }
 0x1b4   : > { %v5316_v58 = vld [vmem:[#allocation9 + $0x18] sm:$0xff] }
 0x1b5   : > { %6995 = vmatmul.mubr.msk.bf16.gmra.mrb[16].mxu0 %vm792_vm2, %v6436_v7  ;;  %v6461_v7 = vrot.slane %v4746_v10, 10  ;;  %v4767_v10 = vld [vmem:[#allocation2 + $0x90] sm:$0xc] }
 0x1b6   : > { %6998 = vmatprep.mubr.msk.bf16.mxu0 %vm792_vm2, %v6437_v60  ;;  %v4850_v60 = vrot.slane %v4848_v6, 4 }
 0x1b7   : > { %v4849_v24 = vsel %vm8533_vm13, %v6461_v7, %v4848_v6  ;;  %v4764_v6 = vld [vmem:[#allocation2 + $0x84] sm:$0xc]  ;;  %v6468_v7 = vrot.slane %v4767_v10, 10 }
 0x1b8   : > { %v4852_v25 = vsel %vm8533_vm13, %v4850_v60, %v4851_v19  ;;  %v6467_v15 = vrot.slane %v4764_v6, 10  ;;  %v4899_v60 = vrot.slane %v4897_v9, 4  ;;  %v4900_v19 = vrot.slane %v4769_v12, 6  ;;  %v4785_v6 = vld [vmem:[#allocation2 + $0xd8] sm:$0xc] }
 0x1b9   : > { %v6477_v33 = vcombine.low %v4849_v24, %v4852_v25  ;;  %v4898_v24 = vsel %vm8533_vm13, %v6468_v7, %v4897_v9  ;;  %v4789_v7 = vld [vmem:[#allocation2 + $0xe8] sm:$0xf] }
 0x1ba   : > { %v4891_v21 = vsel %vm8533_vm13, %v6467_v15, %v4890_v2  ;;  %v4901_v25 = vsel %vm8533_vm13, %v4899_v60, %v4900_v19  ;;  %v6474_v15 = vrot.slane %v4785_v6, 10  ;;  %v4946_v20 = vrot.slane %v4789_v7, 6  ;;  %v5319_v6 = vld [vmem:[#allocation9 + $0x30] sm:$0xff] }
 0x1bb   : > { %v6484_v31 = vcombine.low %v4898_v24, %v4901_v25  ;;  %v5323_v7 = vld [vmem:[#allocation9 + $0x50] sm:$0xff] }
 0x1bc   : > { %v4940_v11 = vsel %vm8533_vm13, %v6474_v15, %v4939_v5  ;;  %v5321_v15 = vld [vmem:[#allocation9 + $0x40] sm:$0xff] }
 0x1bd   : > { %6999 = vmatmul.mubr.msk.bf16.gmra.mrb[20].mxu0 %vm792_vm2, %v6438_v36  ;;  %v4864_v36 = vrot.slane %v4862_v26, 4  ;;  %v4770_v26 = vld [vmem:[#allocation2 + $0x9c] sm:$0xc] }
 0x1be   : > { %7002 = vmatprep.mubr.msk.bf16.mxu0 %vm792_vm2, %v6439_v4  ;;  %v4865_v4 = vrot.slane %v4754_v30, 6  ;;  %v4775_v30 = vld [vmem:[#allocation2 + $0xb0] sm:$0x3]  ;;  %v6469_v32 = vrot.slane %v4770_v26, 10 }
 0x1c0   : > { %v4866_v43 = vsel %vm8533_vm13, %v4864_v36, %v4865_v4  ;;  %v4913_v36 = vrot.slane %v4911_v27, 4  ;;  %v4914_v4 = vrot.slane %v4775_v30, 6  ;;  %v4905_v39 = vsel %vm8533_vm13, %v6469_v32, %v4904_v23 }
 0x1c1   : > { %v6479_v52 = vcombine.low %v4863_v42, %v4866_v43  ;;  %v4912_v42 = vsel %vm8533_vm13, %v6470_v35, %v4911_v27 }
 0x1c2   : > { %v4915_v43 = vsel %vm8533_vm13, %v4913_v36, %v4914_v4 }
 0x1c3   : > { %v6486_v51 = vcombine.low %v4912_v42, %v4915_v43 }
 0x1c5   : > { %7003 = vmatmul.mubr.msk.bf16.gmra.mrb[24].mxu0 %vm792_vm2, %v6440_v55  ;;  %v4878_v55 = vrot.slane %v4876_v44, 4  ;;  %v4776_v44 = vld [vmem:[#allocation2 + $0xb4] sm:$0xc] }
 0x1c6   : > { %7006 = vmatprep.mubr.msk.bf16.mxu0 %vm792_vm2, %v6441_v56  ;;  %v4879_v56 = vrot.slane %v4760_v48, 6  ;;  %v4781_v48 = vld [vmem:[#allocation2 + $0xc8] sm:$0x3]  ;;  %v6471_v61 = vrot.slane %v4776_v44, 10 }
 0x1c8   : > { %v4880_v1 = vsel %vm8533_vm13, %v4878_v55, %v4879_v56  ;;  %v4927_v55 = vrot.slane %v4925_v46, 4  ;;  %v4928_v56 = vrot.slane %v4781_v48, 6  ;;  %v4919_v59 = vsel %vm8533_vm13, %v6471_v61, %v4918_v41  ;;  %v5314_v61 = vld [vmem:[#allocation9 + $0x8] sm:$0xff] }
 0x1c9   : > { %v6481_v13 = vcombine.low %v4877_v0, %v4880_v1  ;;  %v4926_v0 = vsel %vm8533_vm13, %v6472_v54, %v4925_v46 }
 0x1ca   : > { %v4929_v1 = vsel %vm8533_vm13, %v4927_v55, %v4928_v56 }
 0x1cb   : > { %v6488_v10 = vcombine.low %v4926_v0, %v4929_v1  ;;  %v5317_v0 = vld [vmem:[#allocation9 + $0x20] sm:$0xff]  ;;  %v5318_v1 = vld [vmem:[#allocation9 + $0x28] sm:$0xff] }
 0x1cd   : > { %7007 = vmatmul.mubr.msk.bf16.gmra.mrb[28].mxu0 %vm792_vm2, %v6442_v16  ;;  %v4892_v16 = vrot.slane %v4890_v2, 4  ;;  %v4782_v2 = vld [vmem:[#allocation2 + $0xcc] sm:$0xc] }
 0x1ce   : > { %7012 = vmatprep.mubr.msk.bf16.mxu0 %vm792_vm2, %v6476_v17  ;;  %v4893_v17 = vrot.slane %v4766_v8, 6  ;;  %v4787_v8 = vld [vmem:[#allocation2 + $0xe0] sm:$0x3]  ;;  %v6473_v12 = vrot.slane %v4782_v2, 10 }
 0x1d0   : > { %v4894_v22 = vsel %vm8533_vm13, %v4892_v16, %v4893_v17  ;;  %v4941_v16 = vrot.slane %v4939_v5, 4  ;;  %v4942_v17 = vrot.slane %v4787_v8, 6  ;;  %v4933_v60 = vsel %vm8533_vm13, %v6473_v12, %v4932_v63  ;;  %v5320_v8 = vld [vmem:[#allocation9 + $0x38] sm:$0xff] }
 0x1d1   : > { %v6483_v49 = vcombine.low %v4891_v21, %v4894_v22  ;;  %v4788_v22 = vld [vmem:[#allocation2 + $0xe4] sm:$0xc] }
 0x1d2   : > { %v4943_v21 = vsel %vm8533_vm13, %v4941_v16, %v4942_v17  ;;  %v6475_v26 = vrot.slane %v4788_v22, 10  ;;  %v5322_v16 = vld [vmem:[#allocation9 + $0x48] sm:$0xff]  ;;  %v5327_v22 = vld [vmem:[#allocation9 + $0x70] sm:$0xff] }
 0x1d3   : > { %v6490_v25 = vcombine.low %v4940_v11, %v4943_v21  ;;  %v9021_v17 = vpack.c.bf16 %v5322_v16, %v5321_v15  ;;  %v5326_v11 = vld [vmem:[#allocation9 + $0x68] sm:$0xff] }
 0x1d4   : > { %v4947_v32 = vsel %vm8533_vm13, %v6475_v26, %v4946_v20 }
 0x1d5   : > { %7013 = vmatmul.mubr.msk.bf16.vlgmr.msra.gmra.mrb[0].mxu0 %vm792_vm2, %v6477_v33  ;;  %v4906_v33 = vrot.slane %v4904_v23, 4  ;;  %v4790_v23 = vld [vmem:[#allocation2 + $0xec] sm:$0x3] }
 0x1d6   : > { %7016 = vmatprep.mubr.msk.bf16.mxu0 %vm792_vm2, %v6478_v34  ;;  %v4907_v34 = vrot.slane %v4772_v18, 6  ;;  %v4948_v18 = vrot.slane %v4946_v20, 4  ;;  %v4949_v27 = vrot.slane %v4790_v23, 6  ;;  %v5325_v20 = vld [vmem:[#allocation9 + $0x60] sm:$0xff]  ;;  %v5328_v23 = vld [vmem:[#allocation9 + $0x78] sm:$0xff] }
 0x1d7   : > { %v9029_v21 = vpack.c.bf16 %v5326_v11, %v5325_v20 }
 0x1d8   : > { %v4908_v40 = vsel %vm8533_vm13, %v4906_v33, %v4907_v34  ;;  %v4950_v33 = vsel %vm8533_vm13, %v4948_v18, %v4949_v27 }
 0x1d9   : > { %v6485_v50 = vcombine.low %v4905_v39, %v4908_v40  ;;  %v6491_v34 = vcombine.low %v4947_v32, %v4950_v33 }
 0x1dd   : > { %7017 = vmatmul.mubr.msk.bf16.gmra.mrb[4].mxu0 %vm792_vm2, %v6479_v52  ;;  %v4920_v52 = vrot.slane %v4918_v41, 4 }
 0x1de   : > { %7020 = vmatprep.mubr.msk.bf16.mxu0 %vm792_vm2, %v6480_v53  ;;  %v4921_v53 = vrot.slane %v4778_v45, 6 }
 0x1e0   : > { %v4922_v62 = vsel %vm8533_vm13, %v4920_v52, %v4921_v53 }
 0x1e1   : > { %v6487_v9 = vcombine.low %v4919_v59, %v4922_v62  ;;  %v8993_v59 = vpack.c.bf16 %v5316_v58, %v5315_v57 }
 0x1e5   : > { %7021 = vmatmul.mubr.msk.bf16.gmra.mrb[8].mxu0 %vm792_vm2, %v6481_v13  ;;  %v4934_v13 = vrot.slane %v4932_v63, 4 }
 0x1e6   : > { %7024 = vmatprep.mubr.msk.bf16.mxu0 %vm792_vm2, %v6482_v14  ;;  %v4935_v14 = vrot.slane %v4784_v3, 6  ;;  %v9003_v3 = vpack.c.bf16 %v5318_v1, %v5317_v0 }
 0x1e8   : > { %v4936_v19 = vsel %vm8533_vm13, %v4934_v13, %v4935_v14 }
 0x1e9   : > { %v6489_v24 = vcombine.low %v4933_v60, %v4936_v19  ;;  %v5324_v60 = vld [vmem:[#allocation9 + $0x58] sm:$0xff] }
 0x1ea   : > { %v9025_v19 = vpack.c.bf16 %v5324_v60, %v5323_v7 }
 0x1ed   : > { %7025 = vmatmul.mubr.msk.bf16.gmra.mrb[12].mxu0 %vm792_vm2, %v6483_v49 }
 0x1ee   : > { %7028 = vmatprep.mubr.msk.bf16.mxu0 %vm792_vm2, %v6484_v31 }
 0x1f5   : > { %7029 = vmatmul.mubr.msk.bf16.gmra.mrb[16].mxu0 %vm792_vm2, %v6485_v50  ;;  %v7916_v50 = vmov 0.0|0.0  }
 0x1f6   : > { %7032 = vmatprep.mubr.msk.bf16.mxu0 %vm792_vm2, %v6486_v51  ;;  %7184 = vmatprep.subr.bf16.mxu1 %v7916_v50  ;;  %v5313_v51 = vld [vmem:[#allocation9] sm:$0xff] }
 0x1f7   : > { %v8981_v52 = vpack.c.bf16 %v5314_v61, %v5313_v51 }
 0x1f9   : > { %7186 = vmatpush3.bf16.msra.mxu1 %v8981_v52 }
 0x1fa   : > { %7187 = vmatprep.subr.bf16.mxu1 %v7916_v50 }
 0x1fd   : > { %7033 = vmatmul.mubr.msk.bf16.gmra.mrb[20].mxu0 %vm792_vm2, %v6487_v9  ;;  %7189 = vmatpush3.bf16.msra.mxu1 %v8993_v59  ;;  %v9009_v9 = vpack.c.bf16 %v5320_v8, %v5319_v6 }
 0x1fe   : > { %7036 = vmatprep.mubr.msk.bf16.mxu0 %vm792_vm2, %v6488_v10  ;;  %7190 = vmatprep.subr.bf16.mxu1 %v7916_v50 }
 0x201   : > { %7192 = vmatpush3.bf16.msra.mxu1 %v9003_v3 }
 0x202   : > { %7193 = vmatprep.subr.bf16.mxu1 %v7916_v50 }
 0x205   : > { %7037 = vmatmul.mubr.msk.bf16.gmra.mrb[24].mxu0 %vm792_vm2, %v6489_v24  ;;  %7195 = vmatpush3.bf16.msra.mxu1 %v9009_v9  ;;  %v9033_v24 = vpack.c.bf16 %v5328_v23, %v5327_v22 }
 0x206   : > { %v8933_v29 = vpop.f32.mrb[0].mxu1  ;;  %7040 = vmatprep.mubr.msk.bf16.mxu0 %vm792_vm2, %v6490_v25  ;;  %7196 = vmatprep.subr.bf16.mxu1 %v7916_v50  ;;  %v7918_v25 = vmov 0.0  }
 0x207   : > { %v8935_v30 = vpop.f32.mrb[1].mxu1  ;;  %7076 = vmatprep.mubr.msk.f32.mxu1 %vm7917_vm14, %v7918_v25 }
 0x208   : > { %v8938_v49 = vpop.f32.mrb[2].mxu1 }
 0x209   : > { %v8940_v31 = vpop.f32.mrb[3].mxu1  ;;  %7198 = vmatpush3.bf16.msra.mxu1 %v9021_v17 }
 0x20a   : > { %7199 = vmatprep.subr.bf16.mxu1 %v7916_v50 }
 0x20d   : > { %7041 = vmatmul.mubr.msk.bf16.gmra.mrb[28].mxu0 %vm792_vm2, %v6491_v34  ;;  %7201 = vmatpush3.bf16.msra.mxu1 %v9025_v19 }
 0x20e   : > { %v8947_v35 = vpop.f32.mrb[4].mxu1  ;;  %7202 = vmatprep.subr.bf16.mxu1 %v7916_v50 }
 0x20f   : > { %v8949_v36 = vpop.f32.mrb[5].mxu1 }
 0x210   : > { %v8952_v4 = vpop.f32.mrb[6].mxu1 }
 0x211   : > { %v8954_v37 = vpop.f32.mrb[7].mxu1  ;;  %7204 = vmatpush3.bf16.msra.mxu1 %v9029_v21 }
 0x212   : > { %7205 = vmatprep.subr.bf16.mxu1 %v7916_v50 }
 0x215   : > { %7207 = vmatpush3.bf16.msra.mxu1 %v9033_v24 }
 0x216   : > { %v8956_v38 = vpop.f32.mrb[8].mxu1  ;;  %7208 = vmatprep.subr.bf16.mxu1 %v7916_v50 }
 0x217   : > { %v8958_v39 = vpop.f32.mrb[9].mxu1 }
 0x218   : > { %v8960_v40 = vpop.f32.mrb[10].mxu1 }
 0x219   : > { %v8962_v41 = vpop.f32.mrb[11].mxu1 }
 0x246   : > { %v8964_v28 = vpop.f32.mrb[12].mxu1 }
 0x247   : > { %v8966_v42 = vpop.f32.mrb[13].mxu1 }
 0x248   : > { %v8968_v43 = vpop.f32.mrb[14].mxu1 }
 0x249   : > { %v8970_v44 = vpop.f32.mrb[15].mxu1 }
 0x24e   : > { %v8972_v45 = vpop.f32.mrb[16].mxu1 }
 0x24f   : > { %v8974_v46 = vpop.f32.mrb[17].mxu1 }
 0x250   : > { %v8976_v47 = vpop.f32.mrb[18].mxu1 }
 0x251   : > { %v8978_v48 = vpop.f32.mrb[19].mxu1 }
 0x256   : > { %v8983_v53 = vpop.f32.mrb[20].mxu1 }
 0x257   : > { %v8985_v54 = vpop.f32.mrb[21].mxu1 }
 0x258   : > { %v8988_v55 = vpop.f32.mrb[22].mxu1 }
 0x259   : > { %v8991_v56 = vpop.f32.mrb[23].mxu1 }
 0x25e   : > { %v8995_v62 = vpop.f32.mrb[24].mxu1 }
 0x25f   : > { %v8998_v63 = vpop.f32.mrb[25].mxu1 }
 0x260   : > { %v9001_v2 = vpop.f32.mrb[26].mxu1 }
 0x261   : > { %v9005_v5 = vpop.f32.mrb[27].mxu1 }
 0x266   : > { %v9011_v10 = vpop.f32.mrb[28].mxu1 }
 0x267   : > { %v9014_v12 = vpop.f32.mrb[29].mxu1 }
 0x268   : > { %v9017_v13 = vpop.f32.mrb[30].mxu1 }
 0x269   : > { %v9019_v14 = vpop.f32.mrb[31].mxu1 }
 0x2a8   : > { %v7014_v26 = vpop.f32.mrb[0].mxu0 }
 0x2a9   : > { %v9040_v18 = vadd.f32 %v7014_v26, %v8933_v29  ;;  %v5090_v27 = vpop.f32.mrb[1].mxu0 }
 0x2aa   : > { %v9043_v32 = vadd.f32 %v5090_v27, %v8935_v30  ;;  %v7015_v33 = vpop.f32.mrb[2].mxu0 }
 0x2ab   : > { %v9046_v34 = vadd.f32 %v7015_v33, %v8938_v49  ;;  %v5093_v51 = vpop.f32.mrb[3].mxu0 }
 0x2ac   : > { %v9049_v61 = vadd.f32 %v5093_v51, %v8940_v31 }
 0x2ae   : > { %v5377_v57 = vadd.f32 %v9049_v61, %v9043_v32 }
 0x2b0   : > { %v5378_v58 = vadd.f32 %v9040_v18, %v5377_v57  ;;  %v7018_v0 = vpop.f32.mrb[4].mxu0 }
 0x2b1   : > { %v9055_v29 = vadd.f32 %v7018_v0, %v8947_v35  ;;  %v5106_v1 = vpop.f32.mrb[5].mxu0 }
 0x2b2   : > { %v9058_v30 = vadd.f32 %v5106_v1, %v8949_v36  ;;  %v5379_v49 = vadd.f32 %v9046_v34, %v5378_v58  ;;  %v7019_v6 = vpop.f32.mrb[6].mxu0 }
 0x2b3   : > { %v9062_v8 = vadd.f32 %v7019_v6, %v8952_v4  ;;  %v5109_v31 = vpop.f32.mrb[7].mxu0 }
 0x2b4   : > { %v5380_v15 = vadd.f32 %v9058_v30, %v5379_v49  ;;  %v9066_v16 = vadd.f32 %v5109_v31, %v8954_v37 }
 0x2b6   : > { %v5381_v7 = vadd.f32 %v9066_v16, %v5380_v15 }
 0x2b8   : > { %v5382_v35 = vadd.f32 %v9055_v29, %v5381_v7  ;;  %v7022_v60 = vpop.f32.mrb[8].mxu0 }
 0x2b9   : > { %v9071_v36 = vadd.f32 %v7022_v60, %v8956_v38  ;;  %v5122_v20 = vpop.f32.mrb[9].mxu0 }
 0x2ba   : > { %v9074_v11 = vadd.f32 %v5122_v20, %v8958_v39  ;;  %v5383_v4 = vadd.f32 %v9062_v8, %v5382_v35  ;;  %v7023_v22 = vpop.f32.mrb[10].mxu0 }
 0x2bb   : > { %v9078_v23 = vadd.f32 %v7023_v22, %v8960_v40  ;;  %v5125_v37 = vpop.f32.mrb[11].mxu0 }
 0x2bc   : > { %v5384_v26 = vadd.f32 %v9074_v11, %v5383_v4  ;;  %v9082_v27 = vadd.f32 %v5125_v37, %v8962_v41 }
 0x2be   : > { %v5385_v33 = vadd.f32 %v9082_v27, %v5384_v26 }
 0x2c0   : > { %v5386_v38 = vadd.f32 %v9071_v36, %v5385_v33  ;;  %v7026_v51 = vpop.f32.mrb[12].mxu0 }
 0x2c1   : > { %v9087_v39 = vadd.f32 %v7026_v51, %v8964_v28  ;;  %v5138_v57 = vpop.f32.mrb[13].mxu0 }
 0x2c2   : > { %v9090_v58 = vadd.f32 %v5138_v57, %v8966_v42  ;;  %v5387_v40 = vadd.f32 %v9078_v23, %v5386_v38  ;;  %v7027_v0 = vpop.f32.mrb[14].mxu0 }
 0x2c3   : > { %v9094_v1 = vadd.f32 %v7027_v0, %v8968_v43  ;;  %v5141_v41 = vpop.f32.mrb[15].mxu0 }
 0x2c4   : > { %v5388_v49 = vadd.f32 %v9090_v58, %v5387_v40  ;;  %v9098_v6 = vadd.f32 %v5141_v41, %v8970_v44 }
 0x2c6   : > { %v5389_v31 = vadd.f32 %v9098_v6, %v5388_v49 }
 0x2c8   : > { %v5390_v28 = vadd.f32 %v9087_v39, %v5389_v31  ;;  %v7030_v15 = vpop.f32.mrb[16].mxu0 }
 0x2c9   : > { %v9103_v42 = vadd.f32 %v7030_v15, %v8972_v45  ;;  %v5154_v7 = vpop.f32.mrb[17].mxu0 }
 0x2ca   : > { %v9106_v35 = vadd.f32 %v5154_v7, %v8974_v46  ;;  %v5391_v43 = vadd.f32 %v9094_v1, %v5390_v28  ;;  %v7031_v60 = vpop.f32.mrb[18].mxu0 }
 0x2cb   : > { %v9110_v20 = vadd.f32 %v7031_v60, %v8976_v47  ;;  %v5157_v44 = vpop.f32.mrb[19].mxu0 }
 0x2cc   : > { %v5392_v4 = vadd.f32 %v9106_v35, %v5391_v43  ;;  %v9114_v22 = vadd.f32 %v5157_v44, %v8978_v48 }
 0x2ce   : > { %v5393_v37 = vadd.f32 %v9114_v22, %v5392_v4 }
 0x2d0   : > { %v5394_v45 = vadd.f32 %v9103_v42, %v5393_v37  ;;  %v7034_v26 = vpop.f32.mrb[20].mxu0 }
 0x2d1   : > { %v9119_v46 = vadd.f32 %v7034_v26, %v8983_v53  ;;  %v5170_v33 = vpop.f32.mrb[21].mxu0 }
 0x2d2   : > { %v9122_v38 = vadd.f32 %v5170_v33, %v8985_v54  ;;  %v5395_v47 = vadd.f32 %v9110_v20, %v5394_v45  ;;  %v7035_v51 = vpop.f32.mrb[22].mxu0 }
 0x2d3   : > { %v9126_v57 = vadd.f32 %v7035_v51, %v8988_v55  ;;  %v5173_v48 = vpop.f32.mrb[23].mxu0 }
 0x2d4   : > { %v5396_v40 = vadd.f32 %v9122_v38, %v5395_v47  ;;  %v9130_v0 = vadd.f32 %v5173_v48, %v8991_v56 }
 0x2d6   : > { %v5397_v41 = vadd.f32 %v9130_v0, %v5396_v40 }
 0x2d8   : > { %v5398_v53 = vadd.f32 %v9119_v46, %v5397_v41  ;;  %v7038_v49 = vpop.f32.mrb[24].mxu0 }
 0x2d9   : > { %v9135_v54 = vadd.f32 %v7038_v49, %v8995_v62  ;;  %v5186_v31 = vpop.f32.mrb[25].mxu0 }
 0x2da   : > { %v9138_v28 = vadd.f32 %v5186_v31, %v8998_v63  ;;  %v5399_v55 = vadd.f32 %v9126_v57, %v5398_v53  ;;  %v7039_v15 = vpop.f32.mrb[26].mxu0  ;;  %v5329_v31 = vld [vmem:[#allocation10] sm:$0xff] }
 0x2db   : > { %v9142_v7 = vadd.f32 %v7039_v15, %v9001_v2  ;;  %v5189_v56 = vpop.f32.mrb[27].mxu0 }
 0x2dc   : > { %v5400_v43 = vadd.f32 %v9138_v28, %v5399_v55  ;;  %v9146_v60 = vadd.f32 %v5189_v56, %v9005_v5  ;;  %v5330_v55 = vld [vmem:[#allocation10 + $0x8] sm:$0xff] }
 0x2dd   : > { %v9167_v15 = vpack.c.bf16 %v5330_v55, %v5329_v31  ;;  %v5343_v55 = vld [vmem:[#allocation10 + $0x70] sm:$0xff] }
 0x2de   : > { %v5401_v44 = vadd.f32 %v9146_v60, %v5400_v43  ;;  %v5331_v43 = vld [vmem:[#allocation10 + $0x10] sm:$0xff] }
 0x2e0   : > { %v5402_v62 = vadd.f32 %v9135_v54, %v5401_v44  ;;  %v7042_v4 = vpop.f32.mrb[28].mxu0  ;;  %v5332_v44 = vld [vmem:[#allocation10 + $0x18] sm:$0xff] }
 0x2e1   : > { %v9151_v63 = vadd.f32 %v7042_v4, %v9011_v10  ;;  %v5202_v37 = vpop.f32.mrb[29].mxu0  ;;  %v5334_v4 = vld [vmem:[#allocation10 + $0x28] sm:$0xff] }
 0x2e2   : > { %v9154_v45 = vadd.f32 %v5202_v37, %v9014_v12  ;;  %v5403_v2 = vadd.f32 %v9142_v7, %v5402_v62  ;;  %v7043_v26 = vpop.f32.mrb[30].mxu0  ;;  %v5333_v62 = vld [vmem:[#allocation10 + $0x20] sm:$0xff] }
 0x2e3   : > { %v9158_v33 = vadd.f32 %v7043_v26, %v9017_v13  ;;  %v5205_v5 = vpop.f32.mrb[31].mxu0  ;;  %v9176_v37 = vpack.c.bf16 %v5334_v4, %v5333_v62  ;;  %v5336_v26 = vld [vmem:[#allocation10 + $0x38] sm:$0xff] }
 0x2e4   : > { %v5404_v47 = vadd.f32 %v9154_v45, %v5403_v2  ;;  %v9162_v51 = vadd.f32 %v5205_v5, %v9019_v14  ;;  %v9170_v14 = vpack.c.bf16 %v5332_v44, %v5331_v43  ;;  %v5335_v2 = vld [vmem:[#allocation10 + $0x30] sm:$0xff] }
 0x2e5   : > { %v9180_v5 = vpack.c.bf16 %v5336_v26, %v5335_v2 }
 0x2e6   : > { %v5405_v48 = vadd.f32 %v9162_v51, %v5404_v47  ;;  %v5337_v47 = vld [vmem:[#allocation10 + $0x40] sm:$0xff] }
 0x2e8   : > { %v5406_v10 = vadd.f32 %v9151_v63, %v5405_v48  ;;  %v5338_v48 = vld [vmem:[#allocation10 + $0x48] sm:$0xff] }
 0x2ea   : > { %v5407_v40 = vadd.f32 %v9158_v33, %v5406_v10  ;;  %v9184_v10 = vpack.c.bf16 %v5338_v48, %v5337_v47 }
 0x2ec   : > { %v5408_v12 = vrot.slane %v5407_v40, 4 }
 0x2ee   : > { %v5409_v41 = vadd.f32 %v5408_v12, %v5407_v40  ;;  %v5339_v40 = vld [vmem:[#allocation10 + $0x50] sm:$0xff]  ;;  %v5340_v12 = vld [vmem:[#allocation10 + $0x58] sm:$0xff] }
 0x2f0   : > { %v5410_v53 = vrot.slane %v5409_v41, 2 }
 0x2f2   : > { %v5411_v49 = vadd.f32 %v5410_v53, %v5409_v41  ;;  %v9188_v41 = vpack.c.bf16 %v5340_v12, %v5339_v40  ;;  %v5341_v53 = vld [vmem:[#allocation10 + $0x60] sm:$0xff] }
 0x2f4   : > { %v5412_v13 = vrot.slane %v5411_v49, 1 }
 0x2f6   : > { %v5413_v56 = vadd.f32 %v5412_v13, %v5411_v49  ;;  %v5342_v49 = vld [vmem:[#allocation10 + $0x68] sm:$0xff]  ;;  %v5344_v13 = vld [vmem:[#allocation10 + $0x78] sm:$0xff] }
 0x2f7   : > { %v9192_v31 = vpack.c.bf16 %v5342_v49, %v5341_v53 }
 0x2f8   : > { %7077 = vmatmul.mubr.f32.vlgmr.msra.gmra.mrb[32].mxu1 %v5413_v56  ;;  %v9197_v56 = vpack.c.bf16 %v5344_v13, %v5343_v55 }
 0x2f9   : > { %7210 = vmatpush3.bf16.msra.mxu1 %v9167_v15  ;;  %7111 = vmatprep.mubr.msk.f32.mxu1 %vm7917_vm14, %v7918_v25 }
 0x2fa   : > { %7211 = vmatprep.subr.bf16.mxu1 %v7916_v50 }
 0x2fd   : > { %7213 = vmatpush3.bf16.msra.mxu1 %v9170_v14 }
 0x2fe   : > { %7214 = vmatprep.subr.bf16.mxu1 %v7916_v50 }
 0x301   : > { %7216 = vmatpush3.bf16.msra.mxu1 %v9176_v37 }
 0x302   : > { %7217 = vmatprep.subr.bf16.mxu1 %v7916_v50 }
 0x305   : > { %7219 = vmatpush3.bf16.msra.mxu1 %v9180_v5 }
 0x306   : > { %7220 = vmatprep.subr.bf16.mxu1 %v7916_v50 }
 0x309   : > { %7222 = vmatpush3.bf16.msra.mxu1 %v9184_v10 }
 0x30a   : > { %7223 = vmatprep.subr.bf16.mxu1 %v7916_v50 }
 0x30d   : > { %7225 = vmatpush3.bf16.msra.mxu1 %v9188_v41 }
 0x30e   : > { %7226 = vmatprep.subr.bf16.mxu1 %v7916_v50 }
 0x311   : > { %7228 = vmatpush3.bf16.msra.mxu1 %v9192_v31 }
 0x312   : > { %7229 = vmatprep.subr.bf16.mxu1 %v7916_v50 }
 0x315   : > { %7231 = vmatpush3.bf16.msra.mxu1 %v9197_v56 }
 0x316   : > { %7232 = vmatprep.subr.bf16.mxu1 %v7916_v50 }
 0x3cb   : > { %v5480_v43 = vpop.f32.mrb[32].mxu1 }
 0x3cc   : > { %v5485_v44 = vmul.f32 0.00390625, %v5480_v43  ;;  %v7078_v62 = vpop.f32.mrb[33].mxu1 }
 0x3ce   : > { %7112 = vmatmul.mubr.f32.vlgmr.msra.gmra.mrb[34].mxu1 %v5485_v44 }
 0x3cf   : > { %7234 = vmatpush3.bf16.msra.mxu1 %v8981_v52  ;;  %7146 = vmatprep.mubr.msk.f32.mxu1 %vm7917_vm14, %v7918_v25  ;;  %v5556_v52 = vlaneseq }
 0x3d0   : > { %7235 = vmatprep.subr.bf16.mxu1 %v7916_v50 }
 0x3d3   : > { %7237 = vmatpush3.bf16.msra.mxu1 %v8993_v59  ;;  %v9219_v59 = vshrl.u32 %v5556_v52, 7 }
 0x3d4   : > { %7238 = vmatprep.subr.bf16.mxu1 %v7916_v50 }
 0x3d7   : > { %7240 = vmatpush3.bf16.msra.mxu1 %v9003_v3 }
 0x3d8   : > { %7241 = vmatprep.subr.bf16.mxu1 %v7916_v50 }
 0x3db   : > { %7243 = vmatpush3.bf16.msra.mxu1 %v9009_v9 }
 0x3dc   : > { %7244 = vmatprep.subr.bf16.mxu1 %v7916_v50 }
 0x3df   : > { %7246 = vmatpush3.bf16.msra.mxu1 %v9021_v17  ;;  %v5558_v17 = vsub.s32 0, %v9219_v59 }
 0x3e0   : > { %7247 = vmatprep.subr.bf16.mxu1 %v7916_v50 }
 0x3e3   : > { %7249 = vmatpush3.bf16.msra.mxu1 %v9025_v19 }
 0x3e4   : > { %7250 = vmatprep.subr.bf16.mxu1 %v7916_v50 }
 0x3e7   : > { %7252 = vmatpush3.bf16.msra.mxu1 %v9029_v21 }
 0x3e8   : > { %7253 = vmatprep.subr.bf16.mxu1 %v7916_v50 }
 0x3eb   : > { %7255 = vmatpush3.bf16.msra.mxu1 %v9033_v24 }
 0x3ec   : > { %7256 = vmatprep.subr.bf16.mxu1 %v7916_v50 }
 0x4a1   : > { %v5552_v3 = vpop.f32.mrb[34].mxu1 }
 0x4a2   : > { %v7113_v9 = vpop.f32.mrb[35].mxu1  ;;  %v9224_v19 = vrot.slane %v5552_v3, %v5558_v17 }
 0x4a4   : > { %v9228_v21 = vsub.f32 %v9043_v32, %v9224_v19  ;;  %v9232_v24 = vsub.f32 %v9049_v61, %v9224_v19  ;;  %v9236_v4 = vsub.f32 %v9040_v18, %v9224_v19  ;;  %v9244_v47 = vsub.f32 %v9046_v34, %v9224_v19 }
 0x4a5   : > { %v9248_v32 = vsub.f32 %v9058_v30, %v9224_v19  ;;  %v9254_v18 = vsub.f32 %v9066_v16, %v9224_v19  ;;  %v9260_v34 = vsub.f32 %v9055_v29, %v9224_v19  ;;  %v9266_v49 = vsub.f32 %v9062_v8, %v9224_v19 }
 0x4a6   : > { %v5592_v2 = vmul.f32 %v9228_v21, %v9228_v21  ;;  %v5593_v26 = vmul.f32 %v9232_v24, %v9232_v24  ;;  %v5594_v61 = vmul.f32 %v9236_v4, %v9236_v4  ;;  %v5595_v40 = vmul.f32 %v9244_v47, %v9244_v47 }
 0x4a7   : > { %v5596_v30 = vmul.f32 %v9248_v32, %v9248_v32  ;;  %v5597_v16 = vmul.f32 %v9254_v18, %v9254_v18  ;;  %v9272_v13 = vsub.f32 %v9074_v11, %v9224_v19  ;;  %v5598_v29 = vmul.f32 %v9260_v34, %v9260_v34 }
 0x4a8   : > { %v5624_v48 = vadd.f32 %v5593_v26, %v5592_v2  ;;  %v9278_v44 = vsub.f32 %v9082_v27, %v9224_v19  ;;  %v5599_v8 = vmul.f32 %v9266_v49, %v9266_v49  ;;  %v9284_v52 = vsub.f32 %v9071_v36, %v9224_v19 }
 0x4a9   : > { %v5600_v11 = vmul.f32 %v9272_v13, %v9272_v13  ;;  %v9290_v9 = vsub.f32 %v9078_v23, %v9224_v19  ;;  %v9296_v26 = vsub.f32 %v9090_v58, %v9224_v19 }
 0x4aa   : > { %v5625_v12 = vadd.f32 %v5624_v48, %v5594_v61  ;;  %v5601_v27 = vmul.f32 %v9278_v44, %v9278_v44  ;;  %v5602_v36 = vmul.f32 %v9284_v52, %v9284_v52  ;;  %v9302_v48 = vsub.f32 %v9098_v6, %v9224_v19 }
 0x4ab   : > { %v5603_v23 = vmul.f32 %v9290_v9, %v9290_v9  ;;  %v5604_v58 = vmul.f32 %v9296_v26, %v9296_v26 }
 0x4ac   : > { %v5626_v53 = vadd.f32 %v5625_v12, %v5595_v40  ;;  %v9308_v12 = vsub.f32 %v9087_v39, %v9224_v19  ;;  %v5605_v6 = vmul.f32 %v9302_v48, %v9302_v48 }
 0x4ae   : > { %v5627_v55 = vadd.f32 %v5626_v53, %v5596_v30  ;;  %v9314_v53 = vsub.f32 %v9094_v1, %v9224_v19  ;;  %v5606_v39 = vmul.f32 %v9308_v12, %v9308_v12 }
 0x4b0   : > { %v5628_v43 = vadd.f32 %v5627_v55, %v5597_v16  ;;  %v9320_v55 = vsub.f32 %v9106_v35, %v9224_v19  ;;  %v5607_v1 = vmul.f32 %v9314_v53, %v9314_v53 }
 0x4b2   : > { %v5629_v62 = vadd.f32 %v5628_v43, %v5598_v29  ;;  %v9326_v43 = vsub.f32 %v9114_v22, %v9224_v19  ;;  %v5608_v35 = vmul.f32 %v9320_v55, %v9320_v55 }
 0x4b4   : > { %v5630_v3 = vadd.f32 %v5629_v62, %v5599_v8  ;;  %v9332_v62 = vsub.f32 %v9103_v42, %v9224_v19  ;;  %v5609_v22 = vmul.f32 %v9326_v43, %v9326_v43 }
 0x4b6   : > { %v5631_v2 = vadd.f32 %v5630_v3, %v5600_v11  ;;  %v9338_v3 = vsub.f32 %v9110_v20, %v9224_v19  ;;  %v5610_v42 = vmul.f32 %v9332_v62, %v9332_v62 }
 0x4b8   : > { %v5632_v61 = vadd.f32 %v5631_v2, %v5601_v27  ;;  %v9344_v2 = vsub.f32 %v9122_v38, %v9224_v19  ;;  %v5611_v20 = vmul.f32 %v9338_v3, %v9338_v3 }
 0x4ba   : > { %v5633_v40 = vadd.f32 %v5632_v61, %v5602_v36  ;;  %v9350_v61 = vsub.f32 %v9130_v0, %v9224_v19  ;;  %v5612_v38 = vmul.f32 %v9344_v2, %v9344_v2 }
 0x4bc   : > { %v5634_v30 = vadd.f32 %v5633_v40, %v5603_v23  ;;  %v9356_v40 = vsub.f32 %v9119_v46, %v9224_v19  ;;  %v5613_v0 = vmul.f32 %v9350_v61, %v9350_v61 }
 0x4be   : > { %v5635_v16 = vadd.f32 %v5634_v30, %v5604_v58  ;;  %v9362_v30 = vsub.f32 %v9126_v57, %v9224_v19  ;;  %v5614_v46 = vmul.f32 %v9356_v40, %v9356_v40 }
 0x4c0   : > { %v5636_v29 = vadd.f32 %v5635_v16, %v5605_v6  ;;  %v9368_v16 = vsub.f32 %v9138_v28, %v9224_v19  ;;  %v5615_v57 = vmul.f32 %v9362_v30, %v9362_v30 }
 0x4c2   : > { %v5637_v8 = vadd.f32 %v5636_v29, %v5606_v39  ;;  %v9374_v29 = vsub.f32 %v9146_v60, %v9224_v19  ;;  %v5616_v28 = vmul.f32 %v9368_v16, %v9368_v16 }
 0x4c4   : > { %v5638_v11 = vadd.f32 %v5637_v8, %v5607_v1  ;;  %v9380_v8 = vsub.f32 %v9135_v54, %v9224_v19  ;;  %v5617_v60 = vmul.f32 %v9374_v29, %v9374_v29 }
 0x4c6   : > { %v5639_v27 = vadd.f32 %v5638_v11, %v5608_v35  ;;  %v9386_v11 = vsub.f32 %v9142_v7, %v9224_v19  ;;  %v5618_v54 = vmul.f32 %v9380_v8, %v9380_v8 }
 0x4c8   : > { %v5640_v36 = vadd.f32 %v5639_v27, %v5609_v22  ;;  %v9392_v27 = vsub.f32 %v9154_v45, %v9224_v19  ;;  %v5619_v7 = vmul.f32 %v9386_v11, %v9386_v11 }
 0x4ca   : > { %v5641_v23 = vadd.f32 %v5640_v36, %v5610_v42  ;;  %v9398_v36 = vsub.f32 %v9162_v51, %v9224_v19  ;;  %v5620_v45 = vmul.f32 %v9392_v27, %v9392_v27 }
 0x4cc   : > { %v5642_v58 = vadd.f32 %v5641_v23, %v5611_v20  ;;  %v9404_v23 = vsub.f32 %v9151_v63, %v9224_v19  ;;  %v5621_v51 = vmul.f32 %v9398_v36, %v9398_v36 }
 0x4ce   : > { %v5643_v6 = vadd.f32 %v5642_v58, %v5612_v38  ;;  %v9410_v58 = vsub.f32 %v9158_v33, %v9224_v19 }
 0x4d0   : > { %v5644_v39 = vadd.f32 %v5643_v6, %v5613_v0  ;;  %v5622_v6 = vmul.f32 %v9404_v23, %v9404_v23  ;;  %v5623_v63 = vmul.f32 %v9410_v58, %v9410_v58 }
 0x4d2   : > { %v5645_v1 = vadd.f32 %v5644_v39, %v5614_v46 }
 0x4d4   : > { %v5646_v35 = vadd.f32 %v5645_v1, %v5615_v57 }
 0x4d6   : > { %v5647_v22 = vadd.f32 %v5646_v35, %v5616_v28 }
 0x4d8   : > { %v5648_v42 = vadd.f32 %v5647_v22, %v5617_v60 }
 0x4da   : > { %v5649_v20 = vadd.f32 %v5648_v42, %v5618_v54 }
 0x4dc   : > { %v5650_v38 = vadd.f32 %v5649_v20, %v5619_v7 }
 0x4de   : > { %v5651_v0 = vadd.f32 %v5650_v38, %v5620_v45 }
 0x4e0   : > { %v5652_v46 = vadd.f32 %v5651_v0, %v5621_v51 }
 0x4e2   : > { %v5653_v39 = vadd.f32 %v5652_v46, %v5622_v6 }
 0x4e4   : > { %v5654_v57 = vadd.f32 %v5653_v39, %v5623_v63 }
 0x4e6   : > { %v5655_v1 = vrot.slane %v5654_v57, 4 }
 0x4e8   : > { %v5656_v28 = vadd.f32 %v5655_v1, %v5654_v57 }
 0x4ea   : > { %v5657_v35 = vrot.slane %v5656_v28, 2 }
 0x4ec   : > { %v5658_v60 = vadd.f32 %v5657_v35, %v5656_v28 }
 0x4ee   : > { %v5659_v22 = vrot.slane %v5658_v60, 1 }
 0x4f0   : > { %v5660_v33 = vadd.f32 %v5659_v22, %v5658_v60 }
 0x4f2   : > { %7147 = vmatmul.mubr.f32.vlgmr.msra.gmra.mrb[36].mxu1 %v5660_v33 }
 0x4f3   : > { %7258 = vmatpush3.bf16.msra.mxu1 %v9167_v15  ;;  %7181 = vmatprep.mubr.msk.f32.mxu1 %vm7917_vm14, %v7918_v25 }
 0x4f4   : > { %7259 = vmatprep.subr.bf16.mxu1 %v7916_v50 }
 0x4f7   : > { %7261 = vmatpush3.bf16.msra.mxu1 %v9170_v14 }
 0x4f8   : > { %7262 = vmatprep.subr.bf16.mxu1 %v7916_v50 }
 0x4fb   : > { %7264 = vmatpush3.bf16.msra.mxu1 %v9176_v37 }
 0x4fc   : > { %7265 = vmatprep.subr.bf16.mxu1 %v7916_v50 }
 0x4ff   : > { %7267 = vmatpush3.bf16.msra.mxu1 %v9180_v5 }
 0x500   : > { %7268 = vmatprep.subr.bf16.mxu1 %v7916_v50 }
 0x503   : > { %7270 = vmatpush3.bf16.msra.mxu1 %v9184_v10  ;;  %v5804_v10 = vld [vmem:[%s9616_s2] sm:$0x1] }
 0x504   : > { %7271 = vmatprep.subr.bf16.mxu1 %v7916_v50 }
 0x507   : > { %7273 = vmatpush3.bf16.msra.mxu1 %v9188_v41 }
 0x508   : > { %7274 = vmatprep.subr.bf16.mxu1 %v7916_v50 }
 0x50b   : > { %7276 = vmatpush3.bf16.msra.mxu1 %v9192_v31 }
 0x50c   : > { %7277 = vmatprep.subr.bf16.mxu1 %v7916_v50 }
 0x50f   : > { %7279 = vmatpush3.bf16.msra.mxu1 %v9197_v56 }
 0x5c5   : > { %v5727_v25 = vpop.f32.mrb[36].mxu1 }
 0x5c6   : > { %v5731_v15 = vmul.f32 0.00390625, %v5727_v25  ;;  %v7148_v14 = vpop.f32.mrb[37].mxu1 }
 0x5c8   : > { %v5732_v37 = vadd.f32 1e-05, %v5731_v15 }
 0x5ca   : > { %7698 = vrsqrt.f32 %v5732_v37 }
 0x5d4   : > { %v7699_v5 = vpop.eup %7698 }
 0x5d5   : > { %7182 = vmatmul.mubr.f32.vlgmr.msra.gmra.mrb[38].mxu1 %v7699_v5 }
 0x6a8   : > { %v5800_v41 = vpop.f32.mrb[38].mxu1 }
 0x6a9   : > { %v5805_v19 = vmul.f32 %v5804_v10, %v5800_v41  ;;  %v7183_v54 = vpop.f32.mrb[39].mxu1 }
 0x6ab   : > { %v5809_v31 = vrot.slane %v5805_v19, %v5558_v17 }
 0x6ad   : > { %v5810_v50 = vmul.f32 %v5809_v31, %v9228_v21  ;;  %v5811_v56 = vmul.f32 %v5809_v31, %v9232_v24  ;;  %v5812_v42 = vmul.f32 %v5809_v31, %v9236_v4  ;;  %v5813_v7 = vmul.f32 %v5809_v31, %v9244_v47 }
 0x6ae   : > { %v5814_v20 = vmul.f32 %v5809_v31, %v9248_v32  ;;  %v5815_v45 = vmul.f32 %v5809_v31, %v9254_v18  ;;  %v5816_v38 = vmul.f32 %v5809_v31, %v9260_v34  ;;  %v5817_v51 = vmul.f32 %v5809_v31, %v9266_v49 }
 0x6af   : > { %v5818_v0 = vmul.f32 %v5809_v31, %v9272_v13  ;;  %v5819_v59 = vmul.f32 %v5809_v31, %v9278_v44  ;;  %v5820_v17 = vmul.f32 %v5809_v31, %v9284_v52  ;;  %v5821_v21 = vmul.f32 %v5809_v31, %v9290_v9  ;;  %v6509_v44 = vld [vmem:[%s9617_s3] ss:$0 sm:$0xff] }
 0x6b0   : > { %v5822_v24 = vmul.f32 %v5809_v31, %v9296_v26  ;;  %v5823_v4 = vmul.f32 %v5809_v31, %v9302_v48  ;;  %v5824_v47 = vmul.f32 %v5809_v31, %v9308_v12  ;;  %v5825_v32 = vmul.f32 %v5809_v31, %v9314_v53 }
 0x6b1   : > { %v5826_v18 = vmul.f32 %v5809_v31, %v9320_v55  ;;  %v5827_v34 = vmul.f32 %v5809_v31, %v9326_v43  ;;  %v5828_v49 = vmul.f32 %v5809_v31, %v9332_v62  ;;  %v5829_v13 = vmul.f32 %v5809_v31, %v9338_v3 }
 0x6b2   : > { %v5830_v52 = vmul.f32 %v5809_v31, %v9344_v2  ;;  %v5831_v9 = vmul.f32 %v5809_v31, %v9350_v61  ;;  %v5832_v26 = vmul.f32 %v5809_v31, %v9356_v40  ;;  %v5833_v48 = vmul.f32 %v5809_v31, %v9362_v30 }
 0x6b3   : > { %v5834_v12 = vmul.f32 %v5809_v31, %v9368_v16  ;;  %v5835_v53 = vmul.f32 %v5809_v31, %v9374_v29  ;;  %v5836_v55 = vmul.f32 %v5809_v31, %v9380_v8  ;;  %v5837_v43 = vmul.f32 %v5809_v31, %v9386_v11 }
 0x6b4   : > { %v5838_v62 = vmul.f32 %v5809_v31, %v9392_v27  ;;  %v5839_v3 = vmul.f32 %v5809_v31, %v9398_v36  ;;  %v5840_v2 = vmul.f32 %v5809_v31, %v9404_v23  ;;  %v5841_v61 = vmul.f32 %v5809_v31, %v9410_v58 }
 0x6b5   : > { %v5849_v6 = vadd.f32 %v6509_v44, %v5810_v50  ;;  %v5850_v40 = vadd.f32 %v6509_v44, %v5811_v56  ;;  %v5851_v30 = vadd.f32 %v6509_v44, %v5812_v42  ;;  %v5852_v46 = vadd.f32 %v6509_v44, %v5813_v7 }
 0x6b6   : > { %v5853_v16 = vadd.f32 %v6509_v44, %v5814_v20  ;;  %v5854_v63 = vadd.f32 %v6509_v44, %v5815_v45  ;;  %v5855_v29 = vadd.f32 %v6509_v44, %v5816_v38  ;;  %v5856_v39 = vadd.f32 %v6509_v44, %v5817_v51 }
 0x6b7   : > { %v5857_v8 = vadd.f32 %v6509_v44, %v5818_v0  ;;  %v5858_v57 = vadd.f32 %v6509_v44, %v5819_v59  ;;  %v5859_v11 = vadd.f32 %v6509_v44, %v5820_v17  ;;  %v5860_v1 = vadd.f32 %v6509_v44, %v5821_v21 }
 0x6b8   : > { %v5861_v27 = vadd.f32 %v6509_v44, %v5822_v24  ;;  %v5862_v28 = vadd.f32 %v6509_v44, %v5823_v4  ;;  %v5863_v36 = vadd.f32 %v6509_v44, %v5824_v47  ;;  %v5864_v35 = vadd.f32 %v6509_v44, %v5825_v32 }
 0x6b9   : > { %v9476_v23 = vadd.f32 %v6509_v44, %v5826_v18  ;;  %v9478_v58 = vadd.f32 %v6509_v44, %v5827_v34  ;;  %v9480_v60 = vadd.f32 %v6509_v44, %v5828_v49  ;;  %v9482_v22 = vadd.f32 %v6509_v44, %v5829_v13 }
 0x6ba   : > { %v9484_v33 = vadd.f32 %v6509_v44, %v5830_v52  ;;  %v9486_v25 = vadd.f32 %v6509_v44, %v5831_v9  ;;  %v9488_v15 = vadd.f32 %v6509_v44, %v5832_v26  ;;  %v9490_v14 = vadd.f32 %v6509_v44, %v5833_v48 }
 0x6bb   : > { %v9492_v37 = vadd.f32 %v6509_v44, %v5834_v12  ;;  %v9494_v5 = vadd.f32 %v6509_v44, %v5835_v53  ;;  %v9496_v10 = vadd.f32 %v6509_v44, %v5836_v55  ;;  %v9498_v41 = vadd.f32 %v6509_v44, %v5837_v43 }
 0x6bc   : > { %v9500_v19 = vadd.f32 %v6509_v44, %v5838_v62  ;;  %v9502_v54 = vadd.f32 %v6509_v44, %v5839_v3  ;;  %v9504_v31 = vadd.f32 %v6509_v44, %v5840_v2  ;;  %v9506_v50 = vadd.f32 %v6509_v44, %v5841_v61 }
 0x6bd   : > { %v5881_v56 = vmax.f32 %v5849_v6, 0.0  ;;  %v5882_v42 = vmax.f32 %v5850_v40, 0.0  ;;  %v5883_v7 = vmax.f32 %v5851_v30, 0.0  ;;  %v5884_v20 = vmax.f32 %v5852_v46, 0.0 }
 0x6be   : > { %v5885_v45 = vmax.f32 %v5853_v16, 0.0  ;;  %v5886_v38 = vmax.f32 %v5854_v63, 0.0  ;;  %v5887_v51 = vmax.f32 %v5855_v29, 0.0  ;;  %v5888_v0 = vmax.f32 %v5856_v39, 0.0 }
 0x6bf   : > { %v5889_v59 = vmax.f32 %v5857_v8, 0.0  ;;  %v5890_v17 = vmax.f32 %v5858_v57, 0.0  ;;  %v5891_v21 = vmax.f32 %v5859_v11, 0.0  ;;  %v5892_v24 = vmax.f32 %v5860_v1, 0.0  ;;  %5913 = vst [vmem:[%s9508_s14] sm:$0xff] %v5881_v56  ;;  %5914 = vst [vmem:[%s9508_s14 + $0x8] sm:$0xff] %v5882_v42 }
 0x6c0   : > { %5915 = vst [vmem:[%s9508_s14 + $0x10] sm:$0xff] %v5883_v7  ;;  %5916 = vst [vmem:[%s9508_s14 + $0x18] sm:$0xff] %v5884_v20  ;;  %v5893_v4 = vmax.f32 %v5861_v27, 0.0  ;;  %v5894_v47 = vmax.f32 %v5862_v28, 0.0  ;;  %v5895_v32 = vmax.f32 %v5863_v36, 0.0  ;;  %v5896_v18 = vmax.f32 %v5864_v35, 0.0 }
 0x6c1   : > { %5917 = vst [vmem:[%s9508_s14 + $0x20] sm:$0xff] %v5885_v45  ;;  %5918 = vst [vmem:[%s9508_s14 + $0x28] sm:$0xff] %v5886_v38  ;;  %v5897_v34 = vmax.f32 %v9476_v23, 0.0  ;;  %v5898_v49 = vmax.f32 %v9478_v58, 0.0  ;;  %v5899_v13 = vmax.f32 %v9480_v60, 0.0  ;;  %v5900_v44 = vmax.f32 %v9482_v22, 0.0 }
 0x6c2   : > { %5919 = vst [vmem:[%s9508_s14 + $0x30] sm:$0xff] %v5887_v51  ;;  %5920 = vst [vmem:[%s9508_s14 + $0x38] sm:$0xff] %v5888_v0  ;;  %v5901_v52 = vmax.f32 %v9484_v33, 0.0  ;;  %v5902_v9 = vmax.f32 %v9486_v25, 0.0  ;;  %v5903_v26 = vmax.f32 %v9488_v15, 0.0  ;;  %v5904_v48 = vmax.f32 %v9490_v14, 0.0 }
 0x6c3   : > { %5921 = vst [vmem:[%s9508_s14 + $0x40] sm:$0xff] %v5889_v59  ;;  %5922 = vst [vmem:[%s9508_s14 + $0x48] sm:$0xff] %v5890_v17  ;;  %v5905_v12 = vmax.f32 %v9492_v37, 0.0  ;;  %v5906_v53 = vmax.f32 %v9494_v5, 0.0  ;;  %v5907_v55 = vmax.f32 %v9496_v10, 0.0  ;;  %v5908_v43 = vmax.f32 %v9498_v41, 0.0 }
 0x6c4   : > { %5923 = vst [vmem:[%s9508_s14 + $0x50] sm:$0xff] %v5891_v21  ;;  %5924 = vst [vmem:[%s9508_s14 + $0x58] sm:$0xff] %v5892_v24  ;;  %v5909_v62 = vmax.f32 %v9500_v19, 0.0  ;;  %v5910_v3 = vmax.f32 %v9502_v54, 0.0  ;;  %v5911_v2 = vmax.f32 %v9504_v31, 0.0  ;;  %v5912_v61 = vmax.f32 %v9506_v50, 0.0 }
 0x6c5   : > { %5925 = vst [vmem:[%s9508_s14 + $0x60] sm:$0xff] %v5893_v4  ;;  %5926 = vst [vmem:[%s9508_s14 + $0x68] sm:$0xff] %v5894_v47 }
 0x6c6   : > { %5927 = vst [vmem:[%s9508_s14 + $0x70] sm:$0xff] %v5895_v32  ;;  %5928 = vst [vmem:[%s9508_s14 + $0x78] sm:$0xff] %v5896_v18 }
 0x6c7   : > { %5929 = vst [vmem:[%s9508_s14 + $0x80] sm:$0xff] %v5897_v34  ;;  %5930 = vst [vmem:[%s9508_s14 + $0x88] sm:$0xff] %v5898_v49 }
 0x6c8   : > { %5931 = vst [vmem:[%s9508_s14 + $0x90] sm:$0xff] %v5899_v13  ;;  %5932 = vst [vmem:[%s9508_s14 + $0x98] sm:$0xff] %v5900_v44 }
 0x6c9   : > { %5933 = vst [vmem:[%s9508_s14 + $0xa0] sm:$0xff] %v5901_v52  ;;  %5934 = vst [vmem:[%s9508_s14 + $0xa8] sm:$0xff] %v5902_v9 }
 0x6ca   : > { %5935 = vst [vmem:[%s9508_s14 + $0xb0] sm:$0xff] %v5903_v26  ;;  %5936 = vst [vmem:[%s9508_s14 + $0xb8] sm:$0xff] %v5904_v48 }
 0x6cb   : > { %5937 = vst [vmem:[%s9508_s14 + $0xc0] sm:$0xff] %v5905_v12  ;;  %5938 = vst [vmem:[%s9508_s14 + $0xc8] sm:$0xff] %v5906_v53 }
 0x6cc   : > { %5939 = vst [vmem:[%s9508_s14 + $0xd0] sm:$0xff] %v5907_v55  ;;  %5940 = vst [vmem:[%s9508_s14 + $0xd8] sm:$0xff] %v5908_v43 }
 0x6cd   : > { %5941 = vst [vmem:[%s9508_s14 + $0xe0] sm:$0xff] %v5909_v62  ;;  %5942 = vst [vmem:[%s9508_s14 + $0xe8] sm:$0xff] %v5910_v3 }
 0x6ce   : > { %5943 = vst [vmem:[%s9508_s14 + $0xf0] sm:$0xff] %v5911_v2  ;;  %5944 = vst [vmem:[%s9508_s14 + $0xf8] sm:$0xff] %v5912_v61 }
 0x6cf   : > { %7828 = shalt.err (!%p7825_p0)
}
 0x6d0   : > { %s7829_s19 = scalar_lea.hbm %s9547_s28, 4096  ;;  %s7833_s9 = scalar_lea.hbm %s9620_s6, 8192 }
 0x6d1   : > { %p7830_p4 = scmp.ne.s32.totalorder %s9547_s28, %s7829_s19  ;;  %p7834_p12 = scmp.lt.u32.totalorder %s9547_s28, %s9620_s6 }
 0x6d2   : > { %p7835_p1 = scmp.lt.u32.totalorder %s7833_s9, %s7829_s19  ;;  %p7837_p13 = scmp.lt.u32.totalorder %s7829_s19, %s9547_s28 }
 0x6d3   : > { %p7831_p8 = pnand %p7830_p4, %p8114_p3 }
 0x6d4   : > { %p7836_p7 = por %p7835_p1, %p7834_p12 }
 0x6d5   : > { %p7832_p2 = pneg %p7831_p8 }
 0x6d6   : > { %p7838_p6 = por %p7837_p13, %p7836_p7 }
 0x6d8   : > { %p7839_p10 = pnand %p7838_p6, %p7832_p2 }
 0x6da   : > { %7842 = shalt.err (!%p7839_p10)
}
 0x6db   : > { %s7920_s14 = smov 128   ;;  %s7921_s13 = smov 8  }
 0x6dc   : > { %7552 = dma.vmem_to_hbm [thread:$0]  (%p8114_p3), %s9549_s16, 4096, %s9547_s28, %s5946_s30, %s7920_s14, %s7920_s14, %s7921_s13  }
 0x6dd PF: > { %s9655_s24 = sld [smem:[#allocation17_spill]]  ;;  %s9656_s27 = sld [smem:[#allocation18_spill]] }
 0x6de   : > { %p9658_p5 = scmp.ge.s32.totalorder %s7905_s26, 2 }
 0x6e3   : > { %s5975_s8 = sand.u32 1, %s9655_s24   ;;  %p9657_p11 = scmp.ne.s32.totalorder %s9656_s27, 0 }
 0x6e4   : > { %s5976_s20 = scalar_lea.sflag [#allocation6], %s5975_s8 }
 0x6e5   : > { %p7569_p9 = pnand %p9658_p5, %p9657_p11 }
 0x6e7   : > { %7880 = dma.done.wait (!%p7569_p9), %s5976_s20, 4096  }
 0x6e8   : > { %7882 = vsyncadd (!%p7569_p9), %s5976_s20, 4294963200  ;;  %s24_s26 = sadd.s32 1, %s7905_s26   ;;  %s9659_s21 = smov %s7889_s22 }
 0x6e9   : > { %p21_p0 = scmp.ge.s32.totalorder %s24_s26, 4   ;;  %s9660_s22 = smov %s7893_s23 }
 0x6ea   : > { %s9661_s23 = smov %s8123_s18  ;;  %s9662_s24 = smov %s7901_s25 }
 0x6eb   : > { %s9663_s25 = smov %s9665_s1  ;;  %23 = sbr.rel (!%p21_p0) target bundleno = 10 (0xa), region = 118 }
 0x6f2   :  { %5981 = vsyncpa [#allocation5], 1 }
 0x6f3   :  { %5983 = vsyncpa [#allocation5 + $0x1], 1 }
 0x6f4   :  { %5984 = vsyncpa [#allocation8], 1 }
 0x6f5   :  { %5985 = vsyncpa [#allocation11], 1 }
 0x6f6   :  { %5986 = vsyncpa [#allocation6], 1 }
 0x6f7   :  { %5988 = vsyncpa [#allocation6 + $0x1], 1 }

</bundles_post_ra>
